<compile_context>
chip_gen: v6e
topology: v6e:2x2x1
jax: 0.10.0
libtpu: 0.0.40
codegen_flags: <defaults>
</compile_context>

<pallas_src>
import functools

import jax
import jax.numpy as jnp
from jax import lax
from jax.experimental import pallas as pl
from jax.experimental.pallas import tpu as pltpu

MATMUL_DTYPE = jnp.bfloat16   # set to jnp.float32 for exact-f32 matmuls


# ----------------------------------------------------------------------------
# Fused kernel: one batch element per grid step.
# ----------------------------------------------------------------------------
def basic_block_kernel(x_ref, w1_ref, w2_ref, w3_ref, b1_ref, b23_ref, a_ref,
                       o_ref, xpad_ref, ypad_ref, *, H, W, C, WP, cdt):
    """out = PReLU( BN2(conv3x3(PReLU(BN1(conv3x3(x))))) + BN3(conv5x5(x)) )."""

    def conv(pad_ref, w_ref, K, off, acc):
        # The K distinct kh-slabs are loaded ONCE (hoisted out of the kw loop)
        # and concatenated along channels, so each kw tap is a single MXU dot
        # with contraction depth K*C.  The kw (width) shift is applied once per
        # tap on the f32 result -> only K misaligned sublane slices per conv.
        slabs = [pad_ref[off + kh: off + kh + H].reshape(H * WP, C)
                 for kh in range(K)]                     # bf16, no per-tap cast
        cat = jnp.concatenate(slabs, axis=-1)            # (H*WP, K*C)
        for kw in range(K):
            t = jnp.dot(cat, w_ref[kw], preferred_element_type=jnp.float32)
            c0 = off + kw
            t = t.reshape(H, WP, C)[:, c0:c0 + W, :]
            acc = t if acc is None else acc + t           # chain, no zero-init
        return acc

    # ---- zero-padded copy of x (pad=2 frame shared by the 3x3 and 5x5) ------
    # NOTE: zeroing is done every step; gating it on program_id(0)==0 would be
    # wrong when the "parallel" batch axis is split across TensorCores.
    xpad_ref[...] = jnp.zeros_like(xpad_ref)
    xpad_ref[2:2 + H, 2:2 + W, :] = x_ref[0].astype(cdt)   # single cast

    # ---- stage 1: y1 = PReLU(BN1(conv3x3(x)))   (BN1 scale folded into w1) --
    y1 = conv(xpad_ref, w1_ref, 3, 1, None) + b1_ref[0]
    y1 = jnp.where(y1 >= 0, y1, a_ref[0, 0] * y1)

    # y1 stays resident in VMEM (zero-padded pad=2 frame, bf16) for stage 2.
    ypad_ref[...] = jnp.zeros_like(ypad_ref)
    ypad_ref[2:2 + H, 2:2 + W, :] = y1.astype(cdt)          # single cast

    # ---- stage 2: out = PReLU(BN2(conv3x3(y1)) + BN3(conv5x5(x))) -----------
    z = conv(xpad_ref, w3_ref, 5, 0, None)      # 5x5 branch initialises acc
    z = conv(ypad_ref, w2_ref, 3, 1, z)         # 3x3 branch accumulates into it
    z = z + b23_ref[0]
    z = jnp.where(z >= 0, z, a_ref[0, 1] * z)
    o_ref[0] = z.astype(o_ref.dtype)


# ----------------------------------------------------------------------------
# Wrapper
# ----------------------------------------------------------------------------
def _round_up(x, m):
    return ((x + m - 1) // m) * m


def basic_block_pallas(x_nhwc, w1, w2, w3, b1, b23, alphas):
    N, H, W, C = x_nhwc.shape
    # Padded width: multiple of 16 so bf16 (16-row packed) slab reshapes and
    # first-dim slices of the scratch stay layout-free.
    WP = _round_up(W + 4, 16)

    kernel = functools.partial(basic_block_kernel, H=H, W=W, C=C, WP=WP,
                               cdt=MATMUL_DTYPE)
    return pl.pallas_call(
        kernel,
        out_shape=jax.ShapeDtypeStruct((N, H, W, C), jnp.float32),
        grid_spec=pltpu.PrefetchScalarGridSpec(
            num_scalar_prefetch=0,
            grid=(N,),
            in_specs=[
                pl.BlockSpec((1, H, W, C), lambda n: (n, 0, 0, 0)),
                pl.BlockSpec((3, 3 * C, C), lambda n: (0, 0, 0)),
                pl.BlockSpec((3, 3 * C, C), lambda n: (0, 0, 0)),
                pl.BlockSpec((5, 5 * C, C), lambda n: (0, 0, 0)),
                pl.BlockSpec((1, C), lambda n: (0, 0)),
                pl.BlockSpec((1, C), lambda n: (0, 0)),
                pl.BlockSpec((1, 2), lambda n: (0, 0),
                             memory_space=pltpu.MemorySpace.SMEM),
            ],
            out_specs=pl.BlockSpec((1, H, W, C), lambda n: (n, 0, 0, 0)),
            scratch_shapes=[
                pltpu.VMEM((H + 4, WP, C), MATMUL_DTYPE),   # zero-padded x
                pltpu.VMEM((H + 4, WP, C), MATMUL_DTYPE),   # zero-padded y1
            ],
        ),
        compiler_params=pltpu.CompilerParams(
            dimension_semantics=("parallel",)),              # v7x: 2 TCs split N
    )(x_nhwc, w1, w2, w3, b1, b23, alphas)


def fold_bn(gamma, beta, mean, var, conv_bias, eps=1e-5):
    """Fold inference-mode BN (+ conv bias) into per-channel scale/bias."""
    scale = gamma / jnp.sqrt(var + eps)                      # (C,)
    bias = beta + scale * (conv_bias - mean)                 # (C,)
    return scale, bias


def _regroup_weight(w_flat, scale, K, dtype):
    """(K*K, Cin, Cout) taps -> (K, K*Cin, Cout).

    For each kw, the K kh-taps are stacked along Cin so one MXU dot per kw
    contracts over K*Cin.  BN scale is folded in per output channel."""
    cin, cout = w_flat.shape[1], w_flat.shape[2]
    w = (w_flat * scale[None, None, :]).astype(dtype)
    w = w.reshape(K, K, cin, cout)             # (kh, kw, Cin, Cout)
    w = jnp.transpose(w, (1, 0, 2, 3))         # (kw, kh, Cin, Cout)
    return w.reshape(K, K * cin, cout)


def basic_block_forward(x_nchw, params):
    """Full BasicBlock forward. Input/output in NCHW like PyTorch."""
    x = jnp.transpose(x_nchw, (0, 2, 3, 1))                  # NCHW -> NHWC

    s1, b1 = fold_bn(params['g1'], params['be1'], params['m1'], params['v1'],
                     params['cb1'])
    s2, b2 = fold_bn(params['g2'], params['be2'], params['m2'], params['v2'],
                     params['cb2'])
    s3, b3 = fold_bn(params['g3'], params['be3'], params['m3'], params['v3'],
                     params['cb3'])

    w1 = _regroup_weight(params['w1'], s1, 3, MATMUL_DTYPE)
    w2 = _regroup_weight(params['w2'], s2, 3, MATMUL_DTYPE)
    w3 = _regroup_weight(params['w3'], s3, 5, MATMUL_DTYPE)
    b1 = b1.reshape(1, -1).astype(jnp.float32)
    b23 = (b2 + b3).reshape(1, -1).astype(jnp.float32)
    alphas = jnp.concatenate([params['a1'], params['a2']]).reshape(1, 2)
    alphas = alphas.astype(jnp.float32)

    out = basic_block_pallas(x, w1, w2, w3, b1, b23, alphas)
    return jnp.transpose(out, (0, 3, 1, 2))                  # NHWC -> NCHW


# ----------------------------------------------------------------------------
# Pure-JAX reference (f32 lax convs) for correctness check
# ----------------------------------------------------------------------------
def reference_forward(x_nchw, params):
    x = jnp.transpose(x_nchw, (0, 2, 3, 1))
    dn = ('NHWC', 'HWIO', 'NHWC')

    def conv(inp, w_flat, K, cb):
        w = w_flat.reshape(K, K, w_flat.shape[1], w_flat.shape[2])
        p = (K - 1) // 2
        return lax.conv_general_dilated(inp, w, (1, 1), [(p, p), (p, p)],
                                        dimension_numbers=dn) + cb

    def bn(inp, g, be, m, v, eps=1e-5):
        return (inp - m) / jnp.sqrt(v + eps) * g + be

    def prelu(inp, a):
        return jnp.where(inp >= 0, inp, a[0] * inp)

    y1 = prelu(bn(conv(x, params['w1'], 3, params['cb1']),
                  params['g1'], params['be1'], params['m1'], params['v1']),
               params['a1'])
    z = (bn(conv(y1, params['w2'], 3, params['cb2']),
            params['g2'], params['be2'], params['m2'], params['v2'])
         + bn(conv(x, params['w3'], 5, params['cb3']),
              params['g3'], params['be3'], params['m3'], params['v3']))
    z = prelu(z, params['a2'])
    return jnp.transpose(z, (0, 3, 1, 2))


# ----------------------------------------------------------------------------
def make_params(key, C):
    ks = jax.random.split(key, 16)
    f32 = jnp.float32
    return {
        # conv weights stored as (K*K, Cin, Cout)  (HWIO flattened)
        'w1': jax.random.normal(ks[0], (9, C, C), f32) * 0.05,
        'w2': jax.random.normal(ks[1], (9, C, C), f32) * 0.05,
        'w3': jax.random.normal(ks[2], (25, C, C), f32) * 0.03,
        'cb1': jax.random.normal(ks[3], (C,), f32) * 0.1,
        'cb2': jax.random.normal(ks[4], (C,), f32) * 0.1,
        'cb3': jax.random.normal(ks[5], (C,), f32) * 0.1,
        # BatchNorm params (inference / running stats)
        'g1': 1.0 + 0.1 * jax.random.normal(ks[6], (C,), f32),
        'be1': 0.1 * jax.random.normal(ks[7], (C,), f32),
        'm1': 0.1 * jax.random.normal(ks[8], (C,), f32),
        'v1': 1.0 + 0.1 * jax.random.uniform(ks[9], (C,), f32),
        'g2': 1.0 + 0.1 * jax.random.normal(ks[10], (C,), f32),
        'be2': 0.1 * jax.random.normal(ks[11], (C,), f32),
        'm2': 0.1 * jax.random.normal(ks[12], (C,), f32),
        'v2': 1.0 + 0.1 * jax.random.uniform(ks[13], (C,), f32),
        'g3': 1.0 + 0.1 * jax.random.normal(ks[14], (C,), f32),
        'be3': 0.1 * jax.random.normal(ks[15], (C,), f32),
        'm3': jnp.zeros((C,), f32),
        'v3': jnp.ones((C,), f32),
        # PReLU single-parameter (PyTorch default init 0.25)
        'a1': jnp.full((1,), 0.25, f32),
        'a2': jnp.full((1,), 0.25, f32),
    }


if __name__ == "__main__":
    N, C, H, W = 2, 128, 8, 8           # small shapes consistent with the module
    key = jax.random.PRNGKey(0)
    kx, kp = jax.random.split(key)
    x = jax.random.normal(kx, (N, C, H, W), jnp.float32)     # NCHW like PyTorch
    params = make_params(kp, C)

    out = jax.jit(basic_block_forward)(x, params)
    out = jax.block_until_ready(out)

    ref = reference_forward(x, params)
    assert out.shape == (N, C, H, W)

    # Tolerance covers bf16 rounding of the matmul inputs (accumulation and the
    # BN/PReLU epilogue stay f32).  With MATMUL_DTYPE = float32, 1e-2 suffices.
    if MATMUL_DTYPE == jnp.bfloat16:
        atol, rtol = 1.5e-1, 1e-1
    else:
        atol, rtol = 1e-2, 1e-2
    max_err = float(jnp.max(jnp.abs(out - ref)))
    mean_err = float(jnp.mean(jnp.abs(out - ref)))
    assert jnp.allclose(out, ref, atol=atol, rtol=rtol), (max_err, mean_err)
    assert mean_err < 5e-2, mean_err    # guards against systematic bugs

    print("KERNEL_OK")
</pallas_src>

<mosaic_0001>
module attributes {stable_mosaic.version = 11 : i64} {
  func.func @basic_block_kernel(%arg0: i32, %arg1: memref<1x8x8x128xf32, #tpu.memory_space<vmem>>, %arg2: memref<3x384x128xbf16, #tpu.memory_space<vmem>>, %arg3: memref<3x384x128xbf16, #tpu.memory_space<vmem>>, %arg4: memref<5x640x128xbf16, #tpu.memory_space<vmem>>, %arg5: memref<1x128xf32, #tpu.memory_space<vmem>>, %arg6: memref<1x128xf32, #tpu.memory_space<vmem>>, %arg7: memref<1x2xf32, #tpu.memory_space<smem>>, %arg8: memref<1x8x8x128xf32, #tpu.memory_space<vmem>>, %arg9: memref<12x16x128xbf16, #tpu.memory_space<vmem>>, %arg10: memref<12x16x128xbf16, #tpu.memory_space<vmem>>) attributes {dimension_semantics = [#tpu.dimension_semantics<parallel>], iteration_bounds = array<i64: 2>, scalar_prefetch = 0 : i64, scratch_operands = 2 : i64, tpu.core_type = #tpu.core_type<tc>, window_params = [{transform_indices = @transform_0, window_bounds = array<i64: 1, 8, 8, 128>}, {pipeline_mode = #tpu.pipeline_mode<synchronous>, transform_indices = @transform_1, window_bounds = array<i64: 3, 384, 128>}, {pipeline_mode = #tpu.pipeline_mode<synchronous>, transform_indices = @transform_2, window_bounds = array<i64: 3, 384, 128>}, {pipeline_mode = #tpu.pipeline_mode<synchronous>, transform_indices = @transform_3, window_bounds = array<i64: 5, 640, 128>}, {pipeline_mode = #tpu.pipeline_mode<synchronous>, transform_indices = @transform_4, window_bounds = array<i64: 1, 128>}, {pipeline_mode = #tpu.pipeline_mode<synchronous>, transform_indices = @transform_5, window_bounds = array<i64: 1, 128>}, {transform_indices = @transform_6, window_bounds = array<i64: 1, 2>}, {transform_indices = @transform_7, window_bounds = array<i64: 1, 8, 8, 128>}]} {
    %cst = arith.constant 0.000000e+00 : bf16
    %0 = vector.broadcast %cst : bf16 to vector<12x16x128xbf16>
    %c0 = arith.constant 0 : index
    %c0_0 = arith.constant 0 : index
    %c0_1 = arith.constant 0 : index
    %1 = vector.load %arg9[%c0, %c0_0, %c0_1] : memref<12x16x128xbf16, #tpu.memory_space<vmem>>, vector<12x16x128xbf16>
    tpu.vector_store %arg9[%c0, %c0_0, %c0_1], %0 {strides = array<i32>} : memref<12x16x128xbf16, #tpu.memory_space<vmem>>, vector<12x16x128xbf16>,
    %c0_2 = arith.constant 0 : index
    %c0_3 = arith.constant 0 : index
    %c0_4 = arith.constant 0 : index
    %c0_5 = arith.constant 0 : index
    %2 = vector.load %arg1[%c0_2, %c0_3, %c0_4, %c0_5] : memref<1x8x8x128xf32, #tpu.memory_space<vmem>>, vector<1x8x8x128xf32>
    %3 = vector.shape_cast %2 : vector<1x8x8x128xf32> to vector<8x8x128xf32>
    %4 = arith.truncf %3 : vector<8x8x128xf32> to vector<8x8x128xbf16>
    %c2 = arith.constant 2 : index
    %c2_6 = arith.constant 2 : index
    %c0_7 = arith.constant 0 : index
    %5 = vector.load %arg9[%c2, %c2_6, %c0_7] : memref<12x16x128xbf16, #tpu.memory_space<vmem>>, vector<8x8x128xbf16>
    tpu.vector_store %arg9[%c2, %c2_6, %c0_7], %4 {strides = array<i32>} : memref<12x16x128xbf16, #tpu.memory_space<vmem>>, vector<8x8x128xbf16>,
    %c1 = arith.constant 1 : index
    %c0_8 = arith.constant 0 : index
    %c0_9 = arith.constant 0 : index
    %6 = vector.load %arg9[%c1, %c0_8, %c0_9] : memref<12x16x128xbf16, #tpu.memory_space<vmem>>, vector<8x16x128xbf16>
    %7 = vector.shape_cast %6 : vector<8x16x128xbf16> to vector<128x128xbf16>
    %c2_10 = arith.constant 2 : index
    %c0_11 = arith.constant 0 : index
    %c0_12 = arith.constant 0 : index
    %8 = vector.load %arg9[%c2_10, %c0_11, %c0_12] : memref<12x16x128xbf16, #tpu.memory_space<vmem>>, vector<8x16x128xbf16>
    %9 = vector.shape_cast %8 : vector<8x16x128xbf16> to vector<128x128xbf16>
    %c3 = arith.constant 3 : index
    %c0_13 = arith.constant 0 : index
    %c0_14 = arith.constant 0 : index
    %10 = vector.load %arg9[%c3, %c0_13, %c0_14] : memref<12x16x128xbf16, #tpu.memory_space<vmem>>, vector<8x16x128xbf16>
    %11 = vector.shape_cast %10 : vector<8x16x128xbf16> to vector<128x128xbf16>
    %12 = tpu.concatenate %7, %9, %11 in 1 : vector<128x128xbf16>, vector<128x128xbf16>, vector<128x128xbf16> -> vector<128x384xbf16>
    %c0_15 = arith.constant 0 : index
    %c0_16 = arith.constant 0 : index
    %c0_17 = arith.constant 0 : index
    %13 = vector.load %arg2[%c0_15, %c0_16, %c0_17] : memref<3x384x128xbf16, #tpu.memory_space<vmem>>, vector<1x384x128xbf16>
    %14 = vector.shape_cast %13 : vector<1x384x128xbf16> to vector<384x128xbf16>
    %cst_18 = arith.constant dense<0.000000e+00> : vector<128x128xf32>
    %15 = tpu.matmul %12, %14, %cst_18 {dimension_numbers = #tpu.dot_dimension_numbers<[1], [0], [0], [1], [0, 0, 1, 1], [], []>} : vector<128x384xbf16>, vector<384x128xbf16>, vector<128x128xf32> -> vector<128x128xf32>
    %16 = vector.shape_cast %15 : vector<128x128xf32> to vector<8x16x128xf32>
    %17 = vector.extract_strided_slice %16 {offsets = [0, 1, 0], sizes = [8, 8, 128], strides = [1, 1, 1]} : vector<8x16x128xf32> to vector<8x8x128xf32>
    %c1_19 = arith.constant 1 : index
    %c0_20 = arith.constant 0 : index
    %c0_21 = arith.constant 0 : index
    %18 = vector.load %arg2[%c1_19, %c0_20, %c0_21] : memref<3x384x128xbf16, #tpu.memory_space<vmem>>, vector<1x384x128xbf16>
    %19 = vector.shape_cast %18 : vector<1x384x128xbf16> to vector<384x128xbf16>
    %cst_22 = arith.constant dense<0.000000e+00> : vector<128x128xf32>
    %20 = tpu.matmul %12, %19, %cst_22 {dimension_numbers = #tpu.dot_dimension_numbers<[1], [0], [0], [1], [0, 0, 1, 1], [], []>} : vector<128x384xbf16>, vector<384x128xbf16>, vector<128x128xf32> -> vector<128x128xf32>
    %21 = vector.shape_cast %20 : vector<128x128xf32> to vector<8x16x128xf32>
    %22 = vector.extract_strided_slice %21 {offsets = [0, 2, 0], sizes = [8, 8, 128], strides = [1, 1, 1]} : vector<8x16x128xf32> to vector<8x8x128xf32>
    %23 = arith.addf %17, %22 : vector<8x8x128xf32>
    %c2_23 = arith.constant 2 : index
    %c0_24 = arith.constant 0 : index
    %c0_25 = arith.constant 0 : index
    %24 = vector.load %arg2[%c2_23, %c0_24, %c0_25] : memref<3x384x128xbf16, #tpu.memory_space<vmem>>, vector<1x384x128xbf16>
    %25 = vector.shape_cast %24 : vector<1x384x128xbf16> to vector<384x128xbf16>
    %cst_26 = arith.constant dense<0.000000e+00> : vector<128x128xf32>
    %26 = tpu.matmul %12, %25, %cst_26 {dimension_numbers = #tpu.dot_dimension_numbers<[1], [0], [0], [1], [0, 0, 1, 1], [], []>} : vector<128x384xbf16>, vector<384x128xbf16>, vector<128x128xf32> -> vector<128x128xf32>
    %27 = vector.shape_cast %26 : vector<128x128xf32> to vector<8x16x128xf32>
    %28 = vector.extract_strided_slice %27 {offsets = [0, 3, 0], sizes = [8, 8, 128], strides = [1, 1, 1]} : vector<8x16x128xf32> to vector<8x8x128xf32>
    %29 = arith.addf %23, %28 : vector<8x8x128xf32>
    %c0_27 = arith.constant 0 : index
    %c0_28 = arith.constant 0 : index
    %30 = vector.load %arg5[%c0_27, %c0_28] : memref<1x128xf32, #tpu.memory_space<vmem>>, vector<1x128xf32>
    %31 = vector.shape_cast %30 : vector<1x128xf32> to vector<128xf32>
    %32 = vector.shape_cast %31 : vector<128xf32> to vector<1x1x128xf32>
    %33 = vector.broadcast %32 : vector<1x1x128xf32> to vector<8x8x128xf32>
    %34 = arith.addf %29, %33 : vector<8x8x128xf32>
    %cst_29 = arith.constant 0.000000e+00 : f32
    %35 = vector.broadcast %cst_29 : f32 to vector<8x8x128xf32>
    %36 = arith.cmpf oge, %34, %35 : vector<8x8x128xf32>
    %c0_30 = arith.constant 0 : index
    %c0_31 = arith.constant 0 : index
    %37 = memref.load %arg7[%c0_30, %c0_31] : memref<1x2xf32, #tpu.memory_space<smem>>
    %38 = vector.broadcast %37 : f32 to vector<8x8x128xf32>
    %39 = arith.mulf %38, %34 : vector<8x8x128xf32>
    %40 = arith.select %36, %34, %39 : vector<8x8x128xi1>, vector<8x8x128xf32>
    %cst_32 = arith.constant 0.000000e+00 : bf16
    %41 = vector.broadcast %cst_32 : bf16 to vector<12x16x128xbf16>
    %c0_33 = arith.constant 0 : index
    %c0_34 = arith.constant 0 : index
    %c0_35 = arith.constant 0 : index
    %42 = vector.load %arg10[%c0_33, %c0_34, %c0_35] : memref<12x16x128xbf16, #tpu.memory_space<vmem>>, vector<12x16x128xbf16>
    tpu.vector_store %arg10[%c0_33, %c0_34, %c0_35], %41 {strides = array<i32>} : memref<12x16x128xbf16, #tpu.memory_space<vmem>>, vector<12x16x128xbf16>,
    %43 = arith.truncf %40 : vector<8x8x128xf32> to vector<8x8x128xbf16>
    %c2_36 = arith.constant 2 : index
    %c2_37 = arith.constant 2 : index
    %c0_38 = arith.constant 0 : index
    %44 = vector.load %arg10[%c2_36, %c2_37, %c0_38] : memref<12x16x128xbf16, #tpu.memory_space<vmem>>, vector<8x8x128xbf16>
    tpu.vector_store %arg10[%c2_36, %c2_37, %c0_38], %43 {strides = array<i32>} : memref<12x16x128xbf16, #tpu.memory_space<vmem>>, vector<8x8x128xbf16>,
    %c0_39 = arith.constant 0 : index
    %c0_40 = arith.constant 0 : index
    %c0_41 = arith.constant 0 : index
    %45 = vector.load %arg9[%c0_39, %c0_40, %c0_41] : memref<12x16x128xbf16, #tpu.memory_space<vmem>>, vector<8x16x128xbf16>
    %46 = vector.shape_cast %45 : vector<8x16x128xbf16> to vector<128x128xbf16>
    %c1_42 = arith.constant 1 : index
    %c0_43 = arith.constant 0 : index
    %c0_44 = arith.constant 0 : index
    %47 = vector.load %arg9[%c1_42, %c0_43, %c0_44] : memref<12x16x128xbf16, #tpu.memory_space<vmem>>, vector<8x16x128xbf16>
    %48 = vector.shape_cast %47 : vector<8x16x128xbf16> to vector<128x128xbf16>
    %c2_45 = arith.constant 2 : index
    %c0_46 = arith.constant 0 : index
    %c0_47 = arith.constant 0 : index
    %49 = vector.load %arg9[%c2_45, %c0_46, %c0_47] : memref<12x16x128xbf16, #tpu.memory_space<vmem>>, vector<8x16x128xbf16>
    %50 = vector.shape_cast %49 : vector<8x16x128xbf16> to vector<128x128xbf16>
    %c3_48 = arith.constant 3 : index
    %c0_49 = arith.constant 0 : index
    %c0_50 = arith.constant 0 : index
    %51 = vector.load %arg9[%c3_48, %c0_49, %c0_50] : memref<12x16x128xbf16, #tpu.memory_space<vmem>>, vector<8x16x128xbf16>
    %52 = vector.shape_cast %51 : vector<8x16x128xbf16> to vector<128x128xbf16>
    %c4 = arith.constant 4 : index
    %c0_51 = arith.constant 0 : index
    %c0_52 = arith.constant 0 : index
    %53 = vector.load %arg9[%c4, %c0_51, %c0_52] : memref<12x16x128xbf16, #tpu.memory_space<vmem>>, vector<8x16x128xbf16>
    %54 = vector.shape_cast %53 : vector<8x16x128xbf16> to vector<128x128xbf16>
    %55 = tpu.concatenate %46, %48, %50, %52, %54 in 1 : vector<128x128xbf16>, vector<128x128xbf16>, vector<128x128xbf16>, vector<128x128xbf16>, vector<128x128xbf16> -> vector<128x640xbf16>
    %c0_53 = arith.constant 0 : index
    %c0_54 = arith.constant 0 : index
    %c0_55 = arith.constant 0 : index
    %56 = vector.load %arg4[%c0_53, %c0_54, %c0_55] : memref<5x640x128xbf16, #tpu.memory_space<vmem>>, vector<1x640x128xbf16>
    %57 = vector.shape_cast %56 : vector<1x640x128xbf16> to vector<640x128xbf16>
    %cst_56 = arith.constant dense<0.000000e+00> : vector<128x128xf32>
    %58 = tpu.matmul %55, %57, %cst_56 {dimension_numbers = #tpu.dot_dimension_numbers<[1], [0], [0], [1], [0, 0, 1, 1], [], []>} : vector<128x640xbf16>, vector<640x128xbf16>, vector<128x128xf32> -> vector<128x128xf32>
    %59 = vector.shape_cast %58 : vector<128x128xf32> to vector<8x16x128xf32>
    %60 = vector.extract_strided_slice %59 {offsets = [0, 0, 0], sizes = [8, 8, 128], strides = [1, 1, 1]} : vector<8x16x128xf32> to vector<8x8x128xf32>
    %c1_57 = arith.constant 1 : index
    %c0_58 = arith.constant 0 : index
    %c0_59 = arith.constant 0 : index
    %61 = vector.load %arg4[%c1_57, %c0_58, %c0_59] : memref<5x640x128xbf16, #tpu.memory_space<vmem>>, vector<1x640x128xbf16>
    %62 = vector.shape_cast %61 : vector<1x640x128xbf16> to vector<640x128xbf16>
    %cst_60 = arith.constant dense<0.000000e+00> : vector<128x128xf32>
    %63 = tpu.matmul %55, %62, %cst_60 {dimension_numbers = #tpu.dot_dimension_numbers<[1], [0], [0], [1], [0, 0, 1, 1], [], []>} : vector<128x640xbf16>, vector<640x128xbf16>, vector<128x128xf32> -> vector<128x128xf32>
    %64 = vector.shape_cast %63 : vector<128x128xf32> to vector<8x16x128xf32>
    %65 = vector.extract_strided_slice %64 {offsets = [0, 1, 0], sizes = [8, 8, 128], strides = [1, 1, 1]} : vector<8x16x128xf32> to vector<8x8x128xf32>
    %66 = arith.addf %60, %65 : vector<8x8x128xf32>
    %c2_61 = arith.constant 2 : index
    %c0_62 = arith.constant 0 : index
    %c0_63 = arith.constant 0 : index
    %67 = vector.load %arg4[%c2_61, %c0_62, %c0_63] : memref<5x640x128xbf16, #tpu.memory_space<vmem>>, vector<1x640x128xbf16>
    %68 = vector.shape_cast %67 : vector<1x640x128xbf16> to vector<640x128xbf16>
    %cst_64 = arith.constant dense<0.000000e+00> : vector<128x128xf32>
    %69 = tpu.matmul %55, %68, %cst_64 {dimension_numbers = #tpu.dot_dimension_numbers<[1], [0], [0], [1], [0, 0, 1, 1], [], []>} : vector<128x640xbf16>, vector<640x128xbf16>, vector<128x128xf32> -> vector<128x128xf32>
    %70 = vector.shape_cast %69 : vector<128x128xf32> to vector<8x16x128xf32>
    %71 = vector.extract_strided_slice %70 {offsets = [0, 2, 0], sizes = [8, 8, 128], strides = [1, 1, 1]} : vector<8x16x128xf32> to vector<8x8x128xf32>
    %72 = arith.addf %66, %71 : vector<8x8x128xf32>
    %c3_65 = arith.constant 3 : index
    %c0_66 = arith.constant 0 : index
    %c0_67 = arith.constant 0 : index
    %73 = vector.load %arg4[%c3_65, %c0_66, %c0_67] : memref<5x640x128xbf16, #tpu.memory_space<vmem>>, vector<1x640x128xbf16>
    %74 = vector.shape_cast %73 : vector<1x640x128xbf16> to vector<640x128xbf16>
    %cst_68 = arith.constant dense<0.000000e+00> : vector<128x128xf32>
    %75 = tpu.matmul %55, %74, %cst_68 {dimension_numbers = #tpu.dot_dimension_numbers<[1], [0], [0], [1], [0, 0, 1, 1], [], []>} : vector<128x640xbf16>, vector<640x128xbf16>, vector<128x128xf32> -> vector<128x128xf32>
    %76 = vector.shape_cast %75 : vector<128x128xf32> to vector<8x16x128xf32>
    %77 = vector.extract_strided_slice %76 {offsets = [0, 3, 0], sizes = [8, 8, 128], strides = [1, 1, 1]} : vector<8x16x128xf32> to vector<8x8x128xf32>
    %78 = arith.addf %72, %77 : vector<8x8x128xf32>
    %c4_69 = arith.constant 4 : index
    %c0_70 = arith.constant 0 : index
    %c0_71 = arith.constant 0 : index
    %79 = vector.load %arg4[%c4_69, %c0_70, %c0_71] : memref<5x640x128xbf16, #tpu.memory_space<vmem>>, vector<1x640x128xbf16>
    %80 = vector.shape_cast %79 : vector<1x640x128xbf16> to vector<640x128xbf16>
    %cst_72 = arith.constant dense<0.000000e+00> : vector<128x128xf32>
    %81 = tpu.matmul %55, %80, %cst_72 {dimension_numbers = #tpu.dot_dimension_numbers<[1], [0], [0], [1], [0, 0, 1, 1], [], []>} : vector<128x640xbf16>, vector<640x128xbf16>, vector<128x128xf32> -> vector<128x128xf32>
    %82 = vector.shape_cast %81 : vector<128x128xf32> to vector<8x16x128xf32>
    %83 = vector.extract_strided_slice %82 {offsets = [0, 4, 0], sizes = [8, 8, 128], strides = [1, 1, 1]} : vector<8x16x128xf32> to vector<8x8x128xf32>
    %84 = arith.addf %78, %83 : vector<8x8x128xf32>
    %c1_73 = arith.constant 1 : index
    %c0_74 = arith.constant 0 : index
    %c0_75 = arith.constant 0 : index
    %85 = vector.load %arg10[%c1_73, %c0_74, %c0_75] : memref<12x16x128xbf16, #tpu.memory_space<vmem>>, vector<8x16x128xbf16>
    %86 = vector.shape_cast %85 : vector<8x16x128xbf16> to vector<128x128xbf16>
    %c2_76 = arith.constant 2 : index
    %c0_77 = arith.constant 0 : index
    %c0_78 = arith.constant 0 : index
    %87 = vector.load %arg10[%c2_76, %c0_77, %c0_78] : memref<12x16x128xbf16, #tpu.memory_space<vmem>>, vector<8x16x128xbf16>
    %88 = vector.shape_cast %87 : vector<8x16x128xbf16> to vector<128x128xbf16>
    %c3_79 = arith.constant 3 : index
    %c0_80 = arith.constant 0 : index
    %c0_81 = arith.constant 0 : index
    %89 = vector.load %arg10[%c3_79, %c0_80, %c0_81] : memref<12x16x128xbf16, #tpu.memory_space<vmem>>, vector<8x16x128xbf16>
    %90 = vector.shape_cast %89 : vector<8x16x128xbf16> to vector<128x128xbf16>
    %91 = tpu.concatenate %86, %88, %90 in 1 : vector<128x128xbf16>, vector<128x128xbf16>, vector<128x128xbf16> -> vector<128x384xbf16>
    %c0_82 = arith.constant 0 : index
    %c0_83 = arith.constant 0 : index
    %c0_84 = arith.constant 0 : index
    %92 = vector.load %arg3[%c0_82, %c0_83, %c0_84] : memref<3x384x128xbf16, #tpu.memory_space<vmem>>, vector<1x384x128xbf16>
    %93 = vector.shape_cast %92 : vector<1x384x128xbf16> to vector<384x128xbf16>
    %cst_85 = arith.constant dense<0.000000e+00> : vector<128x128xf32>
    %94 = tpu.matmul %91, %93, %cst_85 {dimension_numbers = #tpu.dot_dimension_numbers<[1], [0], [0], [1], [0, 0, 1, 1], [], []>} : vector<128x384xbf16>, vector<384x128xbf16>, vector<128x128xf32> -> vector<128x128xf32>
    %95 = vector.shape_cast %94 : vector<128x128xf32> to vector<8x16x128xf32>
    %96 = vector.extract_strided_slice %95 {offsets = [0, 1, 0], sizes = [8, 8, 128], strides = [1, 1, 1]} : vector<8x16x128xf32> to vector<8x8x128xf32>
    %97 = arith.addf %84, %96 : vector<8x8x128xf32>
    %c1_86 = arith.constant 1 : index
    %c0_87 = arith.constant 0 : index
    %c0_88 = arith.constant 0 : index
    %98 = vector.load %arg3[%c1_86, %c0_87, %c0_88] : memref<3x384x128xbf16, #tpu.memory_space<vmem>>, vector<1x384x128xbf16>
    %99 = vector.shape_cast %98 : vector<1x384x128xbf16> to vector<384x128xbf16>
    %cst_89 = arith.constant dense<0.000000e+00> : vector<128x128xf32>
    %100 = tpu.matmul %91, %99, %cst_89 {dimension_numbers = #tpu.dot_dimension_numbers<[1], [0], [0], [1], [0, 0, 1, 1], [], []>} : vector<128x384xbf16>, vector<384x128xbf16>, vector<128x128xf32> -> vector<128x128xf32>
    %101 = vector.shape_cast %100 : vector<128x128xf32> to vector<8x16x128xf32>
    %102 = vector.extract_strided_slice %101 {offsets = [0, 2, 0], sizes = [8, 8, 128], strides = [1, 1, 1]} : vector<8x16x128xf32> to vector<8x8x128xf32>
    %103 = arith.addf %97, %102 : vector<8x8x128xf32>
    %c2_90 = arith.constant 2 : index
    %c0_91 = arith.constant 0 : index
    %c0_92 = arith.constant 0 : index
    %104 = vector.load %arg3[%c2_90, %c0_91, %c0_92] : memref<3x384x128xbf16, #tpu.memory_space<vmem>>, vector<1x384x128xbf16>
    %105 = vector.shape_cast %104 : vector<1x384x128xbf16> to vector<384x128xbf16>
    %cst_93 = arith.constant dense<0.000000e+00> : vector<128x128xf32>
    %106 = tpu.matmul %91, %105, %cst_93 {dimension_numbers = #tpu.dot_dimension_numbers<[1], [0], [0], [1], [0, 0, 1, 1], [], []>} : vector<128x384xbf16>, vector<384x128xbf16>, vector<128x128xf32> -> vector<128x128xf32>
    %107 = vector.shape_cast %106 : vector<128x128xf32> to vector<8x16x128xf32>
    %108 = vector.extract_strided_slice %107 {offsets = [0, 3, 0], sizes = [8, 8, 128], strides = [1, 1, 1]} : vector<8x16x128xf32> to vector<8x8x128xf32>
    %109 = arith.addf %103, %108 : vector<8x8x128xf32>
    %c0_94 = arith.constant 0 : index
    %c0_95 = arith.constant 0 : index
    %110 = vector.load %arg6[%c0_94, %c0_95] : memref<1x128xf32, #tpu.memory_space<vmem>>, vector<1x128xf32>
    %111 = vector.shape_cast %110 : vector<1x128xf32> to vector<128xf32>
    %112 = vector.shape_cast %111 : vector<128xf32> to vector<1x1x128xf32>
    %113 = vector.broadcast %112 : vector<1x1x128xf32> to vector<8x8x128xf32>
    %114 = arith.addf %109, %113 : vector<8x8x128xf32>
    %cst_96 = arith.constant 0.000000e+00 : f32
    %115 = vector.broadcast %cst_96 : f32 to vector<8x8x128xf32>
    %116 = arith.cmpf oge, %114, %115 : vector<8x8x128xf32>
    %c0_97 = arith.constant 0 : index
    %c1_98 = arith.constant 1 : index
    %117 = memref.load %arg7[%c0_97, %c1_98] : memref<1x2xf32, #tpu.memory_space<smem>>
    %118 = vector.broadcast %117 : f32 to vector<8x8x128xf32>
    %119 = arith.mulf %118, %114 : vector<8x8x128xf32>
    %120 = arith.select %116, %114, %119 : vector<8x8x128xi1>, vector<8x8x128xf32>
    %c0_99 = arith.constant 0 : index
    %c0_100 = arith.constant 0 : index
    %c0_101 = arith.constant 0 : index
    %c0_102 = arith.constant 0 : index
    %121 = vector.load %arg8[%c0_99, %c0_100, %c0_101, %c0_102] : memref<1x8x8x128xf32, #tpu.memory_space<vmem>>, vector<1x8x8x128xf32>
    %122 = vector.shape_cast %121 : vector<1x8x8x128xf32> to vector<8x8x128xf32>
    %123 = vector.shape_cast %120 : vector<8x8x128xf32> to vector<1x8x8x128xf32>
    tpu.vector_store %arg8[%c0_99, %c0_100, %c0_101, %c0_102], %123 {strides = array<i32>} : memref<1x8x8x128xf32, #tpu.memory_space<vmem>>, vector<1x8x8x128xf32>,
    return
  }
  func.func @transform_0(%arg0: i32) -> (i32, i32, i32, i32) {
    %c0_i32 = arith.constant 0 : i32
    %c0_i32_0 = arith.constant 0 : i32
    %c0_i32_1 = arith.constant 0 : i32
    %c0_i32_2 = arith.constant 0 : i32
    return %arg0, %c0_i32, %c0_i32_0, %c0_i32_1 : i32, i32, i32, i32
  }
  func.func @transform_1(%arg0: i32) -> (i32, i32, i32) {
    %c0_i32 = arith.constant 0 : i32
    %c0_i32_0 = arith.constant 0 : i32
    %c0_i32_1 = arith.constant 0 : i32
    %c0_i32_2 = arith.constant 0 : i32
    return %c0_i32, %c0_i32_0, %c0_i32_1 : i32, i32, i32
  }
  func.func @transform_2(%arg0: i32) -> (i32, i32, i32) {
    %c0_i32 = arith.constant 0 : i32
    %c0_i32_0 = arith.constant 0 : i32
    %c0_i32_1 = arith.constant 0 : i32
    %c0_i32_2 = arith.constant 0 : i32
    return %c0_i32, %c0_i32_0, %c0_i32_1 : i32, i32, i32
  }
  func.func @transform_3(%arg0: i32) -> (i32, i32, i32) {
    %c0_i32 = arith.constant 0 : i32
    %c0_i32_0 = arith.constant 0 : i32
    %c0_i32_1 = arith.constant 0 : i32
    %c0_i32_2 = arith.constant 0 : i32
    return %c0_i32, %c0_i32_0, %c0_i32_1 : i32, i32, i32
  }
  func.func @transform_4(%arg0: i32) -> (i32, i32) {
    %c0_i32 = arith.constant 0 : i32
    %c0_i32_0 = arith.constant 0 : i32
    %c0_i32_1 = arith.constant 0 : i32
    return %c0_i32, %c0_i32_0 : i32, i32
  }
  func.func @transform_5(%arg0: i32) -> (i32, i32) {
    %c0_i32 = arith.constant 0 : i32
    %c0_i32_0 = arith.constant 0 : i32
    %c0_i32_1 = arith.constant 0 : i32
    return %c0_i32, %c0_i32_0 : i32, i32
  }
  func.func @transform_6(%arg0: i32) -> (i32, i32) {
    %c0_i32 = arith.constant 0 : i32
    %c0_i32_0 = arith.constant 0 : i32
    %c0_i32_1 = arith.constant 0 : i32
    return %c0_i32, %c0_i32_0 : i32, i32
  }
  func.func @transform_7(%arg0: i32) -> (i32, i32, i32, i32) {
    %c0_i32 = arith.constant 0 : i32
    %c0_i32_0 = arith.constant 0 : i32
    %c0_i32_1 = arith.constant 0 : i32
    %c0_i32_2 = arith.constant 0 : i32
    return %arg0, %c0_i32, %c0_i32_0, %c0_i32_1 : i32, i32, i32, i32
  }
}

</mosaic_0001>

<bundles_post_ra>
// kernel: basic_block_forward.1
= control target key start
LH: loop header
LB: loop body
LE: loop exit
PB: predicated region body
PF: predicated region fallthrough
CT: control target
= control target key end

     0   :  { %12 = vsyncpa [#allocation6], 0  ;;  %s13287_s0 = inlined_call_operand.vmem [shape: f32[2,8,8,128], index: 0, kind: input, shape index: {}]   ;;  %s13288_s1 = inlined_call_operand.vmem [shape: bf16[3,384,128], index: 1, kind: input, shape index: {}]   ;;  %s13289_s2 = inlined_call_operand.vmem [shape: bf16[3,384,128], index: 2, kind: input, shape index: {}]   ;;  %s13290_s3 = inlined_call_operand.vmem [shape: bf16[5,640,128], index: 3, kind: input, shape index: {}]   ;;  %s13291_s4 = inlined_call_operand.vmem [shape: f32[1,128], index: 4, kind: input, shape index: {}]   ;;  %s13292_s5 = inlined_call_operand.vmem [shape: f32[1,128], index: 5, kind: input, shape index: {}]   ;;  %s13293_s6 = inlined_call_operand.vmem [shape: f32[1,2], index: 6, kind: input, shape index: {}]   ;;  %s13294_s7 = inlined_call_operand.hbm [shape: f32[2,8,8,128], index: 7, kind: output, shape index: {}]  }
   0x1   :  { %13 = vsyncpa [#allocation5], 0 }
   0x2   :  { %15 = vsyncpa [#allocation5 + $0x1], 0  ;;  %s10683_s24 = smov 0   ;;  %s10685_s25 = smov 0  }
   0x3   :  { %s10687_s26 = smov 0   ;;  %s10689_s27 = smov 0  }
   0x4 LB: > { %s10704_s28 = sadd.s32 4294967295, %s10636_s27   ;;  %s7423_s29 = sadd.s32 4294967294, %s10636_s27   ;;  %s10636_s27 = sphi %s10689_s27, %s13309_s27   ;;  %s10632_s26 = sphi %s10687_s26, %s13308_s26   ;;  %s10628_s25 = sphi %s10685_s25, %s13307_s25   ;;  %s10624_s24 = sphi %s10683_s24, %s13306_s24  }
   0x5   : > { %s10708_s30 = sadd.s32 1, %s10636_s27   ;;  %s180_s8 = sadd.s32 1, %s10632_s26 }
   0x6   : > { %s177_s9 = ssub.s32 %s10636_s27, %s10708_s30  ;;  %p190_p0 = scmp.ne.s32.totalorder %s10632_s26, %s10628_s25 }
   0x7   : > { %p178_p1 = scmp.eq.s32.totalorder %s177_s9, 0  ;;  %p191_p2 = scmp.eq.s32.totalorder %s10704_s28, 1 }
   0x8   : > { %p196_p3 = scmp.ne.s32.totalorder %s10628_s25, %s10624_s24  ;;  %p197_p4 = scmp.eq.s32.totalorder %s7423_s29, 1 }
   0x9   : > { %s10719_s10 = scalar_select %p178_p1, %s10632_s26, %s180_s8  }
   0xa   : > { %p10721_p5 = por %p191_p2, %p190_p0  ;;  %p10725_p6 = por %p197_p4, %p196_p3 }
   0xb   : > { %p7424_p7 = scmp.ge.s32.totalorder %s10636_s27, 1  ;;  %p204_p8 = scmp.lt.s32.totalorder %s10636_s27, 3 }
   0xc   : > { %p10000_p9 = scmp.eq.s32.totalorder %s10704_s28, 0  ;;  %s232_s16 = sshll.u32 %s13293_s6, 4  ;;  %s233_s16 = int_to_ptr.vmem [resolvable:$true] %s232_s16 }
   0xd   : > { %p10732_p10 = pnand %p7424_p7, %p204_p8  ;;  %s10557_s17 = scalar_lea.vmem %s233_s16, 16 }
   0xe   : > { %p10558_p13 = scmp.ne.s32.totalorder %s233_s16, %s10557_s17  ;;  %p10565_p3 = scmp.lt.s32.totalorder %s233_s16, %s233_s16 }
   0xf   : > { %p9992_p11 = pneg %p10732_p10  ;;  %p10566_p4 = scmp.lt.s32.totalorder %s10557_s17, %s10557_s17 }
  0x11   : > { %p9993_p12 = pnand %p10000_p9, %p9992_p11  ;;  %p10567_p7 = por %p10566_p4, %p10565_p3 }
  0x13   : > { %p10559_p0 = pneg %p9993_p12 }
  0x15   : > { %p10560_p1 = pnand %p10559_p0, %p10558_p13 }
  0x17   : > { %p10561_p2 = pneg %p10560_p1 }
  0x19   : > { %p10568_p8 = pnand %p10567_p7, %p10561_p2 }
  0x1b   : > { %10571 = shalt.err (!%p10568_p8)
}
  0x1c   : > { %s10638_s18 = smov [#allocation4]   ;;  %253 = sbr.rel (%p10732_p10) target bundleno = 993 (0x3e1), region = 48 }
  0x1d   : > { %9995 = dma.vmem_to_smem (!%p9993_p12), %s233_s16, 16, %s10638_s18, [#allocation6]  }
  0x21   : > { %10615 = dma.done.wait (%p10000_p9), [#allocation6], 16  }
  0x22   : > { %10617 = vsyncadd (%p10000_p9), [#allocation6], 4294967280 }
  0x23   : > { %259 = sfence }
  0x24   : > { %v10039_v0 = vld [vmem:[%s13288_s1 + $0x78] sm:$0xff]   ;;  %v10639_v3 = vmov 0   ;;  %v10042_v4 = vld [vmem:[%s13288_s1 + $0x70] sm:$0xff]   ;;  %v10045_v7 = vld [vmem:[%s13288_s1 + $0x68] sm:$0xff]   ;;  %p286_p9 = scmp.lt.s32.totalorder %s10704_s28, 1  ;;  %vm1388_vm0 = vcmask 1046528  }
  0x25   : > { %v10040_v1 = vld [vmem:[%s13288_s1 + $0xb8] sm:$0xff]   ;;  %8434 = vmatprep.subr.bf16.mxu0 %v10039_v0  ;;  %296 = vst [vmem:[#allocation2 + $0x10] sm:$0xf] %v10639_v3  ;;  %297 = vst [vmem:[#allocation2 + $0x14] sm:$0xf] %v10639_v3  ;;  %v10043_v5 = vld [vmem:[%s13288_s1 + $0xb0] sm:$0xff]  }
  0x26   : > { %v10041_v2 = vld [vmem:[%s13288_s1 + $0x38] sm:$0xff]   ;;  %292 = vst [vmem:[#allocation2] sm:$0xf] %v10639_v3  ;;  %293 = vst [vmem:[#allocation2 + $0x4] sm:$0xf] %v10639_v3  ;;  %9634 = vmatprep.subr.bf16.mxu1 %v10040_v1  ;;  %v10044_v6 = vld [vmem:[%s13288_s1 + $0x30] sm:$0xff]  }
  0x27   : > { %294 = vst [vmem:[#allocation2 + $0x8] sm:$0xf] %v10639_v3  ;;  %295 = vst [vmem:[#allocation2 + $0xc] sm:$0xf] %v10639_v3  ;;  %8435 = vmatpush3.bf16.msra.mxu0 %v10041_v2  ;;  %9635 = vmatpush3.bf16.msra.mxu1 %v10040_v1  ;;  %v10046_v8 = vld [vmem:[%s13288_s1 + $0xa8] sm:$0xff]   ;;  %v10048_v10 = vld [vmem:[%s13288_s1 + $0x60] sm:$0xff]  }
  0x28   : > { %298 = vst [vmem:[#allocation2 + $0x18] sm:$0xf] %v10639_v3  ;;  %299 = vst [vmem:[#allocation2 + $0x1c] sm:$0xf] %v10639_v3  ;;  %8436 = vmatprep.subr.bf16.mxu0 %v10042_v4  ;;  %9636 = vmatprep.subr.bf16.mxu1 %v10043_v5  ;;  %v10047_v9 = vld [vmem:[%s13288_s1 + $0x28] sm:$0xff]   ;;  %v10049_v11 = vld [vmem:[%s13288_s1 + $0xa0] sm:$0xff]  }
  0x29   : > { %300 = vst [vmem:[#allocation2 + $0x20] sm:$0xf] %v10639_v3  ;;  %301 = vst [vmem:[#allocation2 + $0x24] sm:$0xf] %v10639_v3  ;;  %v10050_v12 = vld [vmem:[%s13288_s1 + $0x20] sm:$0xff]   ;;  %v10051_v13 = vld [vmem:[%s13288_s1 + $0x58] sm:$0xff]  }
  0x2a   : > { %302 = vst [vmem:[#allocation2 + $0x28] sm:$0xf] %v10639_v3  ;;  %303 = vst [vmem:[#allocation2 + $0x2c] sm:$0xf] %v10639_v3  ;;  %v10052_v14 = vld [vmem:[%s13288_s1 + $0x98] sm:$0xff]   ;;  %s287_s19 = scalar_select %p286_p9, %s10704_s28, 1 }
  0x2b   : > { %304 = vst [vmem:[#allocation2 + $0x30] sm:$0xf] %v10639_v3  ;;  %305 = vst [vmem:[#allocation2 + $0x34] sm:$0xf] %v10639_v3  ;;  %8437 = vmatpush3.bf16.msra.mxu0 %v10044_v6  ;;  %9637 = vmatpush3.bf16.msra.mxu1 %v10043_v5  ;;  %v10053_v15 = vld [vmem:[%s13288_s1 + $0x18] sm:$0xff]   ;;  %v10054_v16 = vld [vmem:[%s13288_s1 + $0x50] sm:$0xff]  }
  0x2c   : > { %306 = vst [vmem:[#allocation2 + $0x38] sm:$0xf] %v10639_v3  ;;  %307 = vst [vmem:[#allocation2 + $0x3c] sm:$0xf] %v10639_v3  ;;  %8438 = vmatprep.subr.bf16.mxu0 %v10045_v7  ;;  %9638 = vmatprep.subr.bf16.mxu1 %v10046_v8  ;;  %v10055_v17 = vld [vmem:[%s13288_s1 + $0x90] sm:$0xff]   ;;  %s8408_s9 = sshll.u32 %s287_s19, 6 }
  0x2d   : > { %308 = vst [vmem:[#allocation2 + $0x40] sm:$0xf] %v10639_v3  ;;  %309 = vst [vmem:[#allocation2 + $0x44] sm:$0xf] %v10639_v3  ;;  %v10056_v18 = vld [vmem:[%s13288_s1 + $0x10] sm:$0xff]   ;;  %v10057_v19 = vld [vmem:[%s13288_s1 + $0x48] sm:$0xff]   ;;  %s10814_s19 = scalar_lea.vmem %s13287_s0, %s8408_s9 }
  0x2e   : > { %310 = vst [vmem:[#allocation2 + $0x48] sm:$0xf] %v10639_v3  ;;  %311 = vst [vmem:[#allocation2 + $0x4c] sm:$0xf] %v10639_v3  ;;  %v10058_v20 = vld [vmem:[%s13288_s1 + $0x88] sm:$0xff]   ;;  %v10060_v22 = vld [vmem:[%s13288_s1 + $0x40] sm:$0xff]  }
  0x2f   : > { %312 = vst [vmem:[#allocation2 + $0x50] sm:$0xf] %v10639_v3  ;;  %313 = vst [vmem:[#allocation2 + $0x54] sm:$0xf] %v10639_v3  ;;  %8439 = vmatpush3.bf16.msra.mxu0 %v10047_v9  ;;  %9639 = vmatpush3.bf16.msra.mxu1 %v10046_v8  ;;  %v10059_v21 = vld [vmem:[%s13288_s1 + $0x8] sm:$0xff]   ;;  %v316_v23 = vld [vmem:[%s10814_s19] sm:$0xff] }
  0x30   : > { %314 = vst [vmem:[#allocation2 + $0x58] sm:$0xf] %v10639_v3  ;;  %315 = vst [vmem:[#allocation2 + $0x5c] sm:$0xf] %v10639_v3  ;;  %8440 = vmatprep.subr.bf16.mxu0 %v10048_v10  ;;  %9640 = vmatprep.subr.bf16.mxu1 %v10049_v11  ;;  %v317_v24 = vld [vmem:[%s10814_s19 + $0x8] sm:$0xff]  ;;  %v10061_v25 = vld [vmem:[%s13288_s1 + $0x80] sm:$0xff]   ;;  %v8409_v26 = vpack.c.bf16 %v316_v23, %v316_v23 }
  0x31   : > { %1980 = vst [vmem:[#allocation3 + $0x8] sm:$0xf] %v10639_v3  ;;  %1981 = vst [vmem:[#allocation3 + $0xc] sm:$0xf] %v10639_v3  ;;  %v8410_v27 = vpack.c.bf16 %v317_v24, %v317_v24  ;;  %v318_v28 = vld [vmem:[%s10814_s19 + $0x10] sm:$0xff]  ;;  %v10062_v32 = vld [vmem:[%s13288_s1] sm:$0xff]  }
  0x32   : > { %1982 = vst [vmem:[#allocation3 + $0x10] sm:$0xf] %v10639_v3  ;;  %1983 = vst [vmem:[#allocation3 + $0x14] sm:$0xf] %v10639_v3  ;;  %v8411_v29 = vpack.c.bf16 %v318_v28, %v318_v28  ;;  %v356_v30 = vrot.slane %v8409_v26, 7  ;;  %v10067_v36 = vld [vmem:[%s13288_s1 + $0x138] sm:$0xff]  }
  0x33   : > { %1984 = vst [vmem:[#allocation3 + $0x18] sm:$0xf] %v10639_v3  ;;  %1985 = vst [vmem:[#allocation3 + $0x1c] sm:$0xf] %v10639_v3  ;;  %8441 = vmatpush3.bf16.msra.mxu0 %v10050_v12  ;;  %9641 = vmatpush3.bf16.msra.mxu1 %v10049_v11  ;;  %v358_v31 = vrot.slane %v8410_v27, 7  ;;  %v10068_v37 = vld [vmem:[%s13288_s1 + $0x178] sm:$0xff]  }
  0x34   : > { %1986 = vst [vmem:[#allocation3 + $0x20] sm:$0xf] %v10639_v3  ;;  %1987 = vst [vmem:[#allocation3 + $0x24] sm:$0xf] %v10639_v3  ;;  %8442 = vmatprep.subr.bf16.mxu0 %v10051_v13  ;;  %9642 = vmatprep.subr.bf16.mxu1 %v10052_v14  ;;  %v360_v33 = vrot.slane %v8411_v29, 7  ;;  %v357_v34 = vrot.slane %v356_v30, 4 }
  0x35   : > { %1988 = vst [vmem:[#allocation3 + $0x28] sm:$0xf] %v10639_v3  ;;  %1989 = vst [vmem:[#allocation3 + $0x2c] sm:$0xf] %v10639_v3  ;;  %v359_v35 = vrot.slane %v358_v31, 4  ;;  %v319_v39 = vld [vmem:[%s10814_s19 + $0x18] sm:$0xff] }
  0x36   : > { %1990 = vst [vmem:[#allocation3 + $0x30] sm:$0xf] %v10639_v3  ;;  %1991 = vst [vmem:[#allocation3 + $0x34] sm:$0xf] %v10639_v3  ;;  %v361_v38 = vrot.slane %v360_v33, 4  ;;  %v320_v40 = vld [vmem:[%s10814_s19 + $0x20] sm:$0xff]  ;;  %v8412_v41 = vpack.c.bf16 %v319_v39, %v319_v39 }
  0x37   : > { %1992 = vst [vmem:[#allocation3 + $0x38] sm:$0xf] %v10639_v3  ;;  %1993 = vst [vmem:[#allocation3 + $0x3c] sm:$0xf] %v10639_v3  ;;  %8443 = vmatpush3.bf16.msra.mxu0 %v10053_v15  ;;  %9643 = vmatpush3.bf16.msra.mxu1 %v10052_v14  ;;  %v8413_v42 = vpack.c.bf16 %v320_v40, %v320_v40  ;;  %v10839_v45 = vld [vmem:[#allocation2 + $0x8] sm:$0xff]   ;;  %v10069_v46 = vld [vmem:[%s13288_s1 + $0xf8] sm:$0xff]  }
  0x38   : > { %1994 = vst [vmem:[#allocation3 + $0x40] sm:$0xf] %v10639_v3  ;;  %1995 = vst [vmem:[#allocation3 + $0x44] sm:$0xf] %v10639_v3  ;;  %8444 = vmatprep.subr.bf16.mxu0 %v10054_v16  ;;  %9644 = vmatprep.subr.bf16.mxu1 %v10055_v17  ;;  %v362_v43 = vrot.slane %v8412_v41, 7  ;;  %v10070_v50 = vld [vmem:[%s13288_s1 + $0x130] sm:$0xff]  }
  0x39   : > { %1996 = vst [vmem:[#allocation3 + $0x48] sm:$0xf] %v10639_v3  ;;  %1997 = vst [vmem:[#allocation3 + $0x4c] sm:$0xf] %v10639_v3  ;;  %v364_v44 = vrot.slane %v8413_v42, 7  ;;  %v10077_v51 = vld [vmem:[%s13288_s1 + $0x170] sm:$0xff]  }
  0x3a   : > { %1998 = vst [vmem:[#allocation3 + $0x50] sm:$0xf] %v10639_v3  ;;  %1999 = vst [vmem:[#allocation3 + $0x54] sm:$0xf] %v10639_v3  ;;  %v363_v47 = vrot.slane %v362_v43, 4  ;;  %v10071_v55 = vld [vmem:[%s13288_s1 + $0xf0] sm:$0xff]  }
  0x3b   : > { %8445 = vmatpush3.bf16.msra.mxu0 %v10056_v18  ;;  %9645 = vmatpush3.bf16.msra.mxu1 %v10055_v17  ;;  %389 = vst [vmem:[#allocation2 + $0x10] sm:$0xe] %v356_v30  ;;  %391 = vst [vmem:[#allocation2 + $0x18] sm:$0xe] %v358_v31  ;;  %v365_v48 = vrot.slane %v364_v44, 4  ;;  %v10076_v56 = vld [vmem:[%s13288_s1 + $0x128] sm:$0xff]  }
  0x3c   : > { %8446 = vmatprep.subr.bf16.mxu0 %v10057_v19  ;;  %9646 = vmatprep.subr.bf16.mxu1 %v10058_v20  ;;  %393 = vst [vmem:[#allocation2 + $0x20] sm:$0xe] %v360_v33  ;;  %390 = vst [vmem:[#allocation2 + $0x14] sm:$0x1] %v357_v34  ;;  %v321_v58 = vld [vmem:[%s10814_s19 + $0x28] sm:$0xff]  ;;  %v322_v62 = vld [vmem:[%s10814_s19 + $0x30] sm:$0xff] }
  0x3d   : > { %392 = vst [vmem:[#allocation2 + $0x1c] sm:$0x1] %v359_v35  ;;  %394 = vst [vmem:[#allocation2 + $0x24] sm:$0x1] %v361_v38  ;;  %v10078_v59 = vld [vmem:[%s13288_s1 + $0xe8] sm:$0xff]   ;;  %v8414_v61 = vpack.c.bf16 %v321_v58, %v321_v58  ;;  %v8415_v0 = vpack.c.bf16 %v322_v62, %v322_v62  ;;  %v10079_v3 = vld [vmem:[%s13288_s1 + $0x120] sm:$0xff]  }
  0x3e   : > { %395 = vst [vmem:[#allocation2 + $0x28] sm:$0xe] %v362_v43  ;;  %397 = vst [vmem:[#allocation2 + $0x30] sm:$0xe] %v364_v44  ;;  %v10086_v6 = vld [vmem:[%s13288_s1 + $0x168] sm:$0xff]   ;;  %v10080_v8 = vld [vmem:[%s13288_s1 + $0xe0] sm:$0xff]  }
  0x3f   : > { %8447 = vmatpush3.bf16.msra.mxu0 %v10059_v21  ;;  %9647 = vmatpush3.bf16.msra.mxu1 %v10058_v20  ;;  %396 = vst [vmem:[#allocation2 + $0x2c] sm:$0x1] %v363_v47  ;;  %398 = vst [vmem:[#allocation2 + $0x34] sm:$0x1] %v365_v48  ;;  %v366_v2 = vrot.slane %v8414_v61, 7  ;;  %v368_v4 = vrot.slane %v8415_v0, 7 }
  0x40   : > { %8448 = vmatprep.subr.bf16.mxu0 %v10060_v22  ;;  %9648 = vmatprep.subr.bf16.mxu1 %v10061_v25  ;;  %v10085_v9 = vld [vmem:[%s13288_s1 + $0x118] sm:$0xff]   ;;  %v10088_v15 = vld [vmem:[%s13288_s1 + $0x110] sm:$0xff]   ;;  %v10095_v20 = vld [vmem:[%s13288_s1 + $0x160] sm:$0xff]   ;;  %vm1848_vm1 = vcmask 1045504   ;;  %vm2050_vm2 = vsmask.f32 256 }
  0x41   : > { %v367_v5 = vrot.slane %v366_v2, 4  ;;  %399 = vst [vmem:[#allocation2 + $0x38] sm:$0xe] %v366_v2  ;;  %v369_v7 = vrot.slane %v368_v4, 4  ;;  %401 = vst [vmem:[#allocation2 + $0x40] sm:$0xe] %v368_v4 }
  0x42   : > { %v323_v11 = vld [vmem:[%s10814_s19 + $0x38] sm:$0xff]  ;;  %v10089_v17 = vld [vmem:[%s13288_s1 + $0xd0] sm:$0xff]   ;;  %v10094_v22 = vld [vmem:[%s13288_s1 + $0x108] sm:$0xff]   ;;  %s11683_s19 = sld [smem:[#allocation4]]  ;;  %vm2051_vm3 = vsmask.f32 4368 }
  0x43   : > { %8449 = vmatpush3.bf16.msra.mxu0 %v10062_v32  ;;  %9649 = vmatpush3.bf16.msra.mxu1 %v10061_v25  ;;  %v10844_v49 = vld [vmem:[#allocation2 + $0x10] sm:$0xff]   ;;  %400 = vst [vmem:[#allocation2 + $0x3c] sm:$0x1] %v367_v5  ;;  %402 = vst [vmem:[#allocation2 + $0x44] sm:$0x1] %v369_v7  ;;  %v8416_v13 = vpack.c.bf16 %v323_v11, %v323_v11  ;;  %v10087_v14 = vld [vmem:[%s13288_s1 + $0xd8] sm:$0xff]  }
  0x44   : > { %8514 = vmatprep.subr.bf16.mxu1 %v10067_v36  ;;  %9666 = vmatprep.subr.bf16.mxu0 %v10068_v37  ;;  %v10852_v52 = vld [vmem:[#allocation2 + $0x18] sm:$0xff]   ;;  %v10854_v53 = vld [vmem:[#allocation2 + $0x20] sm:$0xff]   ;;  %v10869_v57 = vld [vmem:[#allocation2 + $0x10] sm:$0xff]   ;;  %s8402_s21 = sld [smem:[#allocation4 + $0x1]]  ;;  %s283_s22 = sand.u32 1, %s10628_s25  }
  0x45   : > { %823 = vmatprep.mubr.bf16.mxu0 %v10844_v49  ;;  %v10857_v54 = vld [vmem:[#allocation2 + $0x18] sm:$0xff]   ;;  %9650 = vmatprep.mubr.bf16.mxu1 %v10852_v52  ;;  %v10875_v60 = vld [vmem:[#allocation2 + $0x20] sm:$0xff]   ;;  %v370_v16 = vrot.slane %v8416_v13, 7  ;;  %v10096_v24 = vld [vmem:[%s13288_s1 + $0xc8] sm:$0xff]   ;;  %s7429_s8 = sshll.u32 %s283_s22, 6  ;;  %s10640_s18 = smov [#allocation7]  }
  0x46   : > { %824 = vmatmul.mubr.bf16.vlgmr.msra.gmra.mxu0 %v10839_v45  ;;  %9651 = vmatmul.mubr.bf16.vlgmr.msra.gmra.mxu1 %v10854_v53  ;;  %v10878_v63 = vld [vmem:[#allocation2 + $0x28] sm:$0xff]   ;;  %v10880_v1 = vld [vmem:[#allocation2 + $0x30] sm:$0xff]   ;;  %v10898_v10 = vld [vmem:[#allocation2 + $0x18] sm:$0xff]   ;;  %s13200_s13 = scalar_lea.vmem [#allocation7], %s7429_s8  ;;  %s10576_s20 = sshll.u32 %s10640_s18, 4  ;;  %s10577_s20 = int_to_ptr.vmem [resolvable:$false] %s10576_s20 }
  0x47   : > { %9667 = vmatpush3.bf16.msra.mxu0 %v10068_v37  ;;  %8515 = vmatpush3.bf16.msra.mxu1 %v10069_v46  ;;  %v10901_v12 = vld [vmem:[#allocation2 + $0x28] sm:$0xff]   ;;  %v371_v19 = vrot.slane %v370_v16, 4  ;;  %403 = vst [vmem:[#allocation2 + $0x48] sm:$0xe] %v370_v16  ;;  %v10926_v23 = vld [vmem:[#allocation2 + $0x20] sm:$0xff]   ;;  %v10931_v25 = vld [vmem:[#allocation2 + $0x30] sm:$0xff]  }
  0x48   : > { %831 = vmatprep.mubr.bf16.mxu0 %v10857_v54  ;;  %8516 = vmatprep.subr.bf16.mxu1 %v10070_v50  ;;  %v10933_v26 = vld [vmem:[#allocation2 + $0x50] sm:$0xff]   ;;  %v10097_v27 = vld [vmem:[%s13288_s1 + $0x100] sm:$0xff]   ;;  %v10101_v28 = vld [vmem:[%s13288_s1 + $0x158] sm:$0xff]   ;;  %s7349_s9 = sshll.u32 %s13200_s13, 4  ;;  %s13242_s9 = int_to_ptr.vmem [resolvable:$true] %s7349_s9 }
  0x49   : > { %9668 = vmatprep.subr.bf16.mxu0 %v10077_v51  ;;  %9654 = vmatprep.mubr.bf16.mxu1 %v10878_v63  ;;  %404 = vst [vmem:[#allocation2 + $0x4c] sm:$0x1] %v371_v19  ;;  %v10098_v29 = vld [vmem:[%s13288_s1 + $0xc0] sm:$0xff]   ;;  %v10948_v31 = vld [vmem:[#allocation2 + $0x28] sm:$0xff]   ;;  %v10104_v32 = vld [vmem:[%s13288_s1 + $0x150] sm:$0xff]   ;;  %s10572_s17 = scalar_lea.vmem %s13242_s9, 1024  ;;  %p10579_p13 = scmp.lt.s32.totalorder %s13242_s9, %s10577_s20 }
  0x4a   : > { %v10913_v18 = vld [vmem:[#allocation2 + $0x38] sm:$0xff]   ;;  %v10919_v21 = vld [vmem:[#allocation2 + $0x40] sm:$0xff]   ;;  %v10107_v34 = vld [vmem:[%s13288_s1 + $0x148] sm:$0xff]   ;;  %p10573_p10 = scmp.ne.s32.totalorder %s13242_s9, %s10572_s17 }
  0x4b   : > { %9669 = vmatpush3.bf16.msra.mxu0 %v10077_v51  ;;  %8517 = vmatpush3.bf16.msra.mxu1 %v10071_v55  ;;  %v10955_v33 = vld [vmem:[#allocation2 + $0x38] sm:$0xff]   ;;  %v10110_v35 = vld [vmem:[%s13288_s1 + $0x140] sm:$0xff]   ;;  %v10966_v36 = vld [vmem:[#allocation2 + $0x30] sm:$0xff]  }
  0x4c   : > { %8518 = vmatprep.subr.bf16.mxu1 %v10076_v56  ;;  %9670 = vmatprep.subr.bf16.mxu0 %v10086_v6  ;;  %v10112_v37 = vld [vmem:[%s13288_s1 + $0x238] sm:$0xff]   ;;  %v10972_v38 = vld [vmem:[#allocation2 + $0x40] sm:$0xff]   ;;  %v10115_v40 = vld [vmem:[%s13288_s1 + $0x230] sm:$0xff]   ;;  %p10574_p11 = pnand %p10573_p10, %p10721_p5 }
  0x4d   : > { %v10111_v39 = vld [vmem:[%s13288_s1 + $0x1f8] sm:$0xff]   ;;  %v10118_v41 = vld [vmem:[%s13288_s1 + $0x228] sm:$0xff]   ;;  %v10121_v44 = vld [vmem:[%s13288_s1 + $0x220] sm:$0xff]  }
  0x4e   : > { %832 = vmatmul.mubr.bf16.gmra.mxu0 %v10869_v57  ;;  %9655 = vmatmul.mubr.bf16.gmra.mxu1 %v10880_v1  ;;  %v10986_v42 = vld [vmem:[#allocation2 + $0x38] sm:$0xff]   ;;  %v11000_v47 = vld [vmem:[#allocation2 + $0x40] sm:$0xff]   ;;  %v10127_v48 = vld [vmem:[%s13288_s1 + $0x210] sm:$0xff]   ;;  %p10575_p12 = pneg %p10574_p11 }
  0x4f   : > { %839 = vmatprep.mubr.bf16.mxu0 %v10875_v60  ;;  %8519 = vmatpush3.bf16.msra.mxu1 %v10078_v59  ;;  %v10124_v46 = vld [vmem:[%s13288_s1 + $0x218] sm:$0xff]   ;;  %v10130_v50 = vld [vmem:[%s13288_s1 + $0x208] sm:$0xff]   ;;  %v10114_v55 = vld [vmem:[%s13288_s1 + $0x1f0] sm:$0xff]  }
  0x50   : > { %8520 = vmatprep.subr.bf16.mxu1 %v10079_v3  ;;  %9671 = vmatpush3.bf16.msra.mxu0 %v10086_v6  ;;  %v10946_v30 = vld [vmem:[#allocation2 + $0x48] sm:$0xff]   ;;  %v10113_v51 = vld [vmem:[%s13288_s1 + $0x1b8] sm:$0xff]   ;;  %v10133_v56 = vld [vmem:[%s13288_s1 + $0x200] sm:$0xff]  }
  0x51   : > { %9658 = vmatprep.mubr.bf16.mxu1 %v10913_v18  ;;  %9672 = vmatprep.subr.bf16.mxu0 %v10095_v20  ;;  %v10988_v43 = vld [vmem:[#allocation2 + $0x48] sm:$0xff]   ;;  %v10116_v58 = vld [vmem:[%s13288_s1 + $0x1b0] sm:$0xff]   ;;  %v10135_v61 = vld [vmem:[%s13290_s3 + $0x78] sm:$0xff]  }
  0x52   : > { %v10117_v59 = vld [vmem:[%s13288_s1 + $0x1e8] sm:$0xff]   ;;  %v10120_v0 = vld [vmem:[%s13288_s1 + $0x1e0] sm:$0xff]   ;;  %v10123_v3 = vld [vmem:[%s13288_s1 + $0x1d8] sm:$0xff]  }
  0x53   : > { %8521 = vmatpush3.bf16.msra.mxu1 %v10080_v8  ;;  %v10119_v62 = vld [vmem:[%s13288_s1 + $0x1a8] sm:$0xff]   ;;  %v10122_v2 = vld [vmem:[%s13288_s1 + $0x1a0] sm:$0xff]   ;;  %v10125_v4 = vld [vmem:[%s13288_s1 + $0x198] sm:$0xff]  }
  0x54   : > { %8522 = vmatprep.subr.bf16.mxu1 %v10085_v9  ;;  %9673 = vmatpush3.bf16.msra.mxu0 %v10095_v20  ;;  %v10126_v5 = vld [vmem:[%s13288_s1 + $0x1d0] sm:$0xff]   ;;  %v10129_v7 = vld [vmem:[%s13288_s1 + $0x1c8] sm:$0xff]   ;;  %v10132_v9 = vld [vmem:[%s13288_s1 + $0x1c0] sm:$0xff]  }
  0x55   : > { %9674 = vmatprep.subr.bf16.mxu0 %v10101_v28  ;;  %v10128_v6 = vld [vmem:[%s13288_s1 + $0x190] sm:$0xff]   ;;  %v10131_v8 = vld [vmem:[%s13288_s1 + $0x188] sm:$0xff]   ;;  %v10134_v11 = vld [vmem:[%s13288_s1 + $0x180] sm:$0xff]  }
  0x56   : > { %840 = vmatmul.mubr.bf16.gmra.mxu0 %v10898_v10  ;;  %9659 = vmatmul.mubr.bf16.gmra.mxu1 %v10919_v21  ;;  %v10136_v13 = vld [vmem:[%s13290_s3 + $0xf8] sm:$0xff]   ;;  %v10144_v16 = vld [vmem:[%s13290_s3 + $0xb0] sm:$0xff]   ;;  %v10154_v19 = vld [vmem:[%s13290_s3 + $0xe0] sm:$0xff]  }
  0x57   : > { %847 = vmatprep.mubr.bf16.mxu0 %v10901_v12  ;;  %8523 = vmatpush3.bf16.msra.mxu1 %v10087_v14  ;;  %v10138_v14 = vld [vmem:[%s13290_s3 + $0xb8] sm:$0xff]   ;;  %v10141_v20 = vld [vmem:[%s13290_s3 + $0x68] sm:$0xff]   ;;  %vm11842_vm8 = vmor %vm2050_vm2, %vm2051_vm3 }
  0x58   : > { %8524 = vmatprep.subr.bf16.mxu1 %v10088_v15  ;;  %9675 = vmatpush3.bf16.msra.mxu0 %v10101_v28  ;;  %v10142_v15 = vld [vmem:[%s13290_s3 + $0xf0] sm:$0xff]   ;;  %v10147_v28 = vld [vmem:[%s13290_s3 + $0x58] sm:$0xff]  }
  0x59   : > { %9662 = vmatprep.mubr.bf16.mxu1 %v10946_v30  ;;  %9676 = vmatprep.subr.bf16.mxu0 %v10104_v32 }
  0x5b   : > { %8525 = vmatpush3.bf16.msra.mxu1 %v10089_v17  ;;  %v10140_v17 = vld [vmem:[%s13290_s3 + $0x30] sm:$0xff]  }
  0x5c   : > { %8526 = vmatprep.subr.bf16.mxu1 %v10094_v22  ;;  %9677 = vmatpush3.bf16.msra.mxu0 %v10104_v32  ;;  %v10145_v22 = vld [vmem:[%s13290_s3 + $0x60] sm:$0xff]   ;;  %v10170_v32 = vld [vmem:[%s13290_s3 + $0x88] sm:$0xff]  }
  0x5d   : > { %9678 = vmatprep.subr.bf16.mxu0 %v10107_v34 }
  0x5e   : > { %848 = vmatmul.mubr.bf16.gmra.mxu0 %v10926_v23  ;;  %9663 = vmatmul.mubr.bf16.gmra.mxu1 %v10933_v26 }
  0x5f   : > { %855 = vmatprep.mubr.bf16.mxu0 %v10931_v25  ;;  %8527 = vmatpush3.bf16.msra.mxu1 %v10096_v24  ;;  %v10162_v24 = vld [vmem:[%s13290_s3 + $0x98] sm:$0xff]  }
  0x60   : > { %8528 = vmatprep.subr.bf16.mxu1 %v10097_v27  ;;  %1210 = vmatprep.mubr.bf16.mxu1 %v10844_v49  ;;  %v10165_v27 = vld [vmem:[%s13290_s3 + $0xd0] sm:$0xff]  }
  0x61   : > { %9679 = vmatpush3.bf16.msra.mxu0 %v10107_v34  ;;  %v10173_v34 = vld [vmem:[%s13290_s3 + $0xc0] sm:$0xff]  }
  0x62   : > { %9680 = vmatprep.subr.bf16.mxu0 %v10110_v35 }
  0x63   : > { %8529 = vmatpush3.bf16.msra.mxu1 %v10098_v29  ;;  %v10151_v29 = vld [vmem:[%s13290_s3 + $0x50] sm:$0xff]  }
  0x64   : > { %9698 = vmatprep.subr.bf16.mxu1 %v10112_v37 }
  0x65   : > { %9681 = vmatpush3.bf16.msra.mxu0 %v10110_v35  ;;  %v10153_v35 = vld [vmem:[%s13290_s3 + $0x48] sm:$0xff]  }
  0x66   : > { %856 = vmatmul.mubr.bf16.gmra.mxu0 %v10948_v31  ;;  %1211 = vmatmul.mubr.bf16.vlgmr.msra.gmra.mxu1 %v10839_v45 }
  0x67   : > { %863 = vmatprep.mubr.bf16.mxu0 %v10955_v33  ;;  %1218 = vmatprep.mubr.bf16.mxu1 %v10857_v54 }
  0x68   : > { %9699 = vmatpush3.bf16.msra.mxu1 %v10112_v37  ;;  %8594 = vmatprep.subr.bf16.mxu0 %v10111_v39  ;;  %v10174_v37 = vld [vmem:[%s13290_s3 + $0x80] sm:$0xff]   ;;  %v11185_v39 = vld [vmem:[#allocation2 + $0x8] sm:$0xff]  }
  0x69   : > { %9700 = vmatprep.subr.bf16.mxu1 %v10115_v40 }
  0x6c   : > { %9701 = vmatpush3.bf16.msra.mxu1 %v10115_v40  ;;  %v10179_v40 = vld [vmem:[%s13290_s3 + $0x138] sm:$0xff]  }
  0x6d   : > { %9702 = vmatprep.subr.bf16.mxu1 %v10118_v41 }
  0x6e   : > { %864 = vmatmul.mubr.bf16.gmra.mxu0 %v10966_v36  ;;  %1219 = vmatmul.mubr.bf16.gmra.mxu1 %v10869_v57 }
  0x6f   : > { %871 = vmatprep.mubr.bf16.mxu0 %v10972_v38  ;;  %1226 = vmatprep.mubr.bf16.mxu1 %v10875_v60 }
  0x70   : > { %9703 = vmatpush3.bf16.msra.mxu1 %v10118_v41  ;;  %v11199_v41 = vld [vmem:[#allocation2] sm:$0xff]  }
  0x71   : > { %9704 = vmatprep.subr.bf16.mxu1 %v10121_v44 }
  0x74   : > { %9705 = vmatpush3.bf16.msra.mxu1 %v10121_v44  ;;  %v10182_v44 = vld [vmem:[%s13290_s3 + $0x130] sm:$0xff]  }
  0x75   : > { %9706 = vmatprep.subr.bf16.mxu1 %v10124_v46 }
  0x76   : > { %872 = vmatmul.mubr.bf16.gmra.mxu0 %v10986_v42  ;;  %1227 = vmatmul.mubr.bf16.gmra.mxu1 %v10898_v10 }
  0x77   : > { %879 = vmatprep.mubr.bf16.mxu0 %v10988_v43  ;;  %1234 = vmatprep.mubr.bf16.mxu1 %v10901_v12 }
  0x78   : > { %9707 = vmatpush3.bf16.msra.mxu1 %v10124_v46  ;;  %v11216_v46 = vld [vmem:[#allocation2 + $0x18] sm:$0xff]  }
  0x79   : > { %9708 = vmatprep.subr.bf16.mxu1 %v10127_v48 }
  0x7c   : > { %9709 = vmatpush3.bf16.msra.mxu1 %v10127_v48  ;;  %v10190_v48 = vld [vmem:[%s13290_s3 + $0x120] sm:$0xff]  }
  0x7d   : > { %9710 = vmatprep.subr.bf16.mxu1 %v10130_v50 }
  0x7e   : > { %880 = vmatmul.mubr.bf16.gmra.mxu0 %v11000_v47  ;;  %1235 = vmatmul.mubr.bf16.gmra.mxu1 %v10926_v23 }
  0x7f   : > { %9682 = vmatprep.mubr.bf16.mxu0 %v10852_v52  ;;  %1242 = vmatprep.mubr.bf16.mxu1 %v10931_v25 }
  0x80   : > { %9711 = vmatpush3.bf16.msra.mxu1 %v10130_v50  ;;  %v11230_v50 = vld [vmem:[#allocation2 + $0x20] sm:$0xff]  }
  0x81   : > { %9712 = vmatprep.subr.bf16.mxu1 %v10133_v56 }
  0x84   : > { %9713 = vmatpush3.bf16.msra.mxu1 %v10133_v56  ;;  %v11245_v56 = vld [vmem:[#allocation2 + $0x28] sm:$0xff]  }
  0x85   : > { %8674 = vmatprep.subr.bf16.mxu1 %v10135_v61  ;;  %v10181_v61 = vld [vmem:[%s13290_s3 + $0x178] sm:$0xff]  }
  0x86   : > { %9683 = vmatmul.mubr.bf16.vlgmr.msra.gmra.mxu0 %v10854_v53  ;;  %1243 = vmatmul.mubr.bf16.gmra.mxu1 %v10948_v31 }
  0x87   : > { %8595 = vmatpush3.bf16.msra.mxu0 %v10113_v51  ;;  %9686 = vmatprep.mubr.bf16.mxu0 %v10878_v63  ;;  %v10198_v51 = vld [vmem:[%s13290_s3 + $0x110] sm:$0xff]  }
  0x88   : > { %8596 = vmatprep.subr.bf16.mxu0 %v10114_v55  ;;  %1250 = vmatprep.mubr.bf16.mxu1 %v10955_v33  ;;  %v11236_v55 = vld [vmem:[#allocation2 + $0x18] sm:$0xff]  }
  0x8b   : > { %8597 = vmatpush3.bf16.msra.mxu0 %v10116_v58  ;;  %v11248_v58 = vld [vmem:[#allocation2 + $0x10] sm:$0xff]  }
  0x8c   : > { %8598 = vmatprep.subr.bf16.mxu0 %v10117_v59  ;;  %v10206_v59 = vld [vmem:[%s13290_s3 + $0x100] sm:$0xff]  }
  0x8e   : > { %9687 = vmatmul.mubr.bf16.gmra.mxu0 %v10880_v1  ;;  %1251 = vmatmul.mubr.bf16.gmra.mxu1 %v10966_v36 }
  0x8f   : > { %8599 = vmatpush3.bf16.msra.mxu0 %v10119_v62  ;;  %9690 = vmatprep.mubr.bf16.mxu0 %v10913_v18  ;;  %v10188_v62 = vld [vmem:[%s13290_s3 + $0x1b0] sm:$0xff]  }
  0x90   : > { %8600 = vmatprep.subr.bf16.mxu0 %v10120_v0  ;;  %1258 = vmatprep.mubr.bf16.mxu1 %v10972_v38  ;;  %v11263_v0 = vld [vmem:[#allocation2 + $0x20] sm:$0xff]  }
  0x93   : > { %8601 = vmatpush3.bf16.msra.mxu0 %v10122_v2  ;;  %v10212_v2 = vld [vmem:[%s13290_s3 + $0x238] sm:$0xff]  }
  0x94   : > { %8602 = vmatprep.subr.bf16.mxu0 %v10123_v3  ;;  %v11269_v3 = vld [vmem:[#allocation2 + $0x30] sm:$0xff]  }
  0x96   : > { %9691 = vmatmul.mubr.bf16.gmra.mxu0 %v10919_v21  ;;  %1259 = vmatmul.mubr.bf16.gmra.mxu1 %v10986_v42 }
  0x97   : > { %8603 = vmatpush3.bf16.msra.mxu0 %v10125_v4  ;;  %9694 = vmatprep.mubr.bf16.mxu0 %v10946_v30  ;;  %v10189_v4 = vld [vmem:[%s13290_s3 + $0x170] sm:$0xff]  }
  0x98   : > { %8604 = vmatprep.subr.bf16.mxu0 %v10126_v5  ;;  %1266 = vmatprep.mubr.bf16.mxu1 %v10988_v43  ;;  %v10196_v5 = vld [vmem:[%s13290_s3 + $0x1a8] sm:$0xff]  }
  0x9b   : > { %8605 = vmatpush3.bf16.msra.mxu0 %v10128_v6  ;;  %v11278_v6 = vld [vmem:[#allocation2 + $0x18] sm:$0xff]  }
  0x9c   : > { %8606 = vmatprep.subr.bf16.mxu0 %v10129_v7  ;;  %v11280_v7 = vld [vmem:[#allocation2 + $0x28] sm:$0xff]  }
  0x9e   : > { %9695 = vmatmul.mubr.bf16.gmra.mxu0 %v10933_v26  ;;  %1267 = vmatmul.mubr.bf16.gmra.mxu1 %v11000_v47 }
  0x9f   : > { %8607 = vmatpush3.bf16.msra.mxu0 %v10131_v8  ;;  %1670 = vmatprep.mubr.bf16.mxu0 %v10844_v49  ;;  %v10137_v49 = vld [vmem:[%s13290_s3 + $0x38] sm:$0xff]   ;;  %v10197_v8 = vld [vmem:[%s13290_s3 + $0x168] sm:$0xff]  }
  0xa0   : > { %8608 = vmatprep.subr.bf16.mxu0 %v10132_v9  ;;  %9714 = vmatprep.mubr.bf16.mxu1 %v10852_v52  ;;  %v10139_v52 = vld [vmem:[%s13290_s3 + $0x70] sm:$0xff]   ;;  %v10204_v9 = vld [vmem:[%s13290_s3 + $0x1a0] sm:$0xff]  }
  0xa3   : > { %8609 = vmatpush3.bf16.msra.mxu0 %v10134_v11  ;;  %v11290_v11 = vld [vmem:[#allocation2 + $0x28] sm:$0xff]  }
  0xa4   : > { %8738 = vmatprep.subr.bf16.mxu0 %v10136_v13  ;;  %v11293_v13 = vld [vmem:[#allocation2 + $0x38] sm:$0xff]  }
  0xa6   : > { %1671 = vmatmul.mubr.bf16.vlgmr.msra.gmra.mxu0 %v10839_v45  ;;  %v10148_v45 = vld [vmem:[%s13290_s3 + $0xe8] sm:$0xff]   ;;  %9715 = vmatmul.mubr.bf16.vlgmr.msra.gmra.mxu1 %v10854_v53 }
  0xa7   : > { %8739 = vmatpush3.bf16.msra.mxu0 %v10138_v14  ;;  %1678 = vmatprep.mubr.bf16.mxu0 %v10857_v54  ;;  %v10150_v54 = vld [vmem:[%s13290_s3 + $0xa8] sm:$0xff]   ;;  %v10205_v14 = vld [vmem:[%s13290_s3 + $0x160] sm:$0xff]  }
  0xa8   : > { %8740 = vmatprep.subr.bf16.mxu0 %v10142_v15  ;;  %8675 = vmatpush3.bf16.msra.mxu1 %v10137_v49  ;;  %v10143_v53 = vld [vmem:[%s13290_s3 + $0x28] sm:$0xff]   ;;  %v10211_v15 = vld [vmem:[%s13290_s3 + $0x198] sm:$0xff]   ;;  %v11302_v49 = vld [vmem:[#allocation2 + $0x20] sm:$0xff]  }
  0xa9   : > { %9718 = vmatprep.mubr.bf16.mxu1 %v10878_v63  ;;  %8676 = vmatprep.subr.bf16.mxu1 %v10139_v52  ;;  %v10156_v63 = vld [vmem:[%s13290_s3 + $0xa0] sm:$0xff]   ;;  %v10213_v52 = vld [vmem:[%s13290_s3 + $0x158] sm:$0xff]  }
  0xab   : > { %8741 = vmatpush3.bf16.msra.mxu0 %v10144_v16  ;;  %v11304_v16 = vld [vmem:[#allocation2 + $0x30] sm:$0xff]  }
  0xac   : > { %8742 = vmatprep.subr.bf16.mxu0 %v10148_v45  ;;  %8677 = vmatpush3.bf16.msra.mxu1 %v10140_v17  ;;  %v10221_v45 = vld [vmem:[%s13290_s3 + $0x190] sm:$0xff]  }
  0xad   : > { %8678 = vmatprep.subr.bf16.mxu1 %v10141_v20  ;;  %v11314_v17 = vld [vmem:[#allocation2 + $0x30] sm:$0xff]   ;;  %v10231_v20 = vld [vmem:[%s13290_s3 + $0x188] sm:$0xff]  }
  0xae   : > { %1679 = vmatmul.mubr.bf16.gmra.mxu0 %v10869_v57  ;;  %v10161_v57 = vld [vmem:[%s13290_s3 + $0xd8] sm:$0xff]   ;;  %9719 = vmatmul.mubr.bf16.gmra.mxu1 %v10880_v1 }
  0xaf   : > { %1686 = vmatprep.mubr.bf16.mxu0 %v10875_v60  ;;  %8743 = vmatpush3.bf16.msra.mxu0 %v10150_v54  ;;  %v10146_v60 = vld [vmem:[%s13290_s3 + $0x20] sm:$0xff]   ;;  %v10149_v1 = vld [vmem:[%s13290_s3 + $0x18] sm:$0xff]  }
  0xb0   : > { %8744 = vmatprep.subr.bf16.mxu0 %v10154_v19  ;;  %8679 = vmatpush3.bf16.msra.mxu1 %v10143_v53  ;;  %v11317_v54 = vld [vmem:[#allocation2 + $0x40] sm:$0xff]   ;;  %v10223_v19 = vld [vmem:[%s13290_s3 + $0x150] sm:$0xff]   ;;  %v11326_v53 = vld [vmem:[#allocation2 + $0x28] sm:$0xff]  }
  0xb1   : > { %9722 = vmatprep.mubr.bf16.mxu1 %v10913_v18  ;;  %8680 = vmatprep.subr.bf16.mxu1 %v10145_v22  ;;  %v10166_v18 = vld [vmem:[%s13290_s3 + $0x90] sm:$0xff]   ;;  %v10233_v22 = vld [vmem:[%s13290_s3 + $0x148] sm:$0xff]  }
  0xb3   : > { %8745 = vmatpush3.bf16.msra.mxu0 %v10156_v63  ;;  %v11328_v63 = vld [vmem:[#allocation2 + $0x38] sm:$0xff]  }
  0xb4   : > { %8746 = vmatprep.subr.bf16.mxu0 %v10161_v57  ;;  %8681 = vmatpush3.bf16.msra.mxu1 %v10146_v60  ;;  %v10241_v57 = vld [vmem:[%s13290_s3 + $0x180] sm:$0xff]   ;;  %v11338_v60 = vld [vmem:[#allocation2 + $0x38] sm:$0xff]  }
  0xb5   : > { %8682 = vmatprep.subr.bf16.mxu1 %v10147_v28  ;;  %v11350_v28 = vld [vmem:[%s13290_s3 + $0x278] sm:$0xff]  }
  0xb6   : > { %1687 = vmatmul.mubr.bf16.gmra.mxu0 %v10898_v10  ;;  %v10169_v10 = vld [vmem:[%s13290_s3 + $0xc8] sm:$0xff]   ;;  %9723 = vmatmul.mubr.bf16.gmra.mxu1 %v10919_v21 }
  0xb7   : > { %1694 = vmatprep.mubr.bf16.mxu0 %v10901_v12  ;;  %8747 = vmatpush3.bf16.msra.mxu0 %v10162_v24  ;;  %v10152_v12 = vld [vmem:[%s13290_s3 + $0x10] sm:$0xff]   ;;  %v10155_v21 = vld [vmem:[%s13290_s3 + $0x8] sm:$0xff]   ;;  %v11341_v24 = vld [vmem:[#allocation2 + $0x20] sm:$0xff]  }
  0xb8   : > { %8748 = vmatprep.subr.bf16.mxu0 %v10165_v27  ;;  %8683 = vmatpush3.bf16.msra.mxu1 %v10149_v1  ;;  %v10243_v27 = vld [vmem:[%s13290_s3 + $0x140] sm:$0xff]   ;;  %v11352_v1 = vld [vmem:[#allocation2 + $0x30] sm:$0xff]  }
  0xb9   : > { %9726 = vmatprep.mubr.bf16.mxu1 %v10946_v30  ;;  %8684 = vmatprep.subr.bf16.mxu1 %v10151_v29  ;;  %v10157_v30 = vld [vmem:[%s13290_s3 + $0x40] sm:$0xff]  }
  0xbb   : > { %8749 = vmatpush3.bf16.msra.mxu0 %v10166_v18  ;;  %v11355_v18 = vld [vmem:[#allocation2 + $0x40] sm:$0xff]  }
  0xbc   : > { %8750 = vmatprep.subr.bf16.mxu0 %v10169_v10  ;;  %8685 = vmatpush3.bf16.msra.mxu1 %v10152_v12  ;;  %v11360_v10 = vld [vmem:[#allocation2 + $0x28] sm:$0xff]  }
  0xbd   : > { %8686 = vmatprep.subr.bf16.mxu1 %v10153_v35  ;;  %v11366_v35 = vld [vmem:[#allocation2 + $0x30] sm:$0xff]  }
  0xbe   : > { %1695 = vmatmul.mubr.bf16.gmra.mxu0 %v10926_v23  ;;  %v10180_v23 = vld [vmem:[%s13290_s3 + $0x1b8] sm:$0xff]   ;;  %9727 = vmatmul.mubr.bf16.gmra.mxu1 %v10933_v26  ;;  %v11202_v26 = vld [vmem:[#allocation2 + $0x10] sm:$0xff]  }
  0xbf   : > { %1702 = vmatprep.mubr.bf16.mxu0 %v10931_v25  ;;  %8751 = vmatpush3.bf16.msra.mxu0 %v10170_v32  ;;  %v10158_v25 = vld [vmem:[%s13290_s3] sm:$0xff]   ;;  %v10214_v32 = vld [vmem:[%s13290_s3 + $0x1f8] sm:$0xff]  }
  0xc0   : > { %8752 = vmatprep.subr.bf16.mxu0 %v10173_v34  ;;  %8687 = vmatpush3.bf16.msra.mxu1 %v10155_v21 }
  0xc1   : > { %2855 = vmatprep.mubr.bf16.mxu1 %v11185_v39  ;;  %8688 = vmatprep.subr.bf16.mxu1 %v10157_v30 }
  0xc3   : > { %8753 = vmatpush3.bf16.msra.mxu0 %v10174_v37  ;;  %v10215_v37 = vld [vmem:[%s13290_s3 + $0x230] sm:$0xff]  }
  0xc4   : > { %8818 = vmatprep.subr.bf16.mxu0 %v10180_v23  ;;  %8689 = vmatpush3.bf16.msra.mxu1 %v10158_v25  ;;  %v11371_v25 = vld [vmem:[#allocation2 + $0x38] sm:$0xff]  }
  0xc5   : > { %9730 = vmatprep.subr.bf16.mxu1 %v10179_v40 }
  0xc6   : > { %1703 = vmatmul.mubr.bf16.gmra.mxu0 %v10948_v31  ;;  %v10187_v31 = vld [vmem:[%s13290_s3 + $0x128] sm:$0xff]  }
  0xc7   : > { %1710 = vmatprep.mubr.bf16.mxu0 %v10955_v33  ;;  %2856 = vmatmul.mubr.bf16.vlgmr.msra.gmra.mxu1 %v11199_v41  ;;  %v11213_v33 = vld [vmem:[#allocation2 + $0x8] sm:$0xff]  }
  0xc8   : > { %2862 = vmatprep.mubr.bf16.mxu1 %v11202_v26  ;;  %9731 = vmatpush3.bf16.msra.mxu1 %v10179_v40 }
  0xc9   : > { %9732 = vmatprep.subr.bf16.mxu1 %v10182_v44 }
  0xcc   : > { %9733 = vmatpush3.bf16.msra.mxu1 %v10182_v44 }
  0xcd   : > { %9734 = vmatprep.subr.bf16.mxu1 %v10187_v31 }
  0xce   : > { %1711 = vmatmul.mubr.bf16.gmra.mxu0 %v10966_v36  ;;  %v10195_v36 = vld [vmem:[%s13290_s3 + $0x118] sm:$0xff]  }
  0xcf   : > { %1718 = vmatprep.mubr.bf16.mxu0 %v10972_v38  ;;  %2863 = vmatmul.mubr.bf16.gmra.mxu1 %v11213_v33  ;;  %v11227_v38 = vld [vmem:[#allocation2 + $0x10] sm:$0xff]  }
  0xd0   : > { %2869 = vmatprep.mubr.bf16.mxu1 %v11216_v46  ;;  %9735 = vmatpush3.bf16.msra.mxu1 %v10187_v31  ;;  %v11376_v31 = vld [vmem:[#allocation2 + $0x48] sm:$0xff]  }
  0xd1   : > { %9736 = vmatprep.subr.bf16.mxu1 %v10190_v48 }
  0xd4   : > { %9737 = vmatpush3.bf16.msra.mxu1 %v10190_v48  ;;  %v10216_v48 = vld [vmem:[%s13290_s3 + $0x1f0] sm:$0xff]  }
  0xd5   : > { %9738 = vmatprep.subr.bf16.mxu1 %v10195_v36 }
  0xd6   : > { %1719 = vmatmul.mubr.bf16.gmra.mxu0 %v10986_v42  ;;  %v10203_v42 = vld [vmem:[%s13290_s3 + $0x108] sm:$0xff]  }
  0xd7   : > { %1726 = vmatprep.mubr.bf16.mxu0 %v10988_v43  ;;  %2870 = vmatmul.mubr.bf16.gmra.mxu1 %v11227_v38  ;;  %v11243_v43 = vld [vmem:[#allocation2 + $0x18] sm:$0xff]  }
  0xd8   : > { %2876 = vmatprep.mubr.bf16.mxu1 %v11230_v50  ;;  %9739 = vmatpush3.bf16.msra.mxu1 %v10195_v36 }
  0xd9   : > { %9740 = vmatprep.subr.bf16.mxu1 %v10198_v51 }
  0xdc   : > { %9741 = vmatpush3.bf16.msra.mxu1 %v10198_v51 }
  0xdd   : > { %9742 = vmatprep.subr.bf16.mxu1 %v10203_v42 }
  0xde   : > { %1727 = vmatmul.mubr.bf16.gmra.mxu0 %v11000_v47  ;;  %v11257_v47 = vld [vmem:[#allocation2 + $0x20] sm:$0xff]  }
  0xdf   : > { %2944 = vmatprep.mubr.bf16.mxu0 %v11236_v55  ;;  %2877 = vmatmul.mubr.bf16.gmra.mxu1 %v11243_v43 }
  0xe0   : > { %2883 = vmatprep.mubr.bf16.mxu1 %v11245_v56  ;;  %9743 = vmatpush3.bf16.msra.mxu1 %v10203_v42 }
  0xe1   : > { %9744 = vmatprep.subr.bf16.mxu1 %v10206_v59 }
  0xe4   : > { %9745 = vmatpush3.bf16.msra.mxu1 %v10206_v59  ;;  %v10222_v59 = vld [vmem:[%s13290_s3 + $0x228] sm:$0xff]  }
  0xe5   : > { %8882 = vmatprep.subr.bf16.mxu1 %v10212_v2 }
  0xe6   : > { %2945 = vmatmul.mubr.bf16.vlgmr.msra.gmra.mxu0 %v11248_v58 }
  0xe7   : > { %8819 = vmatpush3.bf16.msra.mxu0 %v10181_v61  ;;  %2951 = vmatprep.mubr.bf16.mxu0 %v11257_v47 }
  0xe8   : > { %8820 = vmatprep.subr.bf16.mxu0 %v10188_v62  ;;  %2884 = vmatmul.mubr.bf16.gmra.mxu1 %v11263_v0  ;;  %v10220_v62 = vld [vmem:[#allocation2 + $0x38] sm:$0xff]  }
  0xe9   : > { %2890 = vmatprep.mubr.bf16.mxu1 %v11269_v3 }
  0xeb   : > { %8821 = vmatpush3.bf16.msra.mxu0 %v10189_v4 }
  0xec   : > { %8822 = vmatprep.subr.bf16.mxu0 %v10196_v5  ;;  %v10224_v5 = vld [vmem:[%s13290_s3 + $0x1e8] sm:$0xff]  }
  0xee   : > { %2952 = vmatmul.mubr.bf16.gmra.mxu0 %v11278_v6 }
  0xef   : > { %2958 = vmatprep.mubr.bf16.mxu0 %v11280_v7  ;;  %8823 = vmatpush3.bf16.msra.mxu0 %v10197_v8 }
  0xf0   : > { %8824 = vmatprep.subr.bf16.mxu0 %v10204_v9  ;;  %2891 = vmatmul.mubr.bf16.gmra.mxu1 %v11290_v11  ;;  %v10228_v9 = vld [vmem:[#allocation2 + $0x40] sm:$0xff]  }
  0xf1   : > { %2897 = vmatprep.mubr.bf16.mxu1 %v11293_v13 }
  0xf3   : > { %8825 = vmatpush3.bf16.msra.mxu0 %v10205_v14 }
  0xf4   : > { %8826 = vmatprep.subr.bf16.mxu0 %v10211_v15 }
  0xf6   : > { %2959 = vmatmul.mubr.bf16.gmra.mxu0 %v11302_v49 }
  0xf7   : > { %2965 = vmatprep.mubr.bf16.mxu0 %v11304_v16  ;;  %8827 = vmatpush3.bf16.msra.mxu0 %v10213_v52  ;;  %v10225_v52 = vld [vmem:[%s13290_s3 + $0x220] sm:$0xff]  }
  0xf8   : > { %8828 = vmatprep.subr.bf16.mxu0 %v10221_v45  ;;  %2898 = vmatmul.mubr.bf16.gmra.mxu1 %v11314_v17 }
  0xf9   : > { %2904 = vmatprep.mubr.bf16.mxu1 %v11317_v54 }
  0xfb   : > { %8829 = vmatpush3.bf16.msra.mxu0 %v10223_v19  ;;  %v11397_v19 = vld [vmem:[#allocation2 + $0x40] sm:$0xff]  }
  0xfc   : > { %8830 = vmatprep.subr.bf16.mxu0 %v10231_v20 }
  0xfe   : > { %2966 = vmatmul.mubr.bf16.gmra.mxu0 %v11326_v53 }
  0xff   : > { %2972 = vmatprep.mubr.bf16.mxu0 %v11328_v63  ;;  %8831 = vmatpush3.bf16.msra.mxu0 %v10233_v22 }
 0x100   : > { %8832 = vmatprep.subr.bf16.mxu0 %v10241_v57  ;;  %2905 = vmatmul.mubr.bf16.gmra.mxu1 %v11338_v60  ;;  %v11403_v57 = vld [vmem:[#allocation2 + $0x50] sm:$0xff]  }
 0x101   : > { %9746 = vmatprep.mubr.bf16.mxu1 %v11341_v24 }
 0x103   : > { %8833 = vmatpush3.bf16.msra.mxu0 %v10243_v27  ;;  %v10226_v27 = vld [vmem:[%s13290_s3 + $0x1e0] sm:$0xff]  }
 0x104   : > { %9762 = vmatprep.subr.bf16.mxu0 %v11350_v28 }
 0x106   : > { %v8450_v29 = vpop.f32.mrf.mxu0  ;;  %2973 = vmatmul.mubr.bf16.gmra.mxu0 %v11352_v1  ;;  %v9652_v12 = vpop.f32.mrf.mxu1 }
 0x107   : > { %2979 = vmatprep.mubr.bf16.mxu0 %v11355_v18 }
 0x108   : > { %v8451_v34 = vpop.f32.mrf.mxu0  ;;  %v922_v30 = vpop.f32.mrf.mxu1  ;;  %9747 = vmatmul.mubr.bf16.vlgmr.msra.gmra.mxu1 %v11360_v10 }
 0x109   : > { %v8452_v21 = vadd.f32 %v8451_v34, %v8450_v29  ;;  %8883 = vmatpush3.bf16.msra.mxu1 %v10214_v32  ;;  %9750 = vmatprep.mubr.bf16.mxu1 %v11366_v35  ;;  %v10232_v34 = vld [vmem:[%s13290_s3 + $0x218] sm:$0xff]  }
 0x10a   : > { %v8453_v23 = vpop.f32.mrf.mxu0  ;;  %v9653_v44 = vpop.f32.mrf.mxu1  ;;  %8884 = vmatprep.subr.bf16.mxu1 %v10215_v37 }
 0x10b   : > { %v11374_v40 = vadd.f32 %v8452_v21, %v922_v30  ;;  %v10230_v30 = vld [vmem:[#allocation2 + $0x48] sm:$0xff]  }
 0x10c   : > { %v8454_v36 = vpop.f32.mrf.mxu0  ;;  %v925_v42 = vpop.f32.mrf.mxu1 }
 0x10d   : > { %v8455_v51 = vadd.f32 %v8454_v36, %v8453_v23  ;;  %8885 = vmatpush3.bf16.msra.mxu1 %v10216_v48  ;;  %v10234_v23 = vld [vmem:[%s13290_s3 + $0x1d8] sm:$0xff]   ;;  %v10238_v36 = vld [vmem:[#allocation2 + $0x50] sm:$0xff]  }
 0x10e   : > { %v8456_v61 = vpop.f32.mrf.mxu0  ;;  %2980 = vmatmul.mubr.bf16.gmra.mxu0 %v11371_v25  ;;  %v11388_v4 = vpop.f32.mrf.mxu1  ;;  %8886 = vmatprep.subr.bf16.mxu1 %v10222_v59 }
 0x10f   : > { %v11386_v2 = vadd.f32 %v8455_v51, %v925_v42  ;;  %2986 = vmatprep.mubr.bf16.mxu0 %v11376_v31  ;;  %v10235_v42 = vld [vmem:[%s13290_s3 + $0x210] sm:$0xff]  }
 0x110   : > { %v8457_v8 = vpop.f32.mrf.mxu0  ;;  %v938_v15 = vpop.f32.mrf.mxu1  ;;  %9751 = vmatmul.mubr.bf16.gmra.mxu1 %v10220_v62 }
 0x111   : > { %v8458_v14 = vadd.f32 %v8457_v8, %v8456_v61  ;;  %8887 = vmatpush3.bf16.msra.mxu1 %v10224_v5  ;;  %9754 = vmatprep.mubr.bf16.mxu1 %v10228_v9  ;;  %v10236_v5 = vld [vmem:[%s13290_s3 + $0x1d0] sm:$0xff]  }
 0x112   : > { %v8459_v45 = vpop.f32.mrf.mxu0  ;;  %v11401_v22 = vpop.f32.mrf.mxu1  ;;  %8888 = vmatprep.subr.bf16.mxu1 %v10225_v52  ;;  %v10242_v52 = vld [vmem:[%s13290_s3 + $0x208] sm:$0xff]  }
 0x113   : > { %v11399_v20 = vadd.f32 %v9652_v12, %v8458_v14 }
 0x114   : > { %v8460_v29 = vpop.f32.mrf.mxu0  ;;  %v941_v21 = vpop.f32.mrf.mxu1 }
 0x115   : > { %v8461_v32 = vadd.f32 %v8460_v29, %v8459_v45  ;;  %8889 = vmatpush3.bf16.msra.mxu1 %v10226_v27 }
 0x116   : > { %v8462_v12 = vpop.f32.mrf.mxu0  ;;  %2987 = vmatmul.mubr.bf16.gmra.mxu0 %v11397_v19  ;;  %8890 = vmatprep.subr.bf16.mxu1 %v10232_v34  ;;  %v11421_v59 = vpop.f32.mrf.mxu1 }
 0x117   : > { %v11412_v37 = vadd.f32 %v9653_v44, %v8461_v32  ;;  %2993 = vmatprep.mubr.bf16.mxu0 %v11403_v57  ;;  %v11423_v44 = vld [vmem:[#allocation2 + $0x48] sm:$0xff]  }
 0x118   : > { %v8463_v48 = vpop.f32.mrf.mxu0  ;;  %9755 = vmatmul.mubr.bf16.gmra.mxu1 %v10230_v30  ;;  %v954_v8 = vpop.f32.mrf.mxu1  ;;  %v10244_v32 = vld [vmem:[%s13290_s3 + $0x1c8] sm:$0xff]  }
 0x119   : > { %v8464_v51 = vadd.f32 %v8463_v48, %v8462_v12  ;;  %8891 = vmatpush3.bf16.msra.mxu1 %v10234_v23  ;;  %9758 = vmatprep.mubr.bf16.mxu1 %v10238_v36  ;;  %v10245_v23 = vld [vmem:[%s13290_s3 + $0x200] sm:$0xff]  }
 0x11a   : > { %v8465_v61 = vpop.f32.mrf.mxu0  ;;  %8892 = vmatprep.subr.bf16.mxu1 %v10235_v42  ;;  %v11433_v45 = vpop.f32.mrf.mxu1  ;;  %v10248_v42 = vld [vmem:[%s13290_s3 + $0x270] sm:$0xff]  }
 0x11b   : > { %v11425_v62 = vadd.f32 %v8464_v51, %v938_v15  ;;  %v10240_v15 = vld [vmem:[#allocation2 + $0x58] sm:$0xff]  }
 0x11c   : > { %v8466_v9 = vpop.f32.mrf.mxu0  ;;  %v957_v34 = vpop.f32.mrf.mxu1 }
 0x11d   : > { %v8467_v14 = vadd.f32 %v8466_v9, %v8465_v61  ;;  %8893 = vmatpush3.bf16.msra.mxu1 %v10236_v5  ;;  %v10252_v9 = vld [vmem:[%s13290_s3 + $0x2f8] sm:$0xff]  }
 0x11e   : > { %v8468_v27 = vpop.f32.mrf.mxu0  ;;  %2994 = vmatmul.mubr.bf16.gmra.mxu0 %v11423_v44  ;;  %8894 = vmatprep.subr.bf16.mxu1 %v10242_v52  ;;  %v11448_v36 = vpop.f32.mrf.mxu1 }
 0x11f   : > { %v11436_v29 = vadd.f32 %v8467_v14, %v941_v21  ;;  %3443 = vmatprep.mubr.bf16.mxu0 %v11185_v39  ;;  %v10246_v21 = vld [vmem:[%s13290_s3 + $0x1c0] sm:$0xff]  }
 0x120   : > { %v8469_v12 = vpop.f32.mrf.mxu0  ;;  %9759 = vmatmul.mubr.bf16.gmra.mxu1 %v10240_v15  ;;  %v11457_v61 = vpop.f32.mrf.mxu1 }
 0x121   : > { %v8470_v30 = vadd.f32 %v8469_v12, %v8468_v27  ;;  %8895 = vmatpush3.bf16.msra.mxu1 %v10244_v32  ;;  %3540 = vmatprep.mubr.bf16.mxu1 %v11236_v55 }
 0x122   : > { %v8471_v48 = vpop.f32.mrf.mxu0  ;;  %8896 = vmatprep.subr.bf16.mxu1 %v10245_v23  ;;  %v11466_v55 = vpop.f32.mrf.mxu1  ;;  %v10250_v23 = vld [vmem:[%s13290_s3 + $0x260] sm:$0xff]  }
 0x123   : > { %v11451_v51 = vadd.f32 %v11388_v4, %v8470_v30  ;;  %v10249_v4 = vld [vmem:[%s13290_s3 + $0x268] sm:$0xff]  }
 0x124   : > { %v8472_v39 = vpop.f32.mrf.mxu0  ;;  %v11476_v15 = vpop.f32.mrf.mxu1 }
 0x125   : > { %v8473_v5 = vadd.f32 %v8472_v39, %v8471_v48  ;;  %8897 = vmatpush3.bf16.msra.mxu1 %v10246_v21  ;;  %v10255_v39 = vld [vmem:[%s13290_s3 + $0x2b0] sm:$0xff]  }
 0x126   : > { %v8474_v14 = vpop.f32.mrf.mxu0  ;;  %3444 = vmatmul.mubr.bf16.vlgmr.msra.gmra.mxu0 %v11199_v41  ;;  %v10253_v41 = vld [vmem:[%s13290_s3 + $0x2b8] sm:$0xff]   ;;  %8962 = vmatprep.subr.bf16.mxu1 %v10252_v9  ;;  %v8530_v30 = vpop.f32.mrf.mxu1 }
 0x127   : > { %v11469_v52 = vadd.f32 %v11401_v22, %v8473_v5  ;;  %9763 = vmatpush3.bf16.msra.mxu0 %v11350_v28  ;;  %3451 = vmatprep.mubr.bf16.mxu0 %v11202_v26  ;;  %v10254_v22 = vld [vmem:[%s13290_s3 + $0x2f0] sm:$0xff]  }
 0x128   : > { %v8475_v27 = vpop.f32.mrf.mxu0  ;;  %9764 = vmatprep.subr.bf16.mxu0 %v10248_v42  ;;  %3541 = vmatmul.mubr.bf16.vlgmr.msra.gmra.mxu1 %v11248_v58  ;;  %v8531_v48 = vpop.f32.mrf.mxu1 }
 0x129   : > { %v8476_v32 = vadd.f32 %v8475_v27, %v8474_v14  ;;  %3548 = vmatprep.mubr.bf16.mxu1 %v11257_v47  ;;  %8963 = vmatpush3.bf16.msra.mxu1 %v10253_v41  ;;  %v11491_v5 = vadd.f32 %v8531_v48, %v8530_v30  ;;  %v10251_v47 = vld [vmem:[%s13290_s3 + $0x258] sm:$0xff]   ;;  %v10258_v41 = vld [vmem:[%s13290_s3 + $0x2a8] sm:$0xff]  }
 0x12a   : > { %v8477_v12 = vpop.f32.mrf.mxu0  ;;  %8964 = vmatprep.subr.bf16.mxu1 %v10254_v22  ;;  %v10256_v22 = vld [vmem:[%s13290_s3 + $0x250] sm:$0xff]  }
 0x12b   : > { %v11482_v26 = vadd.f32 %v8476_v32, %v954_v8  ;;  %9765 = vmatpush3.bf16.msra.mxu0 %v10248_v42  ;;  %v10257_v8 = vld [vmem:[%s13290_s3 + $0x2e8] sm:$0xff]   ;;  %v11500_v42 = vpop.f32.mrf.mxu1 }
 0x12c   : > { %v8478_v28 = vpop.f32.mrf.mxu0  ;;  %9766 = vmatprep.subr.bf16.mxu0 %v10249_v4 }
 0x12d   : > { %v8479_v21 = vadd.f32 %v8478_v28, %v8477_v12  ;;  %v11505_v27 = vpop.f32.mrf.mxu1  ;;  %8965 = vmatpush3.bf16.msra.mxu1 %v10255_v39 }
 0x12e   : > { %v8480_v58 = vpop.f32.mrf.mxu0  ;;  %3452 = vmatmul.mubr.bf16.gmra.mxu0 %v11213_v33  ;;  %8966 = vmatprep.subr.bf16.mxu1 %v10257_v8  ;;  %v10263_v8 = vld [vmem:[%s13290_s3 + $0x298] sm:$0xff]  }
 0x12f   : > { %v11502_v9 = vadd.f32 %v8479_v21, %v957_v34  ;;  %3459 = vmatprep.mubr.bf16.mxu0 %v11216_v46  ;;  %9767 = vmatpush3.bf16.msra.mxu0 %v10249_v4  ;;  %v10259_v34 = vld [vmem:[%s13290_s3 + $0x2e0] sm:$0xff]   ;;  %v11513_v12 = vpop.f32.mrf.mxu1 }
 0x130   : > { %v8481_v14 = vpop.f32.mrf.mxu0  ;;  %9768 = vmatprep.subr.bf16.mxu0 %v10250_v23  ;;  %3549 = vmatmul.mubr.bf16.gmra.mxu1 %v11278_v6  ;;  %v10260_v6 = vld [vmem:[%s13290_s3 + $0x2a0] sm:$0xff]  }
 0x131   : > { %v8482_v33 = vadd.f32 %v8481_v14, %v8480_v58  ;;  %3556 = vmatprep.mubr.bf16.mxu1 %v11280_v7  ;;  %v11523_v30 = vpop.f32.mrf.mxu1  ;;  %8967 = vmatpush3.bf16.msra.mxu1 %v10258_v41  ;;  %v10261_v7 = vld [vmem:[%s13290_s3 + $0x248] sm:$0xff]  }
 0x132   : > { %v8483_v32 = vpop.f32.mrf.mxu0  ;;  %8968 = vmatprep.subr.bf16.mxu1 %v10259_v34 }
 0x133   : > { %v11517_v46 = vadd.f32 %v11421_v59, %v8482_v33  ;;  %9769 = vmatpush3.bf16.msra.mxu0 %v10250_v23  ;;  %v10262_v59 = vld [vmem:[%s13290_s3 + $0x2d8] sm:$0xff]   ;;  %v11535_v23 = vpop.f32.mrf.mxu1 }
 0x134   : > { %v8484_v4 = vpop.f32.mrf.mxu0  ;;  %9770 = vmatprep.subr.bf16.mxu0 %v10251_v47 }
 0x135   : > { %v8485_v28 = vadd.f32 %v8484_v4, %v8483_v32  ;;  %8969 = vmatpush3.bf16.msra.mxu1 %v10260_v6  ;;  %v10265_v4 = vld [vmem:[%s13290_s3 + $0x290] sm:$0xff]  }
 0x136   : > { %v8486_v48 = vpop.f32.mrf.mxu0  ;;  %3460 = vmatmul.mubr.bf16.gmra.mxu0 %v11227_v38  ;;  %v11541_v38 = vpop.f32.mrf.mxu1  ;;  %8970 = vmatprep.subr.bf16.mxu1 %v10262_v59  ;;  %v10268_v59 = vld [vmem:[%s13290_s3 + $0x288] sm:$0xff]  }
 0x137   : > { %v11538_v21 = vadd.f32 %v11433_v45, %v8485_v28  ;;  %3467 = vmatprep.mubr.bf16.mxu0 %v11230_v50  ;;  %9771 = vmatpush3.bf16.msra.mxu0 %v10251_v47  ;;  %v10264_v45 = vld [vmem:[%s13290_s3 + $0x2d0] sm:$0xff]   ;;  %v10266_v50 = vld [vmem:[%s13290_s3 + $0x240] sm:$0xff]  }
 0x138   : > { %v8487_v39 = vpop.f32.mrf.mxu0  ;;  %9772 = vmatprep.subr.bf16.mxu0 %v10256_v22  ;;  %v11552_v47 = vpop.f32.mrf.mxu1  ;;  %3557 = vmatmul.mubr.bf16.gmra.mxu1 %v11302_v49  ;;  %v10267_v49 = vld [vmem:[%s13290_s3 + $0x2c8] sm:$0xff]  }
 0x139   : > { %v8488_v58 = vadd.f32 %v8487_v39, %v8486_v48  ;;  %3564 = vmatprep.mubr.bf16.mxu1 %v11304_v16  ;;  %8971 = vmatpush3.bf16.msra.mxu1 %v10263_v8  ;;  %v10271_v16 = vld [vmem:[%s13290_s3 + $0x378] sm:$0xff]  }
 0x13a   : > { %v8489_v14 = vpop.f32.mrf.mxu0  ;;  %v11559_v32 = vpop.f32.mrf.mxu1  ;;  %8972 = vmatprep.subr.bf16.mxu1 %v10264_v45  ;;  %v10270_v45 = vld [vmem:[%s13290_s3 + $0x280] sm:$0xff]  }
 0x13b   : > { %v11556_v33 = vadd.f32 %v8488_v58, %v11457_v61  ;;  %9773 = vmatpush3.bf16.msra.mxu0 %v10256_v22 }
 0x13c   : > { %v8490_v41 = vpop.f32.mrf.mxu0  ;;  %9774 = vmatprep.subr.bf16.mxu0 %v10261_v7  ;;  %v11571_v61 = vpop.f32.mrf.mxu1 }
 0x13d   : > { %v8491_v34 = vadd.f32 %v8490_v41, %v8489_v14  ;;  %8973 = vmatpush3.bf16.msra.mxu1 %v10265_v4 }
 0x13e   : > { %v8492_v28 = vpop.f32.mrf.mxu0  ;;  %3468 = vmatmul.mubr.bf16.gmra.mxu0 %v11243_v43  ;;  %v11577_v43 = vpop.f32.mrf.mxu1  ;;  %8974 = vmatprep.subr.bf16.mxu1 %v10267_v49 }
 0x13f   : > { %v11574_v22 = vadd.f32 %v8491_v34, %v11476_v15  ;;  %3475 = vmatprep.mubr.bf16.mxu0 %v11245_v56  ;;  %9775 = vmatpush3.bf16.msra.mxu0 %v10261_v7  ;;  %v10269_v15 = vld [vmem:[%s13290_s3 + $0x2c0] sm:$0xff]  }
 0x140   : > { %v8493_v6 = vpop.f32.mrf.mxu0  ;;  %9776 = vmatprep.subr.bf16.mxu0 %v10266_v50  ;;  %v8548_v58 = vpop.f32.mrf.mxu1  ;;  %3565 = vmatmul.mubr.bf16.gmra.mxu1 %v11326_v53  ;;  %v11599_v53 = vld [vmem:[%s13290_s3 + $0x3b8] sm:$0xff]  }
 0x141   : > { %v8494_v48 = vadd.f32 %v8493_v6, %v8492_v28  ;;  %3572 = vmatprep.mubr.bf16.mxu1 %v11328_v63  ;;  %8975 = vmatpush3.bf16.msra.mxu1 %v10268_v59 }
 0x142   : > { %v8495_v39 = vpop.f32.mrf.mxu0  ;;  %v8549_v8 = vpop.f32.mrf.mxu1  ;;  %8976 = vmatprep.subr.bf16.mxu1 %v10269_v15 }
 0x143   : > { %v11587_v56 = vadd.f32 %v11448_v36, %v8494_v48  ;;  %9777 = vmatpush3.bf16.msra.mxu0 %v10266_v50 }
 0x144   : > { %v8496_v7 = vpop.f32.mrf.mxu0  ;;  %9026 = vmatprep.subr.bf16.mxu0 %v10271_v16  ;;  %v8551_v36 = vpop.f32.mrf.mxu1 }
 0x145   : > { %v8497_v14 = vadd.f32 %v8496_v7, %v8495_v39  ;;  %8977 = vmatpush3.bf16.msra.mxu1 %v10270_v45 }
 0x146   : > { %v11593_v41 = vpop.f32.mrf.mxu0  ;;  %3476 = vmatmul.mubr.bf16.gmra.mxu0 %v11263_v0  ;;  %v8552_v34 = vpop.f32.mrf.mxu1  ;;  %9794 = vmatprep.subr.bf16.mxu1 %v11599_v53  ;;  %v8535_v0 = vadd.f32 %v11505_v27, %v11500_v42 }
 0x147   : > { %v11602_v63 = vadd.f32 %v11466_v55, %v8497_v14  ;;  %3483 = vmatprep.mubr.bf16.mxu0 %v11269_v3  ;;  %v8550_v55 = vadd.f32 %v8549_v8, %v8548_v58  ;;  %v8553_v59 = vadd.f32 %v8552_v34, %v8551_v36 }
 0x148   : > { %v1309_v50 = vpop.f32.mrf.mxu0  ;;  %v8554_v28 = vpop.f32.mrf.mxu1  ;;  %3573 = vmatmul.mubr.bf16.gmra.mxu1 %v11352_v1 }
 0x149   : > { %v1310_v49 = vadd.f32 %v11491_v5, %v1309_v50  ;;  %3580 = vmatprep.mubr.bf16.mxu1 %v11355_v18 }
 0x14a   : > { %v11605_v4 = vpop.f32.mrf.mxu0  ;;  %v8555_v3 = vpop.f32.mrf.mxu1 }
 0x14b   : > { %v1389_v39 = vrot.slane %v1310_v49, 1 }
 0x14c   : > { %v1312_v16 = vpop.f32.mrf.mxu0  ;;  %v8557_v15 = vpop.f32.mrf.mxu1 }
 0x14d   : > { %v11613_v6 = vadd.f32 %v8535_v0, %v1312_v16 }
 0x14e   : > { %v9688_v48 = vpop.f32.mrf.mxu0  ;;  %3484 = vmatmul.mubr.bf16.gmra.mxu0 %v11290_v11  ;;  %v8558_v5 = vpop.f32.mrf.mxu1 }
 0x14f   : > { %v13297_v42 = vrot.slane %v11613_v6, 1  ;;  %3491 = vmatprep.mubr.bf16.mxu0 %v11293_v13  ;;  %v1334_v27 = vadd.f32 %v9688_v48, %v8550_v55  ;;  %v8559_v49 = vadd.f32 %v8558_v5, %v8557_v15 }
 0x150   : > { %v11618_v1 = vpop.f32.mrf.mxu0  ;;  %v11626_v11 = vpop.f32.mrf.mxu1  ;;  %3581 = vmatmul.mubr.bf16.gmra.mxu1 %v11371_v25 }
 0x151   : > { %v1391_v18 = vsel %vm1388_vm0, %v1389_v39, %v13297_v42  ;;  %3588 = vmatprep.mubr.bf16.mxu1 %v11376_v31  ;;  %v1398_v13 = vrot.slane %v1334_v27, 1 }
 0x152   : > { %v11624_v58 = vadd.f32 %v1391_v18, %v11374_v40  ;;  %v9689_v7 = vpop.f32.mrf.mxu0  ;;  %v11634_v45 = vpop.f32.mrf.mxu1  ;;  %v8556_v40 = vadd.f32 %v8555_v3, %v8554_v28  ;;  %v10272_v18 = vld [vmem:[%s13290_s3 + $0x338] sm:$0xff]  }
 0x153   : > { %v11629_v8 = vadd.f32 %v9689_v7, %v8553_v59 }
 0x154   : > { %v11631_v14 = vpop.f32.mrf.mxu0  ;;  %v11640_v34 = vpop.f32.mrf.mxu1 }
 0x155   : > { %v13296_v36 = vrot.slane %v11629_v8, 1 }
 0x156   : > { %v11637_v50 = vpop.f32.mrf.mxu0  ;;  %3492 = vmatmul.mubr.bf16.gmra.mxu0 %v11314_v17  ;;  %v11649_v16 = vpop.f32.mrf.mxu1 }
 0x157   : > { %v1400_v25 = vsel %vm1388_vm0, %v1398_v13, %v13296_v36  ;;  %3499 = vmatprep.mubr.bf16.mxu0 %v11317_v54 }
 0x158   : > { %v11647_v31 = vadd.f32 %v1400_v25, %v11451_v51  ;;  %v1341_v0 = vpop.f32.mrf.mxu0  ;;  %v11653_v48 = vpop.f32.mrf.mxu1  ;;  %3589 = vmatmul.mubr.bf16.gmra.mxu1 %v11397_v19 }
 0x159   : > { %v1342_v17 = vadd.f32 %v8556_v40, %v1341_v0  ;;  %3596 = vmatprep.mubr.bf16.mxu1 %v11403_v57  ;;  %v10471_v40 = vld [vmem:[#allocation2 + $0x8] sm:$0xff]  }
 0x15a   : > { %v11651_v55 = vpop.f32.mrf.mxu0  ;;  %v11657_v3 = vpop.f32.mrf.mxu1 }
 0x15b   : > { %v1401_v59 = vrot.slane %v1342_v17, 1 }
 0x15c   : > { %v1344_v28 = vpop.f32.mrf.mxu0  ;;  %v11662_v39 = vpop.f32.mrf.mxu1 }
 0x15d   : > { %v11659_v54 = vadd.f32 %v8559_v49, %v1344_v28 }
 0x15e   : > { %v9696_v51 = vpop.f32.mrf.mxu0  ;;  %3500 = vmatmul.mubr.bf16.gmra.mxu0 %v11338_v60  ;;  %v11668_v19 = vpop.f32.mrf.mxu1 }
 0x15f   : > { %v13295_v15 = vrot.slane %v11659_v54, 1  ;;  %9778 = vmatprep.mubr.bf16.mxu0 %v11341_v24  ;;  %v10273_v24 = vld [vmem:[%s13290_s3 + $0x370] sm:$0xff]  }
 0x160   : > { %v11666_v5 = vpop.f32.mrf.mxu0  ;;  %v8572_v7 = vpop.f32.mrf.mxu1  ;;  %3597 = vmatmul.mubr.bf16.gmra.mxu1 %v11423_v44  ;;  %v10275_v44 = vld [vmem:[%s13290_s3 + $0x368] sm:$0xff]  }
 0x161   : > { %v1403_v57 = vsel %vm1388_vm0, %v1401_v59, %v13295_v15  ;;  %4111 = vmatprep.mubr.bf16.mxu1 %v10471_v40 }
 0x162   : > { %v11677_v60 = vadd.f32 %v1403_v57, %v11482_v26  ;;  %v9697_v27 = vpop.f32.mrf.mxu0  ;;  %v8573_v25 = vpop.f32.mrf.mxu1  ;;  %v10274_v26 = vld [vmem:[%s13290_s3 + $0x330] sm:$0xff]   ;;  %v8541_v57 = vadd.f32 %v11541_v38, %v11535_v23  ;;  %v10277_v23 = vld [vmem:[%s13290_s3 + $0x360] sm:$0xff]  }
 0x163   : > { %v8574_v0 = vadd.f32 %v8573_v25, %v8572_v7  ;;  %v10276_v7 = vld [vmem:[%s13290_s3 + $0x328] sm:$0xff]  }
 0x164   : > { %v11685_v13 = vpop.f32.mrf.mxu0  ;;  %v8575_v17 = vpop.f32.mrf.mxu1  ;;  %v11711_v15 = vadd.f32 %v11605_v4, %v8541_v57  ;;  %v10474_v4 = vld [vmem:[#allocation2 + $0x38] sm:$0xff]  }
 0x165   : > { %v1366_v28 = vadd.f32 %v9696_v51, %v8574_v0 }
 0x166   : > { %v8610_v49 = vpop.f32.mrf.mxu0  ;;  %9779 = vmatmul.mubr.bf16.vlgmr.msra.gmra.mxu0 %v11360_v10  ;;  %v8576_v40 = vpop.f32.mrf.mxu1 }
 0x167   : > { %9027 = vmatpush3.bf16.msra.mxu0 %v10272_v18  ;;  %9782 = vmatprep.mubr.bf16.mxu0 %v11366_v35  ;;  %v8577_v10 = vadd.f32 %v8576_v40, %v8575_v17  ;;  %v10290_v35 = vld [vmem:[%s13290_s3 + $0x3b0] sm:$0xff]   ;;  %v8538_v18 = vadd.f32 %v11523_v30, %v11513_v12  ;;  %v10278_v12 = vld [vmem:[%s13290_s3 + $0x320] sm:$0xff]   ;;  %v10291_v30 = vld [vmem:[%s13290_s3 + $0x3a8] sm:$0xff]  }
 0x168   : > { %v8611_v59 = vpop.f32.mrf.mxu0  ;;  %9028 = vmatprep.subr.bf16.mxu0 %v10273_v24  ;;  %v11705_v51 = vpop.f32.mrf.mxu1  ;;  %v10472_v24 = vld [vmem:[#allocation2] sm:$0xff]   ;;  %v10473_v40 = vld [vmem:[#allocation2 + $0x10] sm:$0xff]  }
 0x169   : > { %4112 = vmatmul.mubr.bf16.vlgmr.msra.gmra.mxu1 %v10472_v24  ;;  %v1369_v38 = vadd.f32 %v9697_v27, %v8577_v10  ;;  %v8612_v0 = vadd.f32 %v8611_v59, %v8610_v49  ;;  %v8544_v27 = vadd.f32 %v11559_v32, %v11552_v47  ;;  %v1318_v57 = vadd.f32 %v11593_v41, %v8538_v18  ;;  %v10475_v24 = vld [vmem:[#allocation2 + $0x40] sm:$0xff]   ;;  %v10279_v32 = vld [vmem:[%s13290_s3 + $0x358] sm:$0xff]  }
 0x16a   : > { %v8613_v25 = vpop.f32.mrf.mxu0  ;;  %4119 = vmatprep.mubr.bf16.mxu1 %v10473_v40  ;;  %v1769_v36 = vpop.f32.mrf.mxu1  ;;  %9795 = vmatpush3.bf16.msra.mxu1 %v11599_v53  ;;  %v10280_v18 = vld [vmem:[%s13290_s3 + $0x318] sm:$0xff]  }
 0x16b   : > { %9029 = vmatpush3.bf16.msra.mxu0 %v10274_v26  ;;  %v1410_v26 = vrot.slane %v1366_v28, 1  ;;  %v1411_v49 = vrot.slane %v1369_v38, 1  ;;  %9796 = vmatprep.subr.bf16.mxu1 %v10290_v35  ;;  %v1770_v42 = vadd.f32 %v8612_v0, %v1769_v36  ;;  %v1393_v28 = vrot.slane %v11711_v15, 1  ;;  %v11748_v0 = vld [vmem:[%s13291_s4] ss:$0 sm:$0xff] }
 0x16c   : > { %v8614_v17 = vpop.f32.mrf.mxu0  ;;  %9030 = vmatprep.subr.bf16.mxu0 %v10275_v44  ;;  %v9717_v10 = vpop.f32.mrf.mxu1  ;;  %v11740_v36 = vadd.f32 %v8544_v27, %v11618_v1  ;;  %v1392_v15 = vrot.slane %v1318_v57, 1  ;;  %v13301_v1 = vrot.slane %v11613_v6, 1 }
 0x16d   : > { %v8615_v44 = vadd.f32 %v8614_v17, %v8613_v25  ;;  %v1412_v53 = vsel %vm1388_vm0, %v1410_v26, %v1411_v49  ;;  %v11725_v40 = vadd.f32 %v1411_v49, %v11602_v63  ;;  %v8547_v63 = vadd.f32 %v11577_v43, %v11571_v61  ;;  %v10476_v61 = vld [vmem:[#allocation2 + $0x8] sm:$0xff]   ;;  %v10281_v43 = vld [vmem:[%s13290_s3 + $0x350] sm:$0xff]  }
 0x16e   : > { %v8616_v59 = vpop.f32.mrf.mxu0  ;;  %9783 = vmatmul.mubr.bf16.gmra.mxu0 %v10474_v4  ;;  %v11732_v41 = vadd.f32 %v1412_v53, %v11587_v56  ;;  %9797 = vmatpush3.bf16.msra.mxu1 %v10290_v35  ;;  %v10294_v56 = vld [vmem:[%s13290_s3 + $0x3a0] sm:$0xff]   ;;  %v1430_v17 = vadd.f32 %v13301_v1, %v11386_v2  ;;  %v1849_v27 = vrot.slane %v1770_v42, 2  ;;  %v1395_v2 = vrot.slane %v11740_v36, 1  ;;  %v10479_v36 = vld [vmem:[#allocation2 + $0x50] sm:$0xff]  }
 0x16f   : > { %9031 = vmatpush3.bf16.msra.mxu0 %v10276_v7  ;;  %9786 = vmatprep.mubr.bf16.mxu0 %v10475_v24  ;;  %v1772_v7 = vpop.f32.mrf.mxu1  ;;  %v10282_v24 = vld [vmem:[%s13290_s3 + $0x310] sm:$0xff]   ;;  %v11765_v6 = vadd.f32 %v8547_v63, %v11631_v14 }
 0x170   : > { %v8617_v47 = vpop.f32.mrf.mxu0  ;;  %9032 = vmatprep.subr.bf16.mxu0 %v10277_v23  ;;  %v1773_v23 = vadd.f32 %v8615_v44, %v1772_v7  ;;  %9798 = vmatprep.subr.bf16.mxu1 %v10291_v30  ;;  %v10477_v44 = vld [vmem:[#allocation2 + $0x18] sm:$0xff]  }
 0x171   : > { %v8618_v25 = vadd.f32 %v8617_v47, %v8616_v59  ;;  %v11750_v35 = vpop.f32.mrf.mxu1  ;;  %4120 = vmatmul.mubr.bf16.gmra.mxu1 %v10476_v61  ;;  %v1394_v59 = vsel %vm1388_vm0, %v1392_v15, %v1393_v28 }
 0x172   : > { %v8619_v38 = vpop.f32.mrf.mxu0  ;;  %v1850_v26 = vrot.slane %v1773_v23, 2  ;;  %4127 = vmatprep.mubr.bf16.mxu1 %v10477_v44  ;;  %9799 = vmatpush3.bf16.msra.mxu1 %v10291_v30  ;;  %v10295_v30 = vld [vmem:[%s13290_s3 + $0x398] sm:$0xff]   ;;  %v1431_v23 = vadd.f32 %v1394_v59, %v11399_v20  ;;  %v10284_v20 = vld [vmem:[%s13290_s3 + $0x308] sm:$0xff]  }
 0x173   : > { %9033 = vmatpush3.bf16.msra.mxu0 %v10278_v12  ;;  %v1778_v4 = vadd.f32 %v11705_v51, %v8618_v25  ;;  %v1785_v12 = vpop.f32.mrf.mxu1  ;;  %v10283_v51 = vld [vmem:[%s13290_s3 + $0x348] sm:$0xff]   ;;  %9800 = vmatprep.subr.bf16.mxu1 %v10294_v56  ;;  %v11776_v25 = vstv %s11683_s19  ;;  %s8433_s19 = sshll.u32 %s10704_s28, 10  ;;  %s13247_s28 = scalar_lea.sflag [#allocation5], %s283_s22 }
 0x174   : > { %v8620_v49 = vpop.f32.mrf.mxu0  ;;  %9034 = vmatprep.subr.bf16.mxu0 %v10279_v32  ;;  %v1851_v42 = vsel %vm1848_vm1, %v1849_v27, %v1850_v26  ;;  %v1890_v53 = vadd.f32 %v1850_v26, %v1430_v17  ;;  %v10478_v32 = vld [vmem:[#allocation2 + $0x48] sm:$0xff]   ;;  %s13240_s16 = scalar_lea.hbm %s13294_s7, %s8433_s19 }
 0x175   : > { %v8621_v57 = vadd.f32 %v8620_v49, %v8619_v38  ;;  %v1889_v7 = vadd.f32 %v1851_v42, %v11624_v58  ;;  %v11778_v14 = vpop.f32.mrf.mxu1  ;;  %v1432_v38 = vadd.f32 %v1393_v28, %v11412_v37  ;;  %v11786_v58 = vld [vmem:[%s13290_s3 + $0x390] sm:$0xff]   ;;  %v1852_v17 = vrot.slane %v1778_v4, 2 }
 0x176   : > { %v8622_v47 = vpop.f32.mrf.mxu0  ;;  %9787 = vmatmul.mubr.bf16.gmra.mxu0 %v10478_v32  ;;  %v1913_v15 = vadd.f32 %v11748_v0, %v1890_v53  ;;  %9801 = vmatpush3.bf16.msra.mxu1 %v10294_v56  ;;  %v11794_v37 = vadd.f32 %v11634_v45, %v11626_v11  ;;  %v1396_v28 = vrot.slane %v11765_v6, 1  ;;  %v10480_v56 = vld [vmem:[#allocation2 + $0x10] sm:$0xff]   ;;  %v10285_v11 = vld [vmem:[%s13290_s3 + $0x340] sm:$0xff]   ;;  %v13302_v45 = vrot.slane %v11629_v8, 1 }
 0x177   : > { %v1781_v63 = vadd.f32 %v9717_v10, %v8621_v57  ;;  %9035 = vmatpush3.bf16.msra.mxu0 %v10280_v18  ;;  %9790 = vmatprep.mubr.bf16.mxu0 %v10479_v36  ;;  %v1912_v1 = vadd.f32 %v11748_v0, %v1889_v7  ;;  %v1788_v18 = vpop.f32.mrf.mxu1 }
 0x178   : > { %v8623_v61 = vpop.f32.mrf.mxu0  ;;  %9036 = vmatprep.subr.bf16.mxu0 %v10281_v43  ;;  %vm1929_vm4 = vcmp.ge.f32.partialorder %v1913_v15, 0.0  ;;  %v1947_v43 = vmul.f32 %v11776_v25, %v1913_v15  ;;  %9802 = vmatprep.subr.bf16.mxu1 %v10295_v30  ;;  %v11808_v57 = vadd.f32 %v13302_v45, %v11469_v52 }
 0x179   : > { %v1853_v10 = vrot.slane %v1781_v63, 2  ;;  %v8624_v27 = vadd.f32 %v8623_v61, %v8622_v47  ;;  %vm1928_vm5 = vcmp.ge.f32.partialorder %v1912_v1, 0.0  ;;  %v1946_v49 = vmul.f32 %v11776_v25, %v1912_v1  ;;  %v11800_v4 = vpop.f32.mrf.mxu1  ;;  %4128 = vmatmul.mubr.bf16.gmra.mxu1 %v10480_v56  ;;  %v10481_v47 = vld [vmem:[#allocation2 + $0x20] sm:$0xff]  }
 0x17a   : > { %v8625_v26 = vpop.f32.mrf.mxu0  ;;  %v1963_v6 = vsel %vm1929_vm4, %v1913_v15, %v1947_v43  ;;  %4135 = vmatprep.mubr.bf16.mxu1 %v10481_v47  ;;  %9803 = vmatpush3.bf16.msra.mxu1 %v10295_v30 }
 0x17b   : > { %v1854_v44 = vsel %vm1848_vm1, %v1852_v17, %v1853_v10  ;;  %v1892_v59 = vadd.f32 %v1853_v10, %v1432_v38  ;;  %9037 = vmatpush3.bf16.msra.mxu0 %v10282_v24  ;;  %v1962_v32 = vsel %vm1928_vm5, %v1912_v1, %v1946_v49  ;;  %v1786_v24 = vadd.f32 %v8624_v27, %v1785_v12  ;;  %v11812_v63 = vpop.f32.mrf.mxu1  ;;  %v10286_v1 = vld [vmem:[%s13290_s3 + $0x300] sm:$0xff]   ;;  %v10483_v17 = vld [vmem:[#allocation2 + $0x18] sm:$0xff]  }
 0x17c   : > { %v1891_v42 = vadd.f32 %v1854_v44, %v1431_v23  ;;  %v8626_v53 = vpop.f32.mrf.mxu0  ;;  %9038 = vmatprep.subr.bf16.mxu0 %v10283_v51  ;;  %v1397_v38 = vsel %vm1388_vm0, %v1395_v2, %v1396_v28  ;;  %v8417_v8 = vpack.c.bf16 %v1962_v32, %v1962_v32  ;;  %v10482_v23 = vld [vmem:[#allocation2 + $0x58] sm:$0xff]   ;;  %9804 = vmatprep.subr.bf16.mxu1 %v11786_v58  ;;  %v10299_v51 = vld [vmem:[%s13290_s3 + $0x388] sm:$0xff]  }
 0x17d   : > { %v1915_v7 = vadd.f32 %v11748_v0, %v1892_v59  ;;  %v8627_v36 = vadd.f32 %v8626_v53, %v8625_v26  ;;  %v1434_v12 = vadd.f32 %v1396_v28, %v11436_v29  ;;  %v11822_v30 = vpop.f32.mrf.mxu1  ;;  %v8418_v10 = vpack.c.bf16 %v1963_v6, %v1963_v6  ;;  %v10288_v29 = vld [vmem:[%s13290_s3 + $0x438] sm:$0xff]  }
 0x17e   : > { %v1914_v52 = vadd.f32 %v11748_v0, %v1891_v42  ;;  %v8628_v15 = vpop.f32.mrf.mxu0  ;;  %9791 = vmatmul.mubr.bf16.gmra.mxu0 %v10482_v23  ;;  %v2054_v27 = vshrl.u32 %v8417_v8, 16  ;;  %v1855_v28 = vrot.slane %v1786_v24, 2  ;;  %9805 = vmatpush3.bf16.msra.mxu1 %v11786_v58  ;;  %v2057_v45 = vshll.u32 %v8417_v8, 16 }
 0x17f   : > { %vm1931_vm6 = vcmp.ge.f32.partialorder %v1915_v7, 0.0  ;;  %v1949_v61 = vmul.f32 %v11776_v25, %v1915_v7  ;;  %v1789_v2 = vadd.f32 %v8627_v36, %v1788_v18  ;;  %9039 = vmatpush3.bf16.msra.mxu0 %v10284_v20  ;;  %4208 = vmatprep.mubr.bf16.mxu0 %v10483_v17  ;;  %v11834_v18 = vld [vmem:[%s13290_s3 + $0x380] sm:$0xff]   ;;  %v1433_v20 = vadd.f32 %v1397_v38, %v11425_v62  ;;  %v11837_v44 = vpop.f32.mrf.mxu1  ;;  %v10484_v36 = vld [vmem:[#allocation2 + $0x18] sm:$0xff]  }
 0x180   : > { %vm1930_vm7 = vcmp.ge.f32.partialorder %v1914_v52, 0.0  ;;  %v1948_v43 = vmul.f32 %v11776_v25, %v1914_v52  ;;  %v8629_v26 = vpop.f32.mrf.mxu0  ;;  %9040 = vmatprep.subr.bf16.mxu0 %v10285_v11  ;;  %v2056_v11 = vrot.slane %v2054_v27, 7  ;;  %9806 = vmatprep.subr.bf16.mxu1 %v10299_v51  ;;  %v11849_v62 = vadd.f32 %v11637_v50, %v11794_v37  ;;  %v10289_v38 = vld [vmem:[%s13290_s3 + $0x3f8] sm:$0xff]   ;;  %v10485_v50 = vld [vmem:[#allocation2 + $0x28] sm:$0xff]   ;;  %v10292_v27 = vld [vmem:[%s13290_s3 + $0x430] sm:$0xff]  }
 0x181   : > { %v1856_v49 = vrot.slane %v1789_v2, 2  ;;  %v8630_v59 = vadd.f32 %v8629_v26, %v8628_v15  ;;  %v1965_v42 = vsel %vm1931_vm6, %v1915_v7, %v1949_v61  ;;  %v11852_v24 = vpop.f32.mrf.mxu1  ;;  %4136 = vmatmul.mubr.bf16.gmra.mxu1 %v10484_v36 }
 0x182   : > { %v1964_v6 = vsel %vm1930_vm7, %v1914_v52, %v1948_v43  ;;  %v8631_v53 = vpop.f32.mrf.mxu0  ;;  %v2059_v8 = vor.u32 %v2057_v45, %v2056_v11  ;;  %v2060_v7 = vrot.slane %v2056_v11, 4  ;;  %v2062_v52 = vshll.u32 %v8418_v10, 16  ;;  %4143 = vmatprep.mubr.bf16.mxu1 %v10485_v50  ;;  %9807 = vmatpush3.bf16.msra.mxu1 %v10299_v51  ;;  %v11879_v11 = vld [vmem:[#allocation2 + $0x10] sm:$0xff]  }
 0x183   : > { %v8419_v47 = vpack.c.bf16 %v1964_v6, %v1964_v6  ;;  %v1857_v58 = vsel %vm1848_vm1, %v1855_v28, %v1856_v49  ;;  %v1894_v32 = vadd.f32 %v1856_v49, %v1434_v12  ;;  %9041 = vmatpush3.bf16.msra.mxu0 %v10286_v1  ;;  %v8420_v37 = vpack.c.bf16 %v1965_v42, %v1965_v42  ;;  %v11859_v17 = vpop.f32.mrf.mxu1 }
 0x184   : > { %v1893_v15 = vadd.f32 %v1857_v58, %v1433_v20  ;;  %v8632_v23 = vpop.f32.mrf.mxu0  ;;  %v1794_v2 = vadd.f32 %v11750_v35, %v8630_v59  ;;  %9106 = vmatprep.subr.bf16.mxu0 %v10288_v29  ;;  %v2064_v1 = vsel %vm11842_vm8, %v2060_v7, %v2062_v52  ;;  %2166 = vst [vmem:[#allocation3 + $0x10] sm:$0xe] %v2059_v8  ;;  %v10293_v35 = vld [vmem:[%s13290_s3 + $0x3f0] sm:$0xff]   ;;  %v10304_v29 = vld [vmem:[%s13290_s3 + $0x4b8] sm:$0xff]   ;;  %vm5054_vm7 = vcmask 1044480  }
 0x185   : > { %v2066_v61 = vshrl.u32 %v8419_v47, 16  ;;  %v1917_v12 = vadd.f32 %v11748_v0, %v1894_v32  ;;  %v2069_v10 = vshll.u32 %v8419_v47, 16  ;;  %v8633_v26 = vadd.f32 %v8632_v23, %v8631_v53  ;;  %9808 = vmatprep.subr.bf16.mxu1 %v11834_v18  ;;  %2167 = vst [vmem:[#allocation3 + $0x14] sm:$0x1] %v2064_v1  ;;  %v11877_v59 = vpop.f32.mrf.mxu1  ;;  %v10296_v53 = vld [vmem:[%s13290_s3 + $0x428] sm:$0xff]   ;;  %v10489_v1 = vld [vmem:[#allocation2 + $0x30] sm:$0xff]  }
 0x186   : > { %v1916_v43 = vadd.f32 %v11748_v0, %v1893_v15  ;;  %v8634_v20 = vpop.f32.mrf.mxu0  ;;  %v8565_v51 = vadd.f32 %v11649_v16, %v11640_v34  ;;  %4209 = vmatmul.mubr.bf16.vlgmr.msra.gmra.mxu0 %v11879_v11  ;;  %v8568_v45 = vadd.f32 %v11657_v3, %v11653_v48  ;;  %v11886_v16 = vld [vmem:[#allocation2 + $0x20] sm:$0xff]   ;;  %v2074_v32 = vshll.u32 %v8420_v37, 16  ;;  %9809 = vmatpush3.bf16.msra.mxu1 %v11834_v18 }
 0x187   : > { %v2068_v28 = vrot.slane %v2066_v61, 7  ;;  %vm1933_vm9 = vcmp.ge.f32.partialorder %v1917_v12, 0.0  ;;  %v1951_v49 = vmul.f32 %v11776_v25, %v1917_v12  ;;  %v1797_v42 = vadd.f32 %v11778_v14, %v8633_v26  ;;  %9107 = vmatpush3.bf16.msra.mxu0 %v10289_v38  ;;  %4216 = vmatprep.mubr.bf16.mxu0 %v11886_v16  ;;  %v11893_v3 = vpop.f32.mrf.mxu1  ;;  %v10488_v61 = vld [vmem:[#allocation2 + $0x20] sm:$0xff]  }
 0x188   : > { %vm1932_vm10 = vcmp.ge.f32.partialorder %v1916_v43, 0.0  ;;  %v1950_v6 = vmul.f32 %v11776_v25, %v1916_v43  ;;  %v8635_v34 = vpop.f32.mrf.mxu0  ;;  %9108 = vmatprep.subr.bf16.mxu0 %v10292_v27  ;;  %v1858_v36 = vrot.slane %v1794_v2, 2  ;;  %9170 = vmatprep.subr.bf16.mxu1 %v10304_v29  ;;  %v11897_v52 = vadd.f32 %v11651_v55, %v8565_v51 }
 0x189   : > { %v2071_v47 = vor.u32 %v2069_v10, %v2068_v28  ;;  %v2072_v58 = vrot.slane %v2068_v28, 4  ;;  %v1967_v48 = vsel %vm1933_vm9, %v1917_v12, %v1951_v49  ;;  %v1859_v38 = vrot.slane %v1797_v42, 2  ;;  %v8690_v37 = vpop.f32.mrf.mxu1  ;;  %4144 = vmatmul.mubr.bf16.gmra.mxu1 %v10488_v61  ;;  %v11927_v42 = vld [vmem:[#allocation2 + $0x18] sm:$0xff]  }
 0x18a   : > { %v1966_v14 = vsel %vm1932_vm10, %v1916_v43, %v1950_v6  ;;  %v8636_v8 = vadd.f32 %v8635_v34, %v8634_v20  ;;  %v8637_v7 = vpop.f32.mrf.mxu0  ;;  %v8571_v15 = vadd.f32 %v11668_v19, %v11662_v39  ;;  %v1404_v18 = vrot.slane %v11849_v62, 1  ;;  %4151 = vmatprep.mubr.bf16.mxu1 %v10489_v1  ;;  %v10297_v39 = vld [vmem:[%s13290_s3 + $0x3e8] sm:$0xff]  }
 0x18b   : > { %v2076_v23 = vsel %vm11842_vm8, %v2072_v58, %v2074_v32  ;;  %2168 = vst [vmem:[#allocation3 + $0x18] sm:$0xe] %v2071_v47  ;;  %v8421_v50 = vpack.c.bf16 %v1966_v14, %v1966_v14  ;;  %v8422_v12 = vpack.c.bf16 %v1967_v48, %v1967_v48  ;;  %v1860_v2 = vsel %vm1848_vm1, %v1858_v36, %v1859_v38  ;;  %v8691_v29 = vpop.f32.mrf.mxu1  ;;  %v11932_v58 = vld [vmem:[#allocation2 + $0x28] sm:$0xff]   ;;  %v10301_v36 = vld [vmem:[%s13290_s3 + $0x3e0] sm:$0xff]  }
 0x18c   : > { %2169 = vst [vmem:[#allocation3 + $0x1c] sm:$0x1] %v2076_v23  ;;  %v1896_v55 = vadd.f32 %v1859_v38, %v11808_v57  ;;  %v8638_v27 = vpop.f32.mrf.mxu0  ;;  %9109 = vmatpush3.bf16.msra.mxu0 %v10293_v35  ;;  %v13305_v19 = vrot.slane %v11659_v54, 1  ;;  %v11913_v43 = vadd.f32 %v8568_v45, %v11666_v5  ;;  %v1895_v20 = vadd.f32 %v1860_v2, %v11647_v31  ;;  %v10300_v57 = vld [vmem:[%s13290_s3 + $0x420] sm:$0xff]  }
 0x18d   : > { %v2078_v26 = vshrl.u32 %v8421_v50, 16  ;;  %9110 = vmatprep.subr.bf16.mxu0 %v10296_v53  ;;  %v1802_v51 = vadd.f32 %v8636_v8, %v11812_v63  ;;  %v11921_v28 = vadd.f32 %v8691_v29, %v8690_v37  ;;  %v8639_v54 = vadd.f32 %v8638_v27, %v8637_v7  ;;  %v8693_v6 = vpop.f32.mrf.mxu1 }
 0x18e   : > { %v1438_v10 = vadd.f32 %v13305_v19, %v11502_v9  ;;  %v1919_v35 = vadd.f32 %v11748_v0, %v1896_v55  ;;  %v8640_v9 = vpop.f32.mrf.mxu0  ;;  %v11924_v5 = vadd.f32 %v8571_v15, %v11685_v13  ;;  %v2081_v45 = vshll.u32 %v8421_v50, 16  ;;  %4217 = vmatmul.mubr.bf16.gmra.mxu0 %v11927_v42  ;;  %v11946_v55 = vld [vmem:[#allocation2 + $0x28] sm:$0xff]  }
 0x18f   : > { %v2080_v49 = vrot.slane %v2078_v26, 7  ;;  %v1918_v31 = vadd.f32 %v11748_v0, %v1895_v20  ;;  %v2086_v34 = vshll.u32 %v8422_v12, 16  ;;  %v1805_v53 = vadd.f32 %v8639_v54, %v11837_v44  ;;  %4224 = vmatprep.mubr.bf16.mxu0 %v11932_v58  ;;  %v8694_v14 = vpop.f32.mrf.mxu1  ;;  %v10303_v44 = vld [vmem:[%s13290_s3 + $0x418] sm:$0xff]  }
 0x190   : > { %vm1935_vm11 = vcmp.ge.f32.partialorder %v1919_v35, 0.0  ;;  %v1953_v63 = vmul.f32 %v11776_v25, %v1919_v35  ;;  %v8641_v47 = vpop.f32.mrf.mxu0  ;;  %9111 = vmatpush3.bf16.msra.mxu0 %v10297_v39  ;;  %v1861_v8 = vrot.slane %v1802_v51, 2  ;;  %v1405_v50 = vrot.slane %v11897_v52, 1  ;;  %v11951_v26 = vld [vmem:[#allocation2 + $0x38] sm:$0xff]  }
 0x191   : > { %v2083_v13 = vor.u32 %v2081_v45, %v2080_v49  ;;  %v2084_v32 = vrot.slane %v2080_v49, 4  ;;  %vm1934_vm12 = vcmp.ge.f32.partialorder %v1918_v31, 0.0  ;;  %v1952_v48 = vmul.f32 %v11776_v25, %v1918_v31  ;;  %9112 = vmatprep.subr.bf16.mxu0 %v10300_v57  ;;  %v8696_v2 = vpop.f32.mrf.mxu1  ;;  %4152 = vmatmul.mubr.bf16.gmra.mxu1 %v11946_v55  ;;  %v10305_v54 = vld [vmem:[%s13290_s3 + $0x3d8] sm:$0xff]  }
 0x192   : > { %v1969_v38 = vsel %vm1935_vm11, %v1919_v35, %v1953_v63  ;;  %v1862_v7 = vrot.slane %v1805_v53, 2  ;;  %v8642_v15 = vadd.f32 %v8641_v47, %v8640_v9  ;;  %v8643_v23 = vpop.f32.mrf.mxu0  ;;  %v1407_v37 = vrot.slane %v11913_v43, 1  ;;  %4159 = vmatprep.mubr.bf16.mxu1 %v11951_v26  ;;  %v11970_v53 = vld [vmem:[#allocation2 + $0x20] sm:$0xff]  }
 0x193   : > { %v2088_v61 = vsel %vm11842_vm8, %v2084_v32, %v2086_v34  ;;  %2170 = vst [vmem:[#allocation3 + $0x20] sm:$0xe] %v2083_v13  ;;  %v1968_v12 = vsel %vm1934_vm12, %v1918_v31, %v1952_v48  ;;  %v1408_v20 = vrot.slane %v11924_v5, 1  ;;  %v8424_v29 = vpack.c.bf16 %v1969_v38, %v1969_v38  ;;  %v8697_v35 = vpop.f32.mrf.mxu1  ;;  %v10309_v5 = vld [vmem:[%s13290_s3 + $0x410] sm:$0xff]  }
 0x194   : > { %2171 = vst [vmem:[#allocation3 + $0x24] sm:$0x1] %v2088_v61  ;;  %v8423_v27 = vpack.c.bf16 %v1968_v12, %v1968_v12  ;;  %v1863_v1 = vsel %vm1848_vm1, %v1861_v8, %v1862_v7  ;;  %v1898_v39 = vadd.f32 %v1862_v7, %v1438_v10  ;;  %v1810_v19 = vadd.f32 %v11800_v4, %v8642_v15  ;;  %v8644_v52 = vpop.f32.mrf.mxu0  ;;  %v11975_v48 = vld [vmem:[#allocation2 + $0x30] sm:$0xff]  }
 0x195   : > { %v1897_v57 = vadd.f32 %v1863_v1, %v11677_v60  ;;  %v8645_v51 = vadd.f32 %v8644_v52, %v8643_v23  ;;  %9113 = vmatpush3.bf16.msra.mxu0 %v10301_v36  ;;  %v1406_v60 = vsel %vm1388_vm0, %v1404_v18, %v1405_v50  ;;  %v11967_v6 = vadd.f32 %v8697_v35, %v8696_v2  ;;  %v8699_v34 = vpop.f32.mrf.mxu1  ;;  %v11988_v1 = vld [vmem:[#allocation2 + $0x30] sm:$0xff]  }
 0x196   : > { %v2090_v10 = vshrl.u32 %v8423_v27, 16  ;;  %v2093_v9 = vshll.u32 %v8423_v27, 16  ;;  %v1921_v4 = vadd.f32 %v11748_v0, %v1898_v39  ;;  %v1864_v49 = vrot.slane %v1810_v19, 2  ;;  %v8646_v45 = vpop.f32.mrf.mxu0  ;;  %9114 = vmatprep.subr.bf16.mxu0 %v10303_v44  ;;  %4225 = vmatmul.mubr.bf16.gmra.mxu0 %v11970_v53  ;;  %v10315_v44 = vld [vmem:[%s13290_s3 + $0x408] sm:$0xff]  }
 0x197   : > { %v1920_v31 = vadd.f32 %v11748_v0, %v1897_v57  ;;  %v1813_v63 = vadd.f32 %v11822_v30, %v8645_v51  ;;  %v1440_v47 = vadd.f32 %v1405_v50, %v11538_v21  ;;  %4232 = vmatprep.mubr.bf16.mxu0 %v11975_v48  ;;  %v8700_v30 = vpop.f32.mrf.mxu1  ;;  %v10311_v21 = vld [vmem:[%s13290_s3 + $0x3d0] sm:$0xff]   ;;  %v1439_v38 = vadd.f32 %v1406_v60, %v11517_v46  ;;  %v11996_v57 = vld [vmem:[#allocation2 + $0x40] sm:$0xff]   ;;  %v12013_v34 = vld [vmem:[#allocation2 + $0x28] sm:$0xff]  }
 0x198   : > { %v2092_v13 = vrot.slane %v2090_v10, 7  ;;  %vm1937_vm13 = vcmp.ge.f32.partialorder %v1921_v4, 0.0  ;;  %v1955_v32 = vmul.f32 %v11776_v25, %v1921_v4  ;;  %v8647_v62 = vpop.f32.mrf.mxu0  ;;  %v2098_v15 = vshll.u32 %v8424_v29, 16  ;;  %v10317_v10 = vld [vmem:[%s13290_s3 + $0x3c8] sm:$0xff]  }
 0x199   : > { %vm1936_vm14 = vcmp.ge.f32.partialorder %v1920_v31, 0.0  ;;  %v1954_v18 = vmul.f32 %v11776_v25, %v1920_v31  ;;  %v1865_v14 = vrot.slane %v1813_v63, 2  ;;  %v8648_v36 = vadd.f32 %v8647_v62, %v8646_v45  ;;  %9115 = vmatpush3.bf16.msra.mxu0 %v10305_v54  ;;  %v8702_v27 = vpop.f32.mrf.mxu1  ;;  %4160 = vmatmul.mubr.bf16.gmra.mxu1 %v11988_v1  ;;  %v10323_v63 = vld [vmem:[%s13290_s3 + $0x3c0] sm:$0xff]  }
 0x19a   : > { %v2095_v8 = vor.u32 %v2093_v9, %v2092_v13  ;;  %v2096_v7 = vrot.slane %v2092_v13, 4  ;;  %v8649_v23 = vpop.f32.mrf.mxu0  ;;  %9116 = vmatprep.subr.bf16.mxu0 %v10309_v5  ;;  %v1971_v61 = vsel %vm1937_vm13, %v1921_v4, %v1955_v32  ;;  %v1409_v46 = vsel %vm1388_vm0, %v1407_v37, %v1408_v20  ;;  %4167 = vmatprep.mubr.bf16.mxu1 %v11996_v57 }
 0x19b   : > { %v1970_v50 = vsel %vm1936_vm14, %v1920_v31, %v1954_v18  ;;  %v1866_v12 = vsel %vm1848_vm1, %v1864_v49, %v1865_v14  ;;  %v1900_v2 = vadd.f32 %v1865_v14, %v1440_v47  ;;  %v1442_v35 = vadd.f32 %v1408_v20, %v11574_v22  ;;  %v8703_v54 = vpop.f32.mrf.mxu1  ;;  %v10321_v22 = vld [vmem:[%s13290_s3 + $0x400] sm:$0xff]   ;;  %v12021_v18 = vld [vmem:[#allocation2 + $0x38] sm:$0xff]  }
 0x19c   : > { %v2100_v39 = vsel %vm11842_vm8, %v2096_v7, %v2098_v15  ;;  %2172 = vst [vmem:[#allocation3 + $0x28] sm:$0xe] %v2095_v8  ;;  %v8425_v19 = vpack.c.bf16 %v1970_v50, %v1970_v50  ;;  %v1899_v52 = vadd.f32 %v1866_v12, %v1439_v38  ;;  %v8650_v29 = vpop.f32.mrf.mxu0  ;;  %v1818_v43 = vadd.f32 %v8648_v36, %v11859_v17 }
 0x19d   : > { %2173 = vst [vmem:[#allocation3 + $0x2c] sm:$0x1] %v2100_v39  ;;  %v1923_v51 = vadd.f32 %v11748_v0, %v1900_v2  ;;  %v8651_v37 = vadd.f32 %v8650_v29, %v8649_v23  ;;  %9117 = vmatpush3.bf16.msra.mxu0 %v10311_v21  ;;  %v8426_v9 = vpack.c.bf16 %v1971_v61, %v1971_v61  ;;  %v8705_v60 = vpop.f32.mrf.mxu1  ;;  %v12031_v2 = vld [vmem:[#allocation2 + $0x38] sm:$0xff]  }
 0x19e   : > { %v2102_v4 = vshrl.u32 %v8425_v19, 16  ;;  %v2105_v49 = vshll.u32 %v8425_v19, 16  ;;  %v1922_v45 = vadd.f32 %v11748_v0, %v1899_v52  ;;  %v8652_v5 = vpop.f32.mrf.mxu0  ;;  %9118 = vmatprep.subr.bf16.mxu0 %v10315_v44  ;;  %v12010_v20 = vadd.f32 %v8703_v54, %v8702_v27  ;;  %4233 = vmatmul.mubr.bf16.gmra.mxu0 %v12013_v34  ;;  %v12036_v52 = vld [vmem:[#allocation2 + $0x20] sm:$0xff]  }
 0x19f   : > { %vm1939_vm15 = vcmp.ge.f32.partialorder %v1923_v51, 0.0  ;;  %v1957_v17 = vmul.f32 %v11776_v25, %v1923_v51  ;;  %v1821_v31 = vadd.f32 %v8651_v37, %v11893_v3  ;;  %v1441_v47 = vadd.f32 %v1409_v46, %v11556_v33  ;;  %4240 = vmatprep.mubr.bf16.mxu0 %v12021_v18  ;;  %v12027_v3 = vld [vmem:[%s13290_s3 + $0x4f8] sm:$0xff]   ;;  %v8706_v21 = vpop.f32.mrf.mxu1 }
 0x1a0   : > { %v2104_v13 = vrot.slane %v2102_v4, 7  ;;  %vm1938_vm2 = vcmp.ge.f32.partialorder %v1922_v45, 0.0  ;;  %v1956_v32 = vmul.f32 %v11776_v25, %v1922_v45  ;;  %v8653_v62 = vpop.f32.mrf.mxu0  ;;  %v1867_v30 = vrot.slane %v1818_v43, 2 }
 0x1a1   : > { %v1973_v14 = vsel %vm1939_vm15, %v1923_v51, %v1957_v17  ;;  %v1868_v36 = vrot.slane %v1821_v31, 2  ;;  %v8654_v33 = vadd.f32 %v8653_v62, %v8652_v5  ;;  %9119 = vmatpush3.bf16.msra.mxu0 %v10317_v10  ;;  %v2110_v8 = vshll.u32 %v8426_v9, 16  ;;  %v8708_v12 = vpop.f32.mrf.mxu1  ;;  %4168 = vmatmul.mubr.bf16.gmra.mxu1 %v12031_v2 }
 0x1a2   : > { %v2107_v44 = vor.u32 %v2105_v49, %v2104_v13  ;;  %v2108_v38 = vrot.slane %v2104_v13, 4  ;;  %v1972_v7 = vsel %vm1938_vm2, %v1922_v45, %v1956_v32  ;;  %v8655_v15 = vpop.f32.mrf.mxu0  ;;  %9120 = vmatprep.subr.bf16.mxu0 %v10321_v22  ;;  %v8428_v46 = vpack.c.bf16 %v1973_v14, %v1973_v14  ;;  %9810 = vmatprep.mubr.bf16.mxu1 %v12036_v52  ;;  %v10306_v49 = vld [vmem:[%s13290_s3 + $0x478] sm:$0xff]   ;;  %v12049_v22 = vld [vmem:[#allocation2 + $0x30] sm:$0xff]  }
 0x1a3   : > { %v8427_v23 = vpack.c.bf16 %v1972_v7, %v1972_v7  ;;  %v1869_v50 = vsel %vm1848_vm1, %v1867_v30, %v1868_v36  ;;  %v1902_v61 = vadd.f32 %v1868_v36, %v1442_v35  ;;  %v1826_v51 = vadd.f32 %v11852_v24, %v8654_v33  ;;  %v8709_v43 = vpop.f32.mrf.mxu1  ;;  %v10307_v36 = vld [vmem:[%s13290_s3 + $0x4b0] sm:$0xff]  }
 0x1a4   : > { %v2112_v27 = vsel %vm11842_vm8, %v2108_v38, %v2110_v8  ;;  %2174 = vst [vmem:[#allocation3 + $0x30] sm:$0xe] %v2107_v44  ;;  %v1901_v39 = vadd.f32 %v1869_v50, %v1441_v47  ;;  %v8656_v19 = vpop.f32.mrf.mxu0  ;;  %v12042_v10 = vadd.f32 %v8709_v43, %v8708_v12  ;;  %v2122_v17 = vshll.u32 %v8428_v46, 16  ;;  %v12054_v47 = vld [vmem:[#allocation2 + $0x40] sm:$0xff]  }
 0x1a5   : > { %2175 = vst [vmem:[#allocation3 + $0x34] sm:$0x1] %v2112_v27  ;;  %v2114_v29 = vshrl.u32 %v8427_v23, 16  ;;  %v1925_v35 = vadd.f32 %v11748_v0, %v1902_v61  ;;  %9121 = vmatpush3.bf16.msra.mxu0 %v10323_v63  ;;  %v2117_v54 = vshll.u32 %v8427_v23, 16  ;;  %v8657_v9 = vadd.f32 %v8656_v19, %v8655_v15  ;;  %v8711_v24 = vpop.f32.mrf.mxu1  ;;  %v12062_v15 = vld [vmem:[#allocation2 + $0x28] sm:$0xff]   ;;  %v10308_v27 = vld [vmem:[%s13290_s3 + $0x470] sm:$0xff]  }
 0x1a6   : > { %v1924_v37 = vadd.f32 %v11748_v0, %v1901_v39  ;;  %v8754_v4 = vpop.f32.mrf.mxu0  ;;  %9826 = vmatprep.subr.bf16.mxu0 %v12027_v3  ;;  %4241 = vmatmul.mubr.bf16.gmra.mxu0 %v12049_v22  ;;  %v1870_v33 = vrot.slane %v1826_v51, 2  ;;  %v12073_v39 = vld [vmem:[#allocation2 + $0x30] sm:$0xff]  }
 0x1a7   : > { %v2116_v45 = vrot.slane %v2114_v29, 7  ;;  %vm1941_vm3 = vcmp.ge.f32.partialorder %v1925_v35, 0.0  ;;  %v1959_v5 = vmul.f32 %v11776_v25, %v1925_v35  ;;  %v1829_v31 = vadd.f32 %v11877_v59, %v8657_v9  ;;  %4248 = vmatprep.mubr.bf16.mxu0 %v12054_v47  ;;  %v8712_v14 = vpop.f32.mrf.mxu1 }
 0x1a8   : > { %vm1940_vm4 = vcmp.ge.f32.partialorder %v1924_v37, 0.0  ;;  %v1958_v60 = vmul.f32 %v11776_v25, %v1924_v37  ;;  %v8755_v63 = vpop.f32.mrf.mxu0 }
 0x1a9   : > { %v2119_v13 = vor.u32 %v2117_v54, %v2116_v45  ;;  %v2120_v32 = vrot.slane %v2116_v45, 4  ;;  %v1975_v62 = vsel %vm1941_vm3, %v1925_v35, %v1959_v5  ;;  %v8756_v30 = vadd.f32 %v8755_v63, %v8754_v4  ;;  %v8714_v7 = vpop.f32.mrf.mxu1  ;;  %9811 = vmatmul.mubr.bf16.vlgmr.msra.gmra.mxu1 %v12062_v15  ;;  %v10310_v35 = vld [vmem:[%s13290_s3 + $0x4a8] sm:$0xff]   ;;  %v12089_v45 = vld [vmem:[#allocation2 + $0x38] sm:$0xff]  }
 0x1aa   : > { %v1974_v21 = vsel %vm1940_vm4, %v1924_v37, %v1958_v60  ;;  %v1871_v44 = vrot.slane %v1829_v31, 2  ;;  %v8757_v38 = vpop.f32.mrf.mxu0  ;;  %v8430_v50 = vpack.c.bf16 %v1975_v62, %v1975_v62  ;;  %9171 = vmatpush3.bf16.msra.mxu1 %v10306_v49  ;;  %9814 = vmatprep.mubr.bf16.mxu1 %v12073_v39  ;;  %v10312_v54 = vld [vmem:[%s13290_s3 + $0x468] sm:$0xff]  }
 0x1ab   : > { %v2124_v59 = vsel %vm11842_vm8, %v2120_v32, %v2122_v17  ;;  %2176 = vst [vmem:[#allocation3 + $0x38] sm:$0xe] %v2119_v13  ;;  %v8429_v8 = vpack.c.bf16 %v1974_v21, %v1974_v21  ;;  %v12066_v23 = vadd.f32 %v8756_v30, %v11921_v28  ;;  %v8715_v29 = vpop.f32.mrf.mxu1  ;;  %9172 = vmatprep.subr.bf16.mxu1 %v10307_v36  ;;  %v12093_v17 = vld [vmem:[#allocation2 + $0x48] sm:$0xff]   ;;  %v10313_v32 = vld [vmem:[%s13290_s3 + $0x4a0] sm:$0xff]  }
 0x1ac   : > { %2177 = vst [vmem:[#allocation3 + $0x3c] sm:$0x1] %v2124_v59  ;;  %v1872_v61 = vsel %vm1848_vm1, %v1870_v33, %v1871_v44  ;;  %v1904_v12 = vadd.f32 %v1871_v44, %v11725_v40  ;;  %v8758_v46 = vpop.f32.mrf.mxu0  ;;  %v12081_v51 = vadd.f32 %v8715_v29, %v8714_v7  ;;  %v12103_v44 = vld [vmem:[#allocation2 + $0x38] sm:$0xff]   ;;  %v10314_v38 = vld [vmem:[%s13290_s3 + $0x460] sm:$0xff]  }
 0x1ad   : > { %v2126_v19 = vshrl.u32 %v8429_v8, 16  ;;  %v1903_v28 = vadd.f32 %v1872_v61, %v11732_v41  ;;  %v2129_v9 = vshll.u32 %v8429_v8, 16  ;;  %v10506_v41 = vld [vmem:[%s13291_s4] ss:$0 sm:$0xff]  ;;  %v8717_v49 = vpop.f32.mrf.mxu1  ;;  %v10316_v61 = vld [vmem:[%s13290_s3 + $0x498] sm:$0xff]  }
 0x1ae   : > { %v1927_v40 = vadd.f32 %v11748_v0, %v1904_v12  ;;  %v8760_v43 = vpop.f32.mrf.mxu0  ;;  %4249 = vmatmul.mubr.bf16.gmra.mxu0 %v12089_v45  ;;  %v2134_v0 = vshll.u32 %v8430_v50, 16  ;;  %9173 = vmatpush3.bf16.msra.mxu1 %v10308_v27  ;;  %v12109_v8 = vld [vmem:[#allocation2 + $0x40] sm:$0xff]  }
 0x1af   : > { %v2128_v37 = vrot.slane %v2126_v19, 7  ;;  %v1926_v4 = vadd.f32 %v10506_v41, %v1903_v28  ;;  %4256 = vmatprep.mubr.bf16.mxu0 %v12093_v17  ;;  %v8718_v13 = vpop.f32.mrf.mxu1  ;;  %9174 = vmatprep.subr.bf16.mxu1 %v10310_v35  ;;  %v10318_v28 = vld [vmem:[%s13290_s3 + $0x458] sm:$0xff]   ;;  %v12123_v35 = vld [vmem:[#allocation2 + $0x40] sm:$0xff]   ;;  %v10319_v41 = vld [vmem:[%s13290_s3 + $0x490] sm:$0xff]  }
 0x1b0   : > { %vm1943_vm5 = vcmp.ge.f32.partialorder %v1927_v40, 0.0  ;;  %v1961_v5 = vmul.f32 %v11776_v25, %v1927_v40  ;;  %v8761_v24 = vpop.f32.mrf.mxu0  ;;  %v10320_v13 = vld [vmem:[%s13290_s3 + $0x450] sm:$0xff]  }
 0x1b1   : > { %v2131_v60 = vor.u32 %v2129_v9, %v2128_v37  ;;  %v2132_v31 = vrot.slane %v2128_v37, 4  ;;  %vm1942_vm6 = vcmp.ge.f32.partialorder %v1926_v4, 0.0  ;;  %v1960_v63 = vmul.f32 %v11776_v25, %v1926_v4  ;;  %v8720_v33 = vpop.f32.mrf.mxu1  ;;  %9815 = vmatmul.mubr.bf16.gmra.mxu1 %v12103_v44 }
 0x1b2   : > { %v8762_v62 = vadd.f32 %v8761_v24, %v8760_v43  ;;  %v8763_v14 = vpop.f32.mrf.mxu0  ;;  %v1977_v21 = vsel %vm1943_vm5, %v1927_v40, %v1961_v5  ;;  %9175 = vmatpush3.bf16.msra.mxu1 %v10312_v54  ;;  %9818 = vmatprep.mubr.bf16.mxu1 %v12109_v8  ;;  %v12126_v54 = vld [vmem:[#allocation2 + $0x50] sm:$0xff]  }
 0x1b3   : > { %v2136_v30 = vsel %vm11842_vm8, %v2132_v31, %v2134_v0  ;;  %2178 = vst [vmem:[#allocation3 + $0x40] sm:$0xe] %v2131_v60  ;;  %v1976_v36 = vsel %vm1942_vm6, %v1926_v4, %v1960_v63  ;;  %v8721_v50 = vpop.f32.mrf.mxu1  ;;  %9176 = vmatprep.subr.bf16.mxu1 %v10313_v32  ;;  %v8432_v12 = vpack.c.bf16 %v1977_v21, %v1977_v21  ;;  %v12132_v60 = vld [vmem:[#allocation2 + $0x48] sm:$0xff]  }
 0x1b4   : > { %2179 = vst [vmem:[#allocation3 + $0x44] sm:$0x1] %v2136_v30  ;;  %v8431_v25 = vpack.c.bf16 %v1976_v36, %v1976_v36  ;;  %v8764_v59 = vpop.f32.mrf.mxu0  ;;  %v12113_v7 = vadd.f32 %v8762_v62, %v11967_v6  ;;  %v12118_v46 = vadd.f32 %v8721_v50, %v8720_v33  ;;  %v12143_v62 = vld [vmem:[#allocation2 + $0x50] sm:$0xff]   ;;  %v10324_v36 = vld [vmem:[%s13290_s3 + $0x448] sm:$0xff]  }
 0x1b5   : > { %v8723_v29 = vpop.f32.mrf.mxu1  ;;  %v2146_v0 = vshll.u32 %v8432_v12, 16  ;;  %v12154_v33 = vld [vmem:[#allocation2 + $0x48] sm:$0xff]  }
 0x1b6   : > { %v2138_v27 = vshrl.u32 %v8431_v25, 16  ;;  %v8766_v19 = vpop.f32.mrf.mxu0  ;;  %4257 = vmatmul.mubr.bf16.gmra.mxu0 %v12123_v35  ;;  %v2141_v40 = vshll.u32 %v8431_v25, 16  ;;  %9177 = vmatpush3.bf16.msra.mxu1 %v10314_v38  ;;  %v12157_v38 = vld [vmem:[#allocation2 + $0x8] sm:$0xff]   ;;  %v10326_v29 = vld [vmem:[%s13290_s3 + $0x440] sm:$0xff]  }
 0x1b7   : > { %4264 = vmatprep.mubr.bf16.mxu0 %v12126_v54  ;;  %v8724_v37 = vpop.f32.mrf.mxu1  ;;  %9178 = vmatprep.subr.bf16.mxu1 %v10316_v61  ;;  %v10325_v61 = vld [vmem:[%s13290_s3 + $0x480] sm:$0xff]  }
 0x1b8   : > { %v2140_v6 = vrot.slane %v2138_v27, 7  ;;  %v8767_v43 = vpop.f32.mrf.mxu0  ;;  %v10328_v37 = vld [vmem:[%s13290_s3 + $0x4f0] sm:$0xff]  }
 0x1b9   : > { %v8768_v9 = vadd.f32 %v8767_v43, %v8766_v19  ;;  %v8726_v24 = vpop.f32.mrf.mxu1  ;;  %9819 = vmatmul.mubr.bf16.gmra.mxu1 %v12132_v60  ;;  %v12163_v19 = vld [vmem:[#allocation2 + $0x58] sm:$0xff]  }
 0x1ba   : > { %v2143_v4 = vor.u32 %v2141_v40, %v2140_v6  ;;  %v2144_v49 = vrot.slane %v2140_v6, 4  ;;  %v8769_v5 = vpop.f32.mrf.mxu0  ;;  %9179 = vmatpush3.bf16.msra.mxu1 %v10318_v28  ;;  %9822 = vmatprep.mubr.bf16.mxu1 %v12143_v62  ;;  %v12172_v40 = vld [vmem:[#allocation2 + $0x18] sm:$0xff]  }
 0x1bb   : > { %v12136_v31 = vadd.f32 %v8768_v9, %v12010_v20  ;;  %v8727_v14 = vpop.f32.mrf.mxu1  ;;  %9180 = vmatprep.subr.bf16.mxu1 %v10319_v41  ;;  %v10322_v20 = vld [vmem:[%s13290_s3 + $0x488] sm:$0xff]  }
 0x1bc   : > { %v2148_v63 = vsel %vm11842_vm8, %v2144_v49, %v2146_v0  ;;  %2180 = vst [vmem:[#allocation3 + $0x48] sm:$0xe] %v2143_v4  ;;  %v8770_v32 = vpop.f32.mrf.mxu0  ;;  %v12149_v56 = vadd.f32 %v8727_v14, %v8726_v24  ;;  %v12183_v49 = vld [vmem:[#allocation2] sm:$0xff]   ;;  %v10329_v0 = vld [vmem:[%s13290_s3 + $0x4e8] sm:$0xff]   ;;  %vm5723_vm8 = vcmask 1043456  }
 0x1bd   : > { %2181 = vst [vmem:[#allocation3 + $0x4c] sm:$0x1] %v2148_v63  ;;  %v8729_v21 = vpop.f32.mrf.mxu1  ;;  %v10333_v32 = vld [vmem:[%s13290_s3 + $0x538] sm:$0xff]  }
 0x1be   : > { %v8772_v30 = vpop.f32.mrf.mxu0  ;;  %4265 = vmatmul.mubr.bf16.gmra.mxu0 %v12154_v33  ;;  %9181 = vmatpush3.bf16.msra.mxu1 %v10320_v13  ;;  %v12190_v13 = vld [vmem:[#allocation2 + $0x10] sm:$0xff]  }
 0x1bf   : > { %4779 = vmatprep.mubr.bf16.mxu0 %v12157_v38  ;;  %v8730_v59 = vpop.f32.mrf.mxu1  ;;  %9182 = vmatprep.subr.bf16.mxu1 %v10322_v20  ;;  %v10334_v20 = vld [vmem:[%s13290_s3 + $0x570] sm:$0xff]  }
 0x1c0   : > { %v8773_v25 = vpop.f32.mrf.mxu0  ;;  %v10330_v59 = vld [vmem:[%s13290_s3 + $0x4e0] sm:$0xff]  }
 0x1c1   : > { %v8774_v50 = vadd.f32 %v8773_v25, %v8772_v30  ;;  %v8732_v27 = vpop.f32.mrf.mxu1  ;;  %9823 = vmatmul.mubr.bf16.gmra.mxu1 %v12163_v19 }
 0x1c2   : > { %v8775_v12 = vpop.f32.mrf.mxu0  ;;  %9183 = vmatpush3.bf16.msra.mxu1 %v10324_v36  ;;  %4876 = vmatprep.mubr.bf16.mxu1 %v12172_v40 }
 0x1c3   : > { %v12167_v28 = vadd.f32 %v8774_v50, %v12042_v10  ;;  %v8733_v43 = vpop.f32.mrf.mxu1  ;;  %9184 = vmatprep.subr.bf16.mxu1 %v10325_v61  ;;  %v10332_v10 = vld [vmem:[%s13290_s3 + $0x578] sm:$0xff]   ;;  %v12219_v61 = vld [vmem:[#allocation2 + $0x8] sm:$0xff]  }
 0x1c4   : > { %v8776_v6 = vpop.f32.mrf.mxu0  ;;  %v12181_v9 = vadd.f32 %v8733_v43, %v8732_v27  ;;  %v12222_v27 = vld [vmem:[#allocation2 + $0x18] sm:$0xff]   ;;  %v10338_v43 = vld [vmem:[%s13290_s3 + $0x528] sm:$0xff]  }
 0x1c5   : > { %v8735_v4 = vpop.f32.mrf.mxu1  ;;  %v10331_v6 = vld [vmem:[%s13290_s3 + $0x4d8] sm:$0xff]  }
 0x1c6   : > { %v8778_v41 = vpop.f32.mrf.mxu0  ;;  %4780 = vmatmul.mubr.bf16.vlgmr.msra.gmra.mxu0 %v12183_v49  ;;  %9185 = vmatpush3.bf16.msra.mxu1 %v10326_v29 }
 0x1c7   : > { %9827 = vmatpush3.bf16.msra.mxu0 %v12027_v3  ;;  %v8736_v24 = vpop.f32.mrf.mxu1  ;;  %4787 = vmatprep.mubr.bf16.mxu0 %v12190_v13 }
 0x1c8   : > { %v8779_v5 = vpop.f32.mrf.mxu0  ;;  %9828 = vmatprep.subr.bf16.mxu0 %v10328_v37  ;;  %9250 = vmatprep.subr.bf16.mxu1 %v10332_v10  ;;  %v10339_v10 = vld [vmem:[%s13290_s3 + $0x560] sm:$0xff]  }
 0x1c9   : > { %v8780_v63 = vadd.f32 %v8779_v5, %v8778_v41  ;;  %v9748_v30 = vpop.f32.mrf.mxu1  ;;  %4877 = vmatmul.mubr.bf16.vlgmr.msra.gmra.mxu1 %v11879_v11  ;;  %v10335_v11 = vld [vmem:[%s13290_s3 + $0x530] sm:$0xff]  }
 0x1ca   : > { %v8781_v14 = vpop.f32.mrf.mxu0  ;;  %v12204_v36 = vadd.f32 %v9748_v30, %v12113_v7  ;;  %4884 = vmatprep.mubr.bf16.mxu1 %v11886_v16  ;;  %9251 = vmatpush3.bf16.msra.mxu1 %v10333_v32  ;;  %v10337_v16 = vld [vmem:[%s13290_s3 + $0x568] sm:$0xff]   ;;  %v12255_v30 = vld [vmem:[#allocation2 + $0x20] sm:$0xff]  }
 0x1cb   : > { %v12201_v3 = vadd.f32 %v8780_v63, %v12081_v51  ;;  %9829 = vmatpush3.bf16.msra.mxu0 %v10328_v37  ;;  %v3035_v25 = vpop.f32.mrf.mxu1  ;;  %9252 = vmatprep.subr.bf16.mxu1 %v10334_v20  ;;  %v10336_v63 = vld [vmem:[%s13290_s3 + $0x4d0] sm:$0xff]  }
 0x1cc   : > { %v8782_v21 = vpop.f32.mrf.mxu0  ;;  %9830 = vmatprep.subr.bf16.mxu0 %v10329_v0  ;;  %v12214_v51 = vadd.f32 %v3035_v25, %v12066_v23  ;;  %v12252_v14 = vld [vmem:[#allocation2 + $0x10] sm:$0xff]   ;;  %v10341_v25 = vld [vmem:[%s13290_s3 + $0x4c8] sm:$0xff]  }
 0x1cd   : > { %v9749_v50 = vpop.f32.mrf.mxu1 }
 0x1ce   : > { %v8784_v7 = vpop.f32.mrf.mxu0  ;;  %4788 = vmatmul.mubr.bf16.gmra.mxu0 %v12219_v61  ;;  %9253 = vmatpush3.bf16.msra.mxu1 %v10335_v11 }
 0x1cf   : > { %4795 = vmatprep.mubr.bf16.mxu0 %v12222_v27  ;;  %9831 = vmatpush3.bf16.msra.mxu0 %v10329_v0  ;;  %v3038_v29 = vpop.f32.mrf.mxu1 }
 0x1d0   : > { %v8785_v12 = vpop.f32.mrf.mxu0  ;;  %9832 = vmatprep.subr.bf16.mxu0 %v10330_v59  ;;  %9254 = vmatprep.subr.bf16.mxu1 %v10337_v16 }
 0x1d1   : > { %v8786_v23 = vadd.f32 %v8785_v12, %v8784_v7  ;;  %v9752_v41 = vpop.f32.mrf.mxu1  ;;  %4885 = vmatmul.mubr.bf16.gmra.mxu1 %v11927_v42  ;;  %v10340_v42 = vld [vmem:[%s13290_s3 + $0x520] sm:$0xff]   ;;  %v10344_v7 = vld [vmem:[%s13290_s3 + $0x550] sm:$0xff]  }
 0x1d2   : > { %v8787_v37 = vpop.f32.mrf.mxu0  ;;  %v12237_v0 = vadd.f32 %v9752_v41, %v12167_v28  ;;  %4892 = vmatprep.mubr.bf16.mxu1 %v11932_v58  ;;  %9255 = vmatpush3.bf16.msra.mxu1 %v10338_v43  ;;  %v10342_v58 = vld [vmem:[%s13290_s3 + $0x558] sm:$0xff]   ;;  %v10346_v43 = vld [vmem:[%s13290_s3 + $0x4c0] sm:$0xff]  }
 0x1d3   : > { %v2982_v4 = vadd.f32 %v8786_v23, %v12118_v46  ;;  %9833 = vmatpush3.bf16.msra.mxu0 %v10330_v59  ;;  %v3049_v24 = vpop.f32.mrf.mxu1  ;;  %9256 = vmatprep.subr.bf16.mxu1 %v10339_v10  ;;  %v10343_v59 = vld [vmem:[%s13290_s3 + $0x518] sm:$0xff]  }
 0x1d4   : > { %v8788_v5 = vpop.f32.mrf.mxu0  ;;  %9834 = vmatprep.subr.bf16.mxu0 %v10331_v6  ;;  %v12247_v46 = vadd.f32 %v3049_v24, %v12136_v31  ;;  %v12284_v10 = vld [vmem:[#allocation2 + $0x18] sm:$0xff]   ;;  %v10348_v24 = vld [vmem:[%s13290_s3 + $0x508] sm:$0xff]  }
 0x1d5   : > { %v9753_v32 = vpop.f32.mrf.mxu1 }
 0x1d6   : > { %v8790_v28 = vpop.f32.mrf.mxu0  ;;  %4796 = vmatmul.mubr.bf16.gmra.mxu0 %v12252_v14  ;;  %9257 = vmatpush3.bf16.msra.mxu1 %v10340_v42 }
 0x1d7   : > { %4803 = vmatprep.mubr.bf16.mxu0 %v12255_v30  ;;  %9835 = vmatpush3.bf16.msra.mxu0 %v10331_v6  ;;  %v3052_v21 = vpop.f32.mrf.mxu1  ;;  %v10345_v6 = vld [vmem:[%s13290_s3 + $0x510] sm:$0xff]  }
 0x1d8   : > { %v8791_v20 = vpop.f32.mrf.mxu0  ;;  %9836 = vmatprep.subr.bf16.mxu0 %v10336_v63  ;;  %9258 = vmatprep.subr.bf16.mxu1 %v10342_v58 }
 0x1d9   : > { %v8792_v31 = vadd.f32 %v8791_v20, %v8790_v28  ;;  %v9756_v16 = vpop.f32.mrf.mxu1  ;;  %4893 = vmatmul.mubr.bf16.gmra.mxu1 %v11970_v53  ;;  %v10349_v28 = vld [vmem:[%s13290_s3 + $0x540] sm:$0xff]  }
 0x1da   : > { %v8793_v11 = vpop.f32.mrf.mxu0  ;;  %v12269_v12 = vadd.f32 %v9756_v16, %v2982_v4  ;;  %4900 = vmatprep.mubr.bf16.mxu1 %v11975_v48  ;;  %9259 = vmatpush3.bf16.msra.mxu1 %v10343_v59  ;;  %v10347_v48 = vld [vmem:[%s13290_s3 + $0x548] sm:$0xff]   ;;  %v12317_v16 = vld [vmem:[#allocation2 + $0x30] sm:$0xff]  }
 0x1db   : > { %v2989_v50 = vadd.f32 %v8792_v31, %v12149_v56  ;;  %9837 = vmatpush3.bf16.msra.mxu0 %v10336_v63  ;;  %v3063_v23 = vpop.f32.mrf.mxu1  ;;  %9260 = vmatprep.subr.bf16.mxu1 %v10344_v7  ;;  %v12287_v4 = vld [vmem:[#allocation2 + $0x28] sm:$0xff]   ;;  %v10351_v63 = vld [vmem:[%s13290_s3 + $0x5f8] sm:$0xff]  }
 0x1dc   : > { %v8794_v29 = vpop.f32.mrf.mxu0  ;;  %9838 = vmatprep.subr.bf16.mxu0 %v10341_v25  ;;  %v12279_v53 = vadd.f32 %v3063_v23, %v12201_v3 }
 0x1dd   : > { %v9757_v37 = vpop.f32.mrf.mxu1 }
 0x1de   : > { %v8796_v56 = vpop.f32.mrf.mxu0  ;;  %4804 = vmatmul.mubr.bf16.gmra.mxu0 %v12284_v10  ;;  %9261 = vmatpush3.bf16.msra.mxu1 %v10345_v6 }
 0x1df   : > { %4811 = vmatprep.mubr.bf16.mxu0 %v12287_v4  ;;  %9839 = vmatpush3.bf16.msra.mxu0 %v10341_v25  ;;  %v3066_v5 = vpop.f32.mrf.mxu1  ;;  %v10350_v25 = vld [vmem:[%s13290_s3 + $0x500] sm:$0xff]  }
 0x1e0   : > { %v8797_v41 = vpop.f32.mrf.mxu0  ;;  %9840 = vmatprep.subr.bf16.mxu0 %v10346_v43  ;;  %9262 = vmatprep.subr.bf16.mxu1 %v10347_v48 }
 0x1e1   : > { %v8798_v3 = vadd.f32 %v8797_v41, %v8796_v56  ;;  %v9760_v58 = vpop.f32.mrf.mxu1  ;;  %4901 = vmatmul.mubr.bf16.gmra.mxu1 %v12013_v34  ;;  %v12312_v34 = vld [vmem:[%s13290_s3 + $0x638] sm:$0xff]  }
 0x1e2   : > { %v8799_v42 = vpop.f32.mrf.mxu0  ;;  %4908 = vmatprep.mubr.bf16.mxu1 %v12021_v18  ;;  %9263 = vmatpush3.bf16.msra.mxu1 %v10348_v24 }
 0x1e3   : > { %v2996_v32 = vadd.f32 %v8798_v3, %v12181_v9  ;;  %9841 = vmatpush3.bf16.msra.mxu0 %v10346_v43  ;;  %v3077_v31 = vpop.f32.mrf.mxu1  ;;  %9264 = vmatprep.subr.bf16.mxu1 %v10349_v28  ;;  %v12314_v9 = vld [vmem:[#allocation2 + $0x20] sm:$0xff]  }
 0x1e4   : > { %v8800_v20 = vpop.f32.mrf.mxu0  ;;  %9314 = vmatprep.subr.bf16.mxu0 %v10351_v63  ;;  %v12307_v59 = vadd.f32 %v3077_v31, %v2989_v50 }
 0x1e5   : > { %v12302_v21 = vadd.f32 %v9760_v58, %v2996_v32  ;;  %v9761_v18 = vpop.f32.mrf.mxu1 }
 0x1e6   : > { %v8834_v11 = vpop.f32.mrf.mxu0  ;;  %4812 = vmatmul.mubr.bf16.gmra.mxu0 %v12314_v9  ;;  %9265 = vmatpush3.bf16.msra.mxu1 %v10350_v25 }
 0x1e7   : > { %4819 = vmatprep.mubr.bf16.mxu0 %v12317_v16  ;;  %v3080_v29 = vpop.f32.mrf.mxu1  ;;  %9858 = vmatprep.subr.bf16.mxu1 %v12312_v34 }
 0x1e8   : > { %v8835_v7 = vpop.f32.mrf.mxu0 }
 0x1e9   : > { %v8836_v50 = vadd.f32 %v8835_v7, %v8834_v11  ;;  %v8898_v6 = vpop.f32.mrf.mxu1  ;;  %4909 = vmatmul.mubr.bf16.gmra.mxu1 %v12049_v22 }
 0x1ea   : > { %v8837_v23 = vpop.f32.mrf.mxu0  ;;  %4916 = vmatprep.mubr.bf16.mxu1 %v12054_v47 }
 0x1eb   : > { %v8899_v56 = vpop.f32.mrf.mxu1 }
 0x1ec   : > { %v8838_v43 = vpop.f32.mrf.mxu0  ;;  %v8900_v37 = vadd.f32 %v8899_v56, %v8898_v6 }
 0x1ed   : > { %v8839_v48 = vadd.f32 %v8838_v43, %v8837_v23  ;;  %v8901_v5 = vpop.f32.mrf.mxu1 }
 0x1ee   : > { %v8840_v41 = vpop.f32.mrf.mxu0  ;;  %4820 = vmatmul.mubr.bf16.gmra.mxu0 %v11946_v55  ;;  %v12325_v24 = vadd.f32 %v8900_v37, %v8836_v50 }
 0x1ef   : > { %4827 = vmatprep.mubr.bf16.mxu0 %v11951_v26  ;;  %v8902_v63 = vpop.f32.mrf.mxu1 }
 0x1f0   : > { %v8841_v3 = vpop.f32.mrf.mxu0  ;;  %v8903_v28 = vadd.f32 %v8902_v63, %v8901_v5 }
 0x1f1   : > { %v8842_v42 = vadd.f32 %v8841_v3, %v8840_v41  ;;  %v8904_v22 = vpop.f32.mrf.mxu1  ;;  %4917 = vmatmul.mubr.bf16.gmra.mxu1 %v12089_v45 }
 0x1f2   : > { %v8843_v58 = vpop.f32.mrf.mxu0  ;;  %4924 = vmatprep.mubr.bf16.mxu1 %v12093_v17  ;;  %v12329_v32 = vadd.f32 %v8903_v28, %v8839_v48  ;;  %v10352_v28 = vld [vmem:[%s13290_s3 + $0x5b8] sm:$0xff]  }
 0x1f3   : > { %v8905_v20 = vpop.f32.mrf.mxu1 }
 0x1f4   : > { %v8844_v47 = vpop.f32.mrf.mxu0  ;;  %v8906_v55 = vadd.f32 %v8905_v20, %v8904_v22  ;;  %v10353_v22 = vld [vmem:[%s13290_s3 + $0x5f0] sm:$0xff]  }
 0x1f5   : > { %v8845_v31 = vadd.f32 %v8844_v47, %v8843_v58  ;;  %v8907_v11 = vpop.f32.mrf.mxu1 }
 0x1f6   : > { %v8846_v25 = vpop.f32.mrf.mxu0  ;;  %4828 = vmatmul.mubr.bf16.gmra.mxu0 %v11988_v1  ;;  %v12333_v18 = vadd.f32 %v8906_v55, %v8842_v42 }
 0x1f7   : > { %4835 = vmatprep.mubr.bf16.mxu0 %v11996_v57  ;;  %v8908_v7 = vpop.f32.mrf.mxu1 }
 0x1f8   : > { %v8847_v26 = vpop.f32.mrf.mxu0  ;;  %v8909_v45 = vadd.f32 %v8908_v7, %v8907_v11 }
 0x1f9   : > { %v8848_v29 = vadd.f32 %v8847_v26, %v8846_v25  ;;  %v8910_v23 = vpop.f32.mrf.mxu1  ;;  %4925 = vmatmul.mubr.bf16.gmra.mxu1 %v12123_v35  ;;  %v10355_v26 = vld [vmem:[%s13290_s3 + $0x5e8] sm:$0xff]  }
 0x1fa   : > { %v8849_v50 = vpop.f32.mrf.mxu0  ;;  %4932 = vmatprep.mubr.bf16.mxu1 %v12126_v54  ;;  %v12337_v6 = vadd.f32 %v8909_v45, %v8845_v31 }
 0x1fb   : > { %v8911_v43 = vpop.f32.mrf.mxu1 }
 0x1fc   : > { %v8850_v17 = vpop.f32.mrf.mxu0  ;;  %v8912_v1 = vadd.f32 %v8911_v43, %v8910_v23 }
 0x1fd   : > { %v8851_v56 = vadd.f32 %v8850_v17, %v8849_v50  ;;  %v8913_v37 = vpop.f32.mrf.mxu1  ;;  %v10356_v50 = vld [vmem:[%s13290_s3 + $0x5a8] sm:$0xff]  }
 0x1fe   : > { %v8852_v48 = vpop.f32.mrf.mxu0  ;;  %4836 = vmatmul.mubr.bf16.gmra.mxu0 %v12031_v2  ;;  %v12341_v41 = vadd.f32 %v8912_v1, %v8848_v29 }
 0x1ff   : > { %9842 = vmatprep.mubr.bf16.mxu0 %v12036_v52  ;;  %v8914_v5 = vpop.f32.mrf.mxu1 }
 0x200   : > { %v8853_v57 = vpop.f32.mrf.mxu0  ;;  %v8915_v35 = vadd.f32 %v8914_v5, %v8913_v37 }
 0x201   : > { %v8854_v3 = vadd.f32 %v8853_v57, %v8852_v48  ;;  %v8916_v42 = vpop.f32.mrf.mxu1  ;;  %4933 = vmatmul.mubr.bf16.gmra.mxu1 %v12154_v33  ;;  %v10358_v57 = vld [vmem:[%s13290_s3 + $0x5a0] sm:$0xff]  }
 0x202   : > { %v8855_v63 = vpop.f32.mrf.mxu0  ;;  %5448 = vmatprep.mubr.bf16.mxu1 %v12157_v38  ;;  %v12348_v2 = vadd.f32 %v8915_v35, %v8851_v56  ;;  %v10354_v38 = vld [vmem:[%s13290_s3 + $0x5b0] sm:$0xff]   ;;  %v10357_v56 = vld [vmem:[%s13290_s3 + $0x5e0] sm:$0xff]   ;;  %v10359_v35 = vld [vmem:[%s13290_s3 + $0x5d8] sm:$0xff]  }
 0x203   : > { %v8917_v58 = vpop.f32.mrf.mxu1 }
 0x204   : > { %v8856_v54 = vpop.f32.mrf.mxu0  ;;  %v8918_v47 = vadd.f32 %v8917_v58, %v8916_v42  ;;  %v10374_v42 = vld [vmem:[%s13290_s3 + $0x620] sm:$0xff]  }
 0x205   : > { %v8857_v52 = vadd.f32 %v8856_v54, %v8855_v63  ;;  %v8919_v31 = vpop.f32.mrf.mxu1 }
 0x206   : > { %v8858_v20 = vpop.f32.mrf.mxu0  ;;  %9843 = vmatmul.mubr.bf16.vlgmr.msra.gmra.mxu0 %v12062_v15  ;;  %v12358_v55 = vadd.f32 %v8918_v47, %v8854_v3  ;;  %v10370_v15 = vld [vmem:[%s13290_s3 + $0x630] sm:$0xff]  }
 0x207   : > { %9315 = vmatpush3.bf16.msra.mxu0 %v10352_v28  ;;  %9846 = vmatprep.mubr.bf16.mxu0 %v12073_v39  ;;  %v8920_v25 = vpop.f32.mrf.mxu1  ;;  %v10360_v28 = vld [vmem:[%s13290_s3 + $0x598] sm:$0xff]   ;;  %v10361_v47 = vld [vmem:[%s13290_s3 + $0x5d0] sm:$0xff]  }
 0x208   : > { %v8859_v33 = vpop.f32.mrf.mxu0  ;;  %9316 = vmatprep.subr.bf16.mxu0 %v10353_v22  ;;  %v8921_v7 = vadd.f32 %v8920_v25, %v8919_v31 }
 0x209   : > { %v8860_v11 = vadd.f32 %v8859_v33, %v8858_v20  ;;  %v8922_v45 = vpop.f32.mrf.mxu1  ;;  %5449 = vmatmul.mubr.bf16.vlgmr.msra.gmra.mxu1 %v12183_v49 }
 0x20a   : > { %v8861_v29 = vpop.f32.mrf.mxu0  ;;  %5456 = vmatprep.mubr.bf16.mxu1 %v12190_v13  ;;  %v12371_v23 = vadd.f32 %v8921_v7, %v8857_v52  ;;  %9859 = vmatpush3.bf16.msra.mxu1 %v12312_v34  ;;  %v10371_v13 = vld [vmem:[%s13290_s3 + $0x628] sm:$0xff]  }
 0x20b   : > { %9317 = vmatpush3.bf16.msra.mxu0 %v10354_v38  ;;  %v8923_v17 = vpop.f32.mrf.mxu1  ;;  %9860 = vmatprep.subr.bf16.mxu1 %v10370_v15  ;;  %v10362_v38 = vld [vmem:[%s13290_s3 + $0x590] sm:$0xff]   ;;  %v10363_v7 = vld [vmem:[%s13290_s3 + $0x5c8] sm:$0xff]  }
 0x20c   : > { %v8862_v39 = vpop.f32.mrf.mxu0  ;;  %9318 = vmatprep.subr.bf16.mxu0 %v10355_v26  ;;  %v8924_v49 = vadd.f32 %v8923_v17, %v8922_v45 }
 0x20d   : > { %v8863_v43 = vadd.f32 %v8862_v39, %v8861_v29  ;;  %v8925_v48 = vpop.f32.mrf.mxu1  ;;  %v10364_v39 = vld [vmem:[%s13290_s3 + $0x588] sm:$0xff]  }
 0x20e   : > { %v8864_v1 = vpop.f32.mrf.mxu0  ;;  %9847 = vmatmul.mubr.bf16.gmra.mxu0 %v12103_v44  ;;  %v12385_v5 = vadd.f32 %v8924_v49, %v8860_v11  ;;  %9861 = vmatpush3.bf16.msra.mxu1 %v10370_v15  ;;  %v10378_v15 = vld [vmem:[%s13290_s3 + $0x610] sm:$0xff]  }
 0x20f   : > { %9319 = vmatpush3.bf16.msra.mxu0 %v10356_v50  ;;  %9850 = vmatprep.mubr.bf16.mxu0 %v12109_v8  ;;  %v8926_v34 = vpop.f32.mrf.mxu1 }
 0x210   : > { %v8865_v37 = vpop.f32.mrf.mxu0  ;;  %9320 = vmatprep.subr.bf16.mxu0 %v10357_v56  ;;  %v8927_v63 = vadd.f32 %v8926_v34, %v8925_v48  ;;  %9862 = vmatprep.subr.bf16.mxu1 %v10371_v13  ;;  %v10365_v56 = vld [vmem:[%s13290_s3 + $0x5c0] sm:$0xff]  }
 0x211   : > { %v8866_v3 = vadd.f32 %v8865_v37, %v8864_v1  ;;  %v8928_v54 = vpop.f32.mrf.mxu1  ;;  %5457 = vmatmul.mubr.bf16.gmra.mxu1 %v12219_v61  ;;  %v10366_v48 = vld [vmem:[%s13290_s3 + $0x580] sm:$0xff]  }
 0x212   : > { %v8867_v44 = vpop.f32.mrf.mxu0  ;;  %5464 = vmatprep.mubr.bf16.mxu1 %v12222_v27  ;;  %v12398_v58 = vadd.f32 %v8927_v63, %v8863_v43  ;;  %9863 = vmatpush3.bf16.msra.mxu1 %v10371_v13  ;;  %v10375_v27 = vld [vmem:[%s13290_s3 + $0x618] sm:$0xff]   ;;  %v10382_v63 = vld [vmem:[%s13290_s3 + $0x600] sm:$0xff]  }
 0x213   : > { %9321 = vmatpush3.bf16.msra.mxu0 %v10358_v57  ;;  %v8929_v52 = vpop.f32.mrf.mxu1  ;;  %9864 = vmatprep.subr.bf16.mxu1 %v10374_v42 }
 0x214   : > { %v8868_v8 = vpop.f32.mrf.mxu0  ;;  %9322 = vmatprep.subr.bf16.mxu0 %v10359_v35  ;;  %v8930_v20 = vadd.f32 %v8929_v52, %v8928_v54  ;;  %v10372_v52 = vld [vmem:[%s13289_s2 + $0x70] sm:$0xff]  }
 0x215   : > { %v8869_v22 = vadd.f32 %v8868_v8, %v8867_v44  ;;  %v8931_v31 = vpop.f32.mrf.mxu1 }
 0x216   : > { %v8870_v61 = vpop.f32.mrf.mxu0  ;;  %9851 = vmatmul.mubr.bf16.gmra.mxu0 %v12132_v60  ;;  %v12411_v25 = vadd.f32 %v8930_v20, %v8866_v3  ;;  %9865 = vmatpush3.bf16.msra.mxu1 %v10374_v42  ;;  %v10368_v3 = vld [vmem:[%s13289_s2 + $0x78] sm:$0xff]  }
 0x217   : > { %9323 = vmatpush3.bf16.msra.mxu0 %v10360_v28  ;;  %9854 = vmatprep.mubr.bf16.mxu0 %v12143_v62  ;;  %v8932_v11 = vpop.f32.mrf.mxu1  ;;  %v10369_v42 = vld [vmem:[%s13289_s2 + $0x38] sm:$0xff]  }
 0x218   : > { %v8871_v33 = vpop.f32.mrf.mxu0  ;;  %9324 = vmatprep.subr.bf16.mxu0 %v10361_v47  ;;  %v8933_v29 = vadd.f32 %v8932_v11, %v8931_v31  ;;  %9866 = vmatprep.subr.bf16.mxu1 %v10375_v27  ;;  %v10530_v31 = vld [vmem:[#allocation2 + $0x20] sm:$0xff]  }
 0x219   : > { %v8872_v26 = vadd.f32 %v8871_v33, %v8870_v61  ;;  %v8934_v45 = vpop.f32.mrf.mxu1  ;;  %5465 = vmatmul.mubr.bf16.gmra.mxu1 %v12252_v14  ;;  %v10529_v61 = vld [vmem:[#allocation2 + $0x10] sm:$0xff]  }
 0x21a   : > { %v8873_v60 = vpop.f32.mrf.mxu0  ;;  %5472 = vmatprep.mubr.bf16.mxu1 %v12255_v30  ;;  %v12424_v50 = vadd.f32 %v8933_v29, %v8869_v22  ;;  %9867 = vmatpush3.bf16.msra.mxu1 %v10375_v27  ;;  %v10379_v30 = vld [vmem:[%s13290_s3 + $0x608] sm:$0xff]   ;;  %v10373_v33 = vld [vmem:[%s13289_s2 + $0x30] sm:$0xff]  }
 0x21b   : > { %9325 = vmatpush3.bf16.msra.mxu0 %v10362_v38  ;;  %v8935_v17 = vpop.f32.mrf.mxu1  ;;  %9868 = vmatprep.subr.bf16.mxu1 %v10378_v15 }
 0x21c   : > { %v8874_v62 = vpop.f32.mrf.mxu0  ;;  %9326 = vmatprep.subr.bf16.mxu0 %v10363_v7  ;;  %v8936_v49 = vadd.f32 %v8935_v17, %v8934_v45 }
 0x21d   : > { %v8875_v43 = vadd.f32 %v8874_v62, %v8873_v60  ;;  %v8937_v1 = vpop.f32.mrf.mxu1 }
 0x21e   : > { %v8876_v14 = vpop.f32.mrf.mxu0  ;;  %9855 = vmatmul.mubr.bf16.gmra.mxu0 %v12163_v19  ;;  %v12437_v37 = vadd.f32 %v8936_v49, %v8872_v26  ;;  %9869 = vmatpush3.bf16.msra.mxu1 %v10378_v15 }
 0x21f   : > { %9327 = vmatpush3.bf16.msra.mxu0 %v10364_v39  ;;  %5545 = vmatprep.mubr.bf16.mxu0 %v12172_v40  ;;  %v8938_v57 = vpop.f32.mrf.mxu1 }
 0x220   : > { %v8877_v13 = vpop.f32.mrf.mxu0  ;;  %9328 = vmatprep.subr.bf16.mxu0 %v10365_v56  ;;  %v8939_v35 = vadd.f32 %v8938_v57, %v8937_v1  ;;  %9870 = vmatprep.subr.bf16.mxu1 %v10379_v30 }
 0x221   : > { %v8878_v34 = vadd.f32 %v8877_v13, %v8876_v14  ;;  %v8940_v44 = vpop.f32.mrf.mxu1  ;;  %5473 = vmatmul.mubr.bf16.gmra.mxu1 %v12284_v10 }
 0x222   : > { %v8879_v19 = vpop.f32.mrf.mxu0  ;;  %5480 = vmatprep.mubr.bf16.mxu1 %v12287_v4  ;;  %v12450_v54 = vadd.f32 %v8939_v35, %v8875_v43  ;;  %9871 = vmatpush3.bf16.msra.mxu1 %v10379_v30  ;;  %v12458_v4 = vld [vmem:[%s13289_s2 + $0xb8] sm:$0xff]  }
 0x223   : > { %9329 = vmatpush3.bf16.msra.mxu0 %v10366_v48  ;;  %v8941_v8 = vpop.f32.mrf.mxu1  ;;  %9872 = vmatprep.subr.bf16.mxu1 %v10382_v63  ;;  %v10531_v48 = vld [vmem:[#allocation2 + $0x18] sm:$0xff]  }
 0x224   : > { %v8880_v40 = vpop.f32.mrf.mxu0  ;;  %9394 = vmatprep.subr.bf16.mxu0 %v10368_v3  ;;  %v8942_v22 = vadd.f32 %v8941_v8, %v8940_v44  ;;  %v10381_v3 = vld [vmem:[%s13289_s2 + $0x20] sm:$0xff]   ;;  %v10533_v8 = vld [vmem:[#allocation2 + $0x28] sm:$0xff]  }
 0x225   : > { %v8881_v28 = vadd.f32 %v8880_v40, %v8879_v19  ;;  %v8943_v47 = vpop.f32.mrf.mxu1 }
 0x226   : > { %v9780_v10 = vpop.f32.mrf.mxu0  ;;  %5546 = vmatmul.mubr.bf16.vlgmr.msra.gmra.mxu0 %v10529_v61  ;;  %v12464_v38 = vadd.f32 %v8942_v22, %v8878_v34  ;;  %9873 = vmatpush3.bf16.msra.mxu1 %v10382_v63  ;;  %v10532_v34 = vld [vmem:[#allocation2 + $0x28] sm:$0xff]   ;;  %v10534_v22 = vld [vmem:[#allocation2 + $0x38] sm:$0xff]   ;;  %v10387_v61 = vld [vmem:[%s13289_s2 + $0x50] sm:$0xff]  }
 0x227   : > { %v3648_v20 = vadd.f32 %v9780_v10, %v12333_v18  ;;  %9395 = vmatpush3.bf16.msra.mxu0 %v10369_v42  ;;  %5553 = vmatprep.mubr.bf16.mxu0 %v10530_v31  ;;  %v8944_v11 = vpop.f32.mrf.mxu1  ;;  %v10376_v18 = vld [vmem:[%s13289_s2 + $0x68] sm:$0xff]  }
 0x228   : > { %v3639_v27 = vpop.f32.mrf.mxu0  ;;  %9396 = vmatprep.subr.bf16.mxu0 %v10372_v52  ;;  %v8945_v7 = vadd.f32 %v8944_v11, %v8943_v47  ;;  %9890 = vmatprep.subr.bf16.mxu1 %v12458_v4 }
 0x229   : > { %v3640_v26 = vadd.f32 %v3639_v27, %v12325_v24  ;;  %v8978_v60 = vpop.f32.mrf.mxu1  ;;  %5481 = vmatmul.mubr.bf16.gmra.mxu1 %v12314_v9  ;;  %v10377_v24 = vld [vmem:[%s13289_s2 + $0x28] sm:$0xff]   ;;  %v3721_v39 = vrot.slane %v3648_v20, 1  ;;  %v10380_v9 = vld [vmem:[%s13289_s2 + $0x60] sm:$0xff]  }
 0x22a   : > { %v9781_v29 = vpop.f32.mrf.mxu0  ;;  %5488 = vmatprep.mubr.bf16.mxu1 %v12317_v16  ;;  %v12477_v62 = vadd.f32 %v8945_v7, %v8881_v28  ;;  %v10535_v7 = vld [vmem:[#allocation2 + $0x20] sm:$0xff]  }
 0x22b   : > { %v3651_v15 = vadd.f32 %v9781_v29, %v12337_v6  ;;  %9397 = vmatpush3.bf16.msra.mxu0 %v10373_v33  ;;  %v8979_v17 = vpop.f32.mrf.mxu1  ;;  %v3718_v49 = vrot.slane %v3640_v26, 1 }
 0x22c   : > { %v3642_v45 = vpop.f32.mrf.mxu0  ;;  %9398 = vmatprep.subr.bf16.mxu0 %v10376_v18  ;;  %v12483_v6 = vadd.f32 %v8979_v17, %v8978_v60  ;;  %v10536_v60 = vld [vmem:[#allocation2 + $0x30] sm:$0xff]  }
 0x22d   : > { %v3722_v43 = vrot.slane %v3651_v15, 1  ;;  %v3643_v56 = vadd.f32 %v3642_v45, %v12329_v32  ;;  %v8981_v30 = vpop.f32.mrf.mxu1  ;;  %v10389_v15 = vld [vmem:[%s13289_s2 + $0x10] sm:$0xff]  }
 0x22e   : > { %v9784_v16 = vpop.f32.mrf.mxu0  ;;  %5554 = vmatmul.mubr.bf16.gmra.mxu0 %v10531_v48  ;;  %v10395_v48 = vld [vmem:[%s13289_s2 + $0x40] sm:$0xff]  }
 0x22f   : > { %v3723_v14 = vsel %vm1388_vm0, %v3721_v39, %v3722_v43  ;;  %v3719_v1 = vrot.slane %v3643_v56, 1  ;;  %v3664_v13 = vadd.f32 %v9784_v16, %v12358_v55  ;;  %5561 = vmatprep.mubr.bf16.mxu0 %v10532_v34  ;;  %9399 = vmatpush3.bf16.msra.mxu0 %v10377_v24  ;;  %v8982_v19 = vpop.f32.mrf.mxu1  ;;  %v10383_v55 = vld [vmem:[%s13289_s2 + $0x58] sm:$0xff]  }
 0x230   : > { %v12488_v57 = vadd.f32 %v3723_v14, %v12204_v36  ;;  %v3655_v32 = vpop.f32.mrf.mxu0  ;;  %9400 = vmatprep.subr.bf16.mxu0 %v10380_v9  ;;  %v12501_v44 = vadd.f32 %v8982_v19, %v8981_v30  ;;  %v10537_v9 = vld [vmem:[#allocation2 + $0x30] sm:$0xff]   ;;  %v10538_v14 = vld [vmem:[#allocation2 + $0x40] sm:$0xff]  }
 0x231   : > { %v3720_v35 = vsel %vm1388_vm0, %v3718_v49, %v3719_v1  ;;  %v3656_v63 = vadd.f32 %v3655_v32, %v12341_v41  ;;  %v8984_v42 = vpop.f32.mrf.mxu1  ;;  %5489 = vmatmul.mubr.bf16.gmra.mxu1 %v10533_v8  ;;  %v10385_v41 = vld [vmem:[%s13289_s2 + $0x18] sm:$0xff]   ;;  %v3727_v10 = vrot.slane %v3664_v13, 1  ;;  %v10397_v8 = vld [vmem:[%s13289_s2] sm:$0xff]  }
 0x232   : > { %v12499_v36 = vadd.f32 %v3720_v35, %v12214_v51  ;;  %v9785_v40 = vpop.f32.mrf.mxu0  ;;  %5496 = vmatprep.mubr.bf16.mxu1 %v10534_v22 }
 0x233   : > { %v3667_v28 = vadd.f32 %v9785_v40, %v12371_v23  ;;  %9401 = vmatpush3.bf16.msra.mxu0 %v10381_v3  ;;  %v8985_v47 = vpop.f32.mrf.mxu1  ;;  %v3724_v31 = vrot.slane %v3656_v63, 1 }
 0x234   : > { %v3658_v52 = vpop.f32.mrf.mxu0  ;;  %9402 = vmatprep.subr.bf16.mxu0 %v10383_v55  ;;  %v12511_v27 = vadd.f32 %v8985_v47, %v8984_v42  ;;  %v10539_v55 = vld [vmem:[#allocation2 + $0x28] sm:$0xff]   ;;  %v10540_v42 = vld [vmem:[#allocation2 + $0x38] sm:$0xff]  }
 0x235   : > { %v3728_v51 = vrot.slane %v3667_v28, 1  ;;  %v3659_v20 = vadd.f32 %v3658_v52, %v12348_v2  ;;  %v8987_v11 = vpop.f32.mrf.mxu1 }
 0x236   : > { %v9788_v23 = vpop.f32.mrf.mxu0  ;;  %5562 = vmatmul.mubr.bf16.gmra.mxu0 %v10535_v7 }
 0x237   : > { %v3729_v33 = vsel %vm1388_vm0, %v3727_v10, %v3728_v51  ;;  %v3725_v26 = vrot.slane %v3659_v20, 1  ;;  %v3680_v18 = vadd.f32 %v9788_v23, %v12411_v25  ;;  %5569 = vmatprep.mubr.bf16.mxu0 %v10536_v60  ;;  %9403 = vmatpush3.bf16.msra.mxu0 %v10385_v41  ;;  %v8988_v24 = vpop.f32.mrf.mxu1  ;;  %v10391_v25 = vld [vmem:[%s13289_s2 + $0x48] sm:$0xff]   ;;  %v10541_v51 = vld [vmem:[#allocation2 + $0x38] sm:$0xff]   ;;  %v10542_v23 = vld [vmem:[#allocation2 + $0x20] sm:$0xff]  }
 0x238   : > { %v12516_v29 = vadd.f32 %v3729_v33, %v12237_v0  ;;  %v3671_v2 = vpop.f32.mrf.mxu0  ;;  %9404 = vmatprep.subr.bf16.mxu0 %v10387_v61  ;;  %v12529_v17 = vadd.f32 %v8988_v24, %v8987_v11 }
 0x239   : > { %v3726_v45 = vsel %vm1388_vm0, %v3724_v31, %v3725_v26  ;;  %v3672_v39 = vadd.f32 %v3671_v2, %v12385_v5  ;;  %v8990_v56 = vpop.f32.mrf.mxu1  ;;  %5497 = vmatmul.mubr.bf16.gmra.mxu1 %v10537_v9  ;;  %v10393_v5 = vld [vmem:[%s13289_s2 + $0x8] sm:$0xff]   ;;  %v3733_v30 = vrot.slane %v3680_v18, 1 }
 0x23a   : > { %v12527_v0 = vadd.f32 %v3726_v45, %v12247_v46  ;;  %v9789_v43 = vpop.f32.mrf.mxu0  ;;  %5504 = vmatprep.mubr.bf16.mxu1 %v10538_v14  ;;  %v10544_v45 = vld [vmem:[#allocation2 + $0x40] sm:$0xff]   ;;  %v10546_v14 = vld [vmem:[#allocation2 + $0x30] sm:$0xff]  }
 0x23b   : > { %v3683_v16 = vadd.f32 %v9789_v43, %v12424_v50  ;;  %9405 = vmatpush3.bf16.msra.mxu0 %v10389_v15  ;;  %v8991_v1 = vpop.f32.mrf.mxu1  ;;  %v3730_v34 = vrot.slane %v3672_v39, 1 }
 0x23c   : > { %v3674_v49 = vpop.f32.mrf.mxu0  ;;  %9406 = vmatprep.subr.bf16.mxu0 %v10391_v25  ;;  %v12539_v32 = vadd.f32 %v8991_v1, %v8990_v56  ;;  %v10386_v25 = vld [vmem:[%s13289_s2 + $0xb0] sm:$0xff]  }
 0x23d   : > { %v3734_v46 = vrot.slane %v3683_v16, 1  ;;  %v3675_v13 = vadd.f32 %v3674_v49, %v12398_v58  ;;  %v8993_v35 = vpop.f32.mrf.mxu1  ;;  %v10545_v49 = vld [vmem:[#allocation2 + $0x28] sm:$0xff]  }
 0x23e   : > { %v9792_v50 = vpop.f32.mrf.mxu0  ;;  %5570 = vmatmul.mubr.bf16.gmra.mxu0 %v10539_v55 }
 0x23f   : > { %v3735_v3 = vsel %vm1388_vm0, %v3733_v30, %v3734_v46  ;;  %v3731_v19 = vrot.slane %v3675_v13, 1  ;;  %v3696_v63 = vadd.f32 %v9792_v50, %v12464_v38  ;;  %5577 = vmatprep.mubr.bf16.mxu0 %v10540_v42  ;;  %9407 = vmatpush3.bf16.msra.mxu0 %v10393_v5  ;;  %v8994_v52 = vpop.f32.mrf.mxu1  ;;  %v12554_v38 = vld [vmem:[%s13289_s2 + $0x178] sm:$0xff]  }
 0x240   : > { %v12544_v40 = vadd.f32 %v3735_v3, %v12269_v12  ;;  %v3687_v58 = vpop.f32.mrf.mxu0  ;;  %9408 = vmatprep.subr.bf16.mxu0 %v10395_v48  ;;  %v12559_v41 = vadd.f32 %v8994_v52, %v8993_v35  ;;  %v10549_v42 = vld [vmem:[#allocation2 + $0x38] sm:$0xff]  }
 0x241   : > { %v3732_v28 = vsel %vm1388_vm0, %v3730_v34, %v3731_v19  ;;  %v3688_v22 = vadd.f32 %v3687_v58, %v12437_v37  ;;  %v8996_v47 = vpop.f32.mrf.mxu1  ;;  %5505 = vmatmul.mubr.bf16.gmra.mxu1 %v10541_v51  ;;  %v3739_v37 = vrot.slane %v3696_v63, 1  ;;  %v10547_v34 = vld [vmem:[#allocation2 + $0x38] sm:$0xff]   ;;  %v10390_v19 = vld [vmem:[%s13289_s2 + $0xa0] sm:$0xff]  }
 0x242   : > { %v12557_v12 = vadd.f32 %v3732_v28, %v12279_v53  ;;  %v9793_v10 = vpop.f32.mrf.mxu0  ;;  %9874 = vmatprep.mubr.bf16.mxu1 %v10542_v23  ;;  %v10550_v28 = vld [vmem:[#allocation2 + $0x40] sm:$0xff]  }
 0x243   : > { %v3699_v20 = vadd.f32 %v9793_v10, %v12477_v62  ;;  %9409 = vmatpush3.bf16.msra.mxu0 %v10397_v8  ;;  %v8997_v31 = vpop.f32.mrf.mxu1  ;;  %v3736_v26 = vrot.slane %v3688_v22, 1  ;;  %v10543_v62 = vld [vmem:[#allocation2 + $0x30] sm:$0xff]   ;;  %v10392_v10 = vld [vmem:[%s13289_s2 + $0x98] sm:$0xff]   ;;  %v10551_v23 = vld [vmem:[#allocation2 + $0x40] sm:$0xff]  }
 0x244   : > { %v3690_v61 = vpop.f32.mrf.mxu0  ;;  %9922 = vmatprep.subr.bf16.mxu0 %v12554_v38  ;;  %v12564_v53 = vadd.f32 %v8997_v31, %v8996_v47 }
 0x245   : > { %v3740_v33 = vrot.slane %v3699_v20, 1  ;;  %v3691_v11 = vadd.f32 %v3690_v61, %v12450_v54  ;;  %v8999_v7 = vpop.f32.mrf.mxu1 }
 0x246   : > { %v9042_v60 = vpop.f32.mrf.mxu0  ;;  %5578 = vmatmul.mubr.bf16.gmra.mxu0 %v10543_v62  ;;  %v10554_v62 = vld [vmem:[#allocation2 + $0x50] sm:$0xff]  }
 0x247   : > { %v3741_v18 = vsel %vm1388_vm0, %v3739_v37, %v3740_v33  ;;  %v3737_v2 = vrot.slane %v3691_v11, 1  ;;  %5585 = vmatprep.mubr.bf16.mxu0 %v10544_v45  ;;  %v9000_v54 = vpop.f32.mrf.mxu1  ;;  %v10552_v37 = vld [vmem:[#allocation2 + $0x50] sm:$0xff]  }
 0x248   : > { %v12568_v15 = vadd.f32 %v3741_v18, %v12302_v21  ;;  %v9043_v39 = vpop.f32.mrf.mxu0  ;;  %v12577_v56 = vadd.f32 %v9000_v54, %v8999_v7  ;;  %v10394_v11 = vld [vmem:[%s13289_s2 + $0x90] sm:$0xff]   ;;  %v10396_v54 = vld [vmem:[%s13289_s2 + $0x88] sm:$0xff]  }
 0x249   : > { %v3738_v24 = vsel %vm1388_vm0, %v3736_v26, %v3737_v2  ;;  %v9044_v9 = vadd.f32 %v9043_v39, %v9042_v60  ;;  %v9002_v16 = vpop.f32.mrf.mxu1  ;;  %9875 = vmatmul.mubr.bf16.vlgmr.msra.gmra.mxu1 %v10545_v49  ;;  %v10553_v2 = vld [vmem:[#allocation2 + $0x48] sm:$0xff]  }
 0x24a   : > { %v12575_v43 = vadd.f32 %v3738_v24, %v12307_v59  ;;  %v9045_v21 = vpop.f32.mrf.mxu0  ;;  %9891 = vmatpush3.bf16.msra.mxu1 %v12458_v4  ;;  %9878 = vmatprep.mubr.bf16.mxu1 %v10546_v14  ;;  %v10388_v59 = vld [vmem:[%s13289_s2 + $0xa8] sm:$0xff]  }
 0x24b   : > { %v12581_v5 = vadd.f32 %v9044_v9, %v12483_v6  ;;  %v9003_v30 = vpop.f32.mrf.mxu1  ;;  %9892 = vmatprep.subr.bf16.mxu1 %v10386_v25  ;;  %v10548_v4 = vld [vmem:[#allocation2 + $0x48] sm:$0xff]   ;;  %v12620_v9 = vld [vmem:[#allocation3 + $0x10] sm:$0xff]  }
 0x24c   : > { %v9046_v1 = vpop.f32.mrf.mxu0  ;;  %v12586_v46 = vadd.f32 %v9003_v30, %v9002_v16 }
 0x24d   : > { %v9047_v13 = vadd.f32 %v9046_v1, %v9045_v21  ;;  %v9005_v48 = vpop.f32.mrf.mxu1  ;;  %v10555_v21 = vld [vmem:[#allocation2 + $0x48] sm:$0xff]   ;;  %v10400_v1 = vld [vmem:[%s13289_s2 + $0x80] sm:$0xff]  }
 0x24e   : > { %v9048_v50 = vpop.f32.mrf.mxu0  ;;  %5586 = vmatmul.mubr.bf16.gmra.mxu0 %v10547_v34  ;;  %9893 = vmatpush3.bf16.msra.mxu1 %v10386_v25  ;;  %v10556_v34 = vld [vmem:[#allocation2 + $0x58] sm:$0xff]  }
 0x24f   : > { %5593 = vmatprep.mubr.bf16.mxu0 %v10548_v4  ;;  %v12589_v6 = vadd.f32 %v9047_v13, %v12501_v44  ;;  %v9006_v3 = vpop.f32.mrf.mxu1  ;;  %9894 = vmatprep.subr.bf16.mxu1 %v10388_v59  ;;  %v12631_v13 = vld [vmem:[#allocation3 + $0x18] sm:$0xff]  }
 0x250   : > { %v9049_v35 = vpop.f32.mrf.mxu0  ;;  %v12594_v63 = vadd.f32 %v9006_v3, %v9005_v48  ;;  %v12633_v3 = vld [vmem:[#allocation3 + $0x8] sm:$0xff]  }
 0x251   : > { %v9050_v55 = vadd.f32 %v9049_v35, %v9048_v50  ;;  %v9008_v58 = vpop.f32.mrf.mxu1  ;;  %9879 = vmatmul.mubr.bf16.gmra.mxu1 %v10549_v42 }
 0x252   : > { %v9051_v8 = vpop.f32.mrf.mxu0  ;;  %9895 = vmatpush3.bf16.msra.mxu1 %v10388_v59  ;;  %9882 = vmatprep.mubr.bf16.mxu1 %v10550_v28  ;;  %v10413_v28 = vld [vmem:[%s13289_s2 + $0x170] sm:$0xff]  }
 0x253   : > { %v12597_v44 = vadd.f32 %v9050_v55, %v12511_v27  ;;  %v9009_v52 = vpop.f32.mrf.mxu1  ;;  %9896 = vmatprep.subr.bf16.mxu1 %v10390_v19  ;;  %v10403_v55 = vld [vmem:[%s13289_s2 + $0x138] sm:$0xff]  }
 0x254   : > { %v9052_v22 = vpop.f32.mrf.mxu0  ;;  %v12602_v47 = vadd.f32 %v9009_v52, %v9008_v58 }
 0x255   : > { %v9053_v51 = vadd.f32 %v9052_v22, %v9051_v8  ;;  %v9011_v20 = vpop.f32.mrf.mxu1  ;;  %v12644_v8 = vld [vmem:[#allocation3 + $0x18] sm:$0xff]  }
 0x256   : > { %v9054_v61 = vpop.f32.mrf.mxu0  ;;  %5594 = vmatmul.mubr.bf16.gmra.mxu0 %v10551_v23  ;;  %9897 = vmatpush3.bf16.msra.mxu1 %v10390_v19  ;;  %v10408_v23 = vld [vmem:[%s13289_s2 + $0x130] sm:$0xff]  }
 0x257   : > { %5601 = vmatprep.mubr.bf16.mxu0 %v10552_v37  ;;  %v12605_v27 = vadd.f32 %v9053_v51, %v12529_v17  ;;  %v9012_v31 = vpop.f32.mrf.mxu1  ;;  %9898 = vmatprep.subr.bf16.mxu1 %v10392_v10 }
 0x258   : > { %v9055_v33 = vpop.f32.mrf.mxu0  ;;  %v12610_v26 = vadd.f32 %v9012_v31, %v9011_v20  ;;  %v12657_v20 = vld [vmem:[#allocation3 + $0x20] sm:$0xff]   ;;  %v12665_v31 = vld [vmem:[#allocation3 + $0x28] sm:$0xff]  }
 0x259   : > { %v9056_v18 = vadd.f32 %v9055_v33, %v9054_v61  ;;  %v9014_v7 = vpop.f32.mrf.mxu1  ;;  %9883 = vmatmul.mubr.bf16.gmra.mxu1 %v10553_v2 }
 0x25a   : > { %v9057_v60 = vpop.f32.mrf.mxu0  ;;  %9899 = vmatpush3.bf16.msra.mxu1 %v10392_v10  ;;  %9886 = vmatprep.mubr.bf16.mxu1 %v10554_v62 }
 0x25b   : > { %v12613_v17 = vadd.f32 %v9056_v18, %v12539_v32  ;;  %v9015_v45 = vpop.f32.mrf.mxu1  ;;  %9900 = vmatprep.subr.bf16.mxu1 %v10394_v11 }
 0x25c   : > { %v9058_v24 = vpop.f32.mrf.mxu0  ;;  %v12618_v39 = vadd.f32 %v9015_v45, %v9014_v7  ;;  %v10409_v7 = vld [vmem:[%s13289_s2 + $0xf0] sm:$0xff]  }
 0x25d   : > { %v9059_v25 = vadd.f32 %v9058_v24, %v9057_v60  ;;  %v9017_v16 = vpop.f32.mrf.mxu1  ;;  %v12679_v45 = vld [vmem:[#allocation3 + $0x10] sm:$0xff]   ;;  %v10412_v24 = vld [vmem:[%s13289_s2 + $0x128] sm:$0xff]  }
 0x25e   : > { %v9060_v49 = vpop.f32.mrf.mxu0  ;;  %5602 = vmatmul.mubr.bf16.gmra.mxu0 %v10555_v21  ;;  %9901 = vmatpush3.bf16.msra.mxu1 %v10394_v11 }
 0x25f   : > { %6182 = vmatprep.mubr.bf16.mxu0 %v12620_v9  ;;  %v12624_v32 = vadd.f32 %v9059_v25, %v12559_v41  ;;  %v9018_v14 = vpop.f32.mrf.mxu1  ;;  %9902 = vmatprep.subr.bf16.mxu1 %v10396_v54  ;;  %v12685_v25 = vld [vmem:[#allocation3 + $0x20] sm:$0xff]  }
 0x260   : > { %v9061_v30 = vpop.f32.mrf.mxu0  ;;  %v12629_v59 = vadd.f32 %v9018_v14, %v9017_v16 }
 0x261   : > { %v9062_v48 = vadd.f32 %v9061_v30, %v9060_v49  ;;  %v9020_v50 = vpop.f32.mrf.mxu1  ;;  %9887 = vmatmul.mubr.bf16.gmra.mxu1 %v10556_v34 }
 0x262   : > { %v9063_v4 = vpop.f32.mrf.mxu0  ;;  %9903 = vmatpush3.bf16.msra.mxu1 %v10396_v54  ;;  %9906 = vmatprep.mubr.bf16.mxu1 %v12631_v13 }
 0x263   : > { %v12637_v41 = vadd.f32 %v9062_v48, %v12564_v53  ;;  %v9021_v35 = vpop.f32.mrf.mxu1  ;;  %9904 = vmatprep.subr.bf16.mxu1 %v10400_v1  ;;  %v10407_v53 = vld [vmem:[%s13289_s2 + $0xf8] sm:$0xff]  }
 0x264   : > { %v9064_v19 = vpop.f32.mrf.mxu0  ;;  %v12642_v58 = vadd.f32 %v9021_v35, %v9020_v50  ;;  %v10417_v50 = vld [vmem:[%s13289_s2 + $0x120] sm:$0xff]   ;;  %v12705_v35 = vld [vmem:[#allocation3 + $0x38] sm:$0xff]  }
 0x265   : > { %v9065_v42 = vadd.f32 %v9064_v19, %v9063_v4  ;;  %v9023_v52 = vpop.f32.mrf.mxu1 }
 0x266   : > { %v9066_v22 = vpop.f32.mrf.mxu0  ;;  %6183 = vmatmul.mubr.bf16.vlgmr.msra.gmra.mxu0 %v12633_v3  ;;  %9905 = vmatpush3.bf16.msra.mxu1 %v10400_v1  ;;  %v12699_v1 = vld [vmem:[#allocation3 + $0x30] sm:$0xff]  }
 0x267   : > { %6190 = vmatprep.mubr.bf16.mxu0 %v12644_v8  ;;  %v12655_v10 = vadd.f32 %v9065_v42, %v12577_v56  ;;  %v9024_v51 = vpop.f32.mrf.mxu1  ;;  %9474 = vmatprep.subr.bf16.mxu1 %v10403_v55  ;;  %v10422_v56 = vld [vmem:[%s13289_s2 + $0x168] sm:$0xff]  }
 0x268   : > { %9923 = vmatpush3.bf16.msra.mxu0 %v12554_v38  ;;  %v9067_v61 = vpop.f32.mrf.mxu0  ;;  %v12663_v37 = vadd.f32 %v9024_v51, %v9023_v52 }
 0x269   : > { %v9068_v33 = vadd.f32 %v9067_v61, %v9066_v22  ;;  %9924 = vmatprep.subr.bf16.mxu0 %v10413_v28  ;;  %v9812_v11 = vpop.f32.mrf.mxu1  ;;  %9907 = vmatmul.mubr.bf16.vlgmr.msra.gmra.mxu1 %v12657_v20 }
 0x26a   : > { %v9069_v18 = vpop.f32.mrf.mxu0  ;;  %v4316_v38 = vadd.f32 %v9812_v11, %v12597_v44  ;;  %9910 = vmatprep.mubr.bf16.mxu1 %v12665_v31  ;;  %9475 = vmatpush3.bf16.msra.mxu1 %v10407_v53 }
 0x26b   : > { %v12677_v2 = vadd.f32 %v9068_v33, %v12586_v46  ;;  %v4307_v60 = vpop.f32.mrf.mxu1  ;;  %9476 = vmatprep.subr.bf16.mxu1 %v10408_v23  ;;  %v10431_v46 = vld [vmem:[%s13289_s2 + $0x160] sm:$0xff]  }
 0x26c   : > { %v9070_v62 = vpop.f32.mrf.mxu0  ;;  %9925 = vmatpush3.bf16.msra.mxu0 %v10413_v28  ;;  %v4308_v44 = vadd.f32 %v4307_v60, %v12581_v5  ;;  %v10416_v5 = vld [vmem:[%s13289_s2 + $0xe8] sm:$0xff]  }
 0x26d   : > { %v9071_v54 = vadd.f32 %v9070_v62, %v9069_v18  ;;  %9926 = vmatprep.subr.bf16.mxu0 %v10422_v56  ;;  %v9813_v16 = vpop.f32.mrf.mxu1 }
 0x26e   : > { %v9072_v49 = vpop.f32.mrf.mxu0  ;;  %6191 = vmatmul.mubr.bf16.gmra.mxu0 %v12679_v45  ;;  %v4319_v21 = vadd.f32 %v9813_v16, %v12605_v27  ;;  %9477 = vmatpush3.bf16.msra.mxu1 %v10409_v7  ;;  %v4389_v27 = vrot.slane %v4316_v38, 2  ;;  %v4386_v55 = vrot.slane %v4308_v44, 2  ;;  %v12728_v7 = vld [vmem:[#allocation3 + $0x28] sm:$0xff]   ;;  %v10426_v16 = vld [vmem:[%s13289_s2 + $0x110] sm:$0xff]  }
 0x26f   : > { %6198 = vmatprep.mubr.bf16.mxu0 %v12685_v25  ;;  %v12697_v14 = vadd.f32 %v9071_v54, %v12594_v63  ;;  %v4310_v30 = vpop.f32.mrf.mxu1  ;;  %9478 = vmatprep.subr.bf16.mxu1 %v10412_v24  ;;  %v10437_v63 = vld [vmem:[%s13289_s2 + $0x158] sm:$0xff]  }
 0x270   : > { %v9073_v48 = vpop.f32.mrf.mxu0  ;;  %9927 = vmatpush3.bf16.msra.mxu0 %v10422_v56  ;;  %v4390_v34 = vrot.slane %v4319_v21, 2  ;;  %v4311_v4 = vadd.f32 %v4310_v30, %v12589_v6  ;;  %v10418_v6 = vld [vmem:[%s13289_s2 + $0xe0] sm:$0xff]   ;;  %v12721_v56 = vld [vmem:[#allocation3 + $0x18] sm:$0xff]  }
 0x271   : > { %v9074_v19 = vadd.f32 %v9073_v48, %v9072_v49  ;;  %9928 = vmatprep.subr.bf16.mxu0 %v10431_v46  ;;  %v9816_v42 = vpop.f32.mrf.mxu1  ;;  %9911 = vmatmul.mubr.bf16.gmra.mxu1 %v12699_v1 }
 0x272   : > { %v9075_v28 = vpop.f32.mrf.mxu0  ;;  %v4391_v52 = vsel %vm1848_vm1, %v4389_v27, %v4390_v34  ;;  %v4387_v22 = vrot.slane %v4311_v4, 2  ;;  %v4332_v53 = vadd.f32 %v9816_v42, %v12637_v41  ;;  %9914 = vmatprep.mubr.bf16.mxu1 %v12705_v35  ;;  %9479 = vmatpush3.bf16.msra.mxu1 %v10416_v5  ;;  %v10421_v41 = vld [vmem:[%s13289_s2 + $0x118] sm:$0xff]   ;;  %v12749_v5 = vld [vmem:[#allocation3 + $0x48] sm:$0xff]  }
 0x273   : > { %v4251_v51 = vadd.f32 %v9074_v19, %v12602_v47  ;;  %v12719_v61 = vadd.f32 %v4391_v52, %v12488_v57  ;;  %v4323_v23 = vpop.f32.mrf.mxu1  ;;  %9480 = vmatprep.subr.bf16.mxu1 %v10417_v50  ;;  %v10440_v57 = vld [vmem:[%s13289_s2 + $0x150] sm:$0xff]   ;;  %v12764_v52 = vld [vmem:[#allocation3 + $0x20] sm:$0xff]  }
 0x274   : > { %v9076_v33 = vpop.f32.mrf.mxu0  ;;  %9929 = vmatpush3.bf16.msra.mxu0 %v10431_v46  ;;  %v4388_v11 = vsel %vm1848_vm1, %v4386_v55, %v4387_v22  ;;  %v4324_v18 = vadd.f32 %v4323_v23, %v12613_v17  ;;  %v10425_v17 = vld [vmem:[%s13289_s2 + $0xd8] sm:$0xff]   ;;  %v12743_v46 = vld [vmem:[#allocation3 + $0x40] sm:$0xff]   ;;  %v10430_v22 = vld [vmem:[%s13289_s2 + $0x108] sm:$0xff]  }
 0x275   : > { %v9077_v38 = vadd.f32 %v9076_v33, %v9075_v28  ;;  %9930 = vmatprep.subr.bf16.mxu0 %v10437_v63  ;;  %v12734_v47 = vadd.f32 %v4388_v11, %v12499_v36  ;;  %v9817_v60 = vpop.f32.mrf.mxu1  ;;  %v12771_v23 = vld [vmem:[#allocation3 + $0x30] sm:$0xff]  }
 0x276   : > { %v9078_v62 = vpop.f32.mrf.mxu0  ;;  %6199 = vmatmul.mubr.bf16.gmra.mxu0 %v12721_v56  ;;  %v4335_v24 = vadd.f32 %v9817_v60, %v12655_v10  ;;  %9481 = vmatpush3.bf16.msra.mxu1 %v10418_v6  ;;  %v4395_v10 = vrot.slane %v4332_v53, 2  ;;  %v4392_v48 = vrot.slane %v4324_v18, 2  ;;  %v12780_v11 = vld [vmem:[#allocation3 + $0x50] sm:$0xff]   ;;  %v10434_v60 = vld [vmem:[%s13289_s2 + $0x100] sm:$0xff]  }
 0x277   : > { %6206 = vmatprep.mubr.bf16.mxu0 %v12728_v7  ;;  %v4254_v44 = vadd.f32 %v9077_v38, %v12610_v26  ;;  %v4326_v54 = vpop.f32.mrf.mxu1  ;;  %9482 = vmatprep.subr.bf16.mxu1 %v10421_v41  ;;  %v10443_v26 = vld [vmem:[%s13289_s2 + $0x148] sm:$0xff]  }
 0x278   : > { %v9079_v36 = vpop.f32.mrf.mxu0  ;;  %9931 = vmatpush3.bf16.msra.mxu0 %v10437_v63  ;;  %v4396_v49 = vrot.slane %v4335_v24, 2  ;;  %v4327_v21 = vadd.f32 %v4326_v54, %v12624_v32  ;;  %v10427_v32 = vld [vmem:[%s13289_s2 + $0xd0] sm:$0xff]   ;;  %v10447_v54 = vld [vmem:[%s13289_s2 + $0x1f8] sm:$0xff]  }
 0x279   : > { %v9080_v30 = vadd.f32 %v9079_v36, %v9078_v62  ;;  %9932 = vmatprep.subr.bf16.mxu0 %v10440_v57  ;;  %v9820_v50 = vpop.f32.mrf.mxu1  ;;  %9915 = vmatmul.mubr.bf16.gmra.mxu1 %v12743_v46 }
 0x27a   : > { %v9081_v27 = vpop.f32.mrf.mxu0  ;;  %v4397_v34 = vsel %vm1848_vm1, %v4395_v10, %v4396_v49  ;;  %v4393_v4 = vrot.slane %v4327_v21, 2  ;;  %v4348_v19 = vadd.f32 %v9820_v50, %v4251_v51  ;;  %9918 = vmatprep.mubr.bf16.mxu1 %v12749_v5  ;;  %9483 = vmatpush3.bf16.msra.mxu1 %v10425_v17  ;;  %v12804_v50 = vld [vmem:[#allocation3 + $0x28] sm:$0xff]  }
 0x27b   : > { %v4259_v63 = vadd.f32 %v9080_v30, %v12618_v39  ;;  %v12762_v55 = vadd.f32 %v4397_v34, %v12516_v29  ;;  %v4339_v42 = vpop.f32.mrf.mxu1  ;;  %9484 = vmatprep.subr.bf16.mxu1 %v10426_v16  ;;  %v10446_v29 = vld [vmem:[%s13289_s2 + $0x140] sm:$0xff]  }
 0x27c   : > { %v9082_v28 = vpop.f32.mrf.mxu0  ;;  %9933 = vmatpush3.bf16.msra.mxu0 %v10440_v57  ;;  %v4394_v53 = vsel %vm1848_vm1, %v4392_v48, %v4393_v4  ;;  %v4340_v6 = vadd.f32 %v4339_v42, %v12677_v2  ;;  %v10433_v2 = vld [vmem:[%s13289_s2 + $0xc8] sm:$0xff]   ;;  %v4401_v62 = vrot.slane %v4348_v19, 2 }
 0x27d   : > { %v9083_v51 = vadd.f32 %v9082_v28, %v9081_v27  ;;  %9934 = vmatprep.subr.bf16.mxu0 %v10443_v26  ;;  %v12777_v39 = vadd.f32 %v4394_v53, %v12527_v0  ;;  %v9821_v33 = vpop.f32.mrf.mxu1  ;;  %v10448_v27 = vld [vmem:[%s13289_s2 + $0x238] sm:$0xff]  }
 0x27e   : > { %v9084_v41 = vpop.f32.mrf.mxu0  ;;  %6207 = vmatmul.mubr.bf16.gmra.mxu0 %v12764_v52  ;;  %v4351_v18 = vadd.f32 %v9821_v33, %v4254_v44  ;;  %9485 = vmatpush3.bf16.msra.mxu1 %v10427_v32  ;;  %v4398_v16 = vrot.slane %v4340_v6, 2  ;;  %v12810_v32 = vld [vmem:[#allocation3 + $0x38] sm:$0xff]  }
 0x27f   : > { %6214 = vmatprep.mubr.bf16.mxu0 %v12771_v23  ;;  %v4262_v38 = vadd.f32 %v9083_v51, %v12629_v59  ;;  %v4342_v57 = vpop.f32.mrf.mxu1  ;;  %9486 = vmatprep.subr.bf16.mxu1 %v10430_v22 }
 0x280   : > { %v9085_v0 = vpop.f32.mrf.mxu0  ;;  %9935 = vmatpush3.bf16.msra.mxu0 %v10443_v26  ;;  %v4402_v24 = vrot.slane %v4351_v18, 2  ;;  %v4343_v17 = vadd.f32 %v4342_v57, %v12697_v14  ;;  %v10435_v14 = vld [vmem:[%s13289_s2 + $0xc0] sm:$0xff]  }
 0x281   : > { %v9086_v44 = vadd.f32 %v9085_v0, %v9084_v41  ;;  %9936 = vmatprep.subr.bf16.mxu0 %v10446_v29  ;;  %v9824_v36 = vpop.f32.mrf.mxu1  ;;  %9919 = vmatmul.mubr.bf16.gmra.mxu1 %v12780_v11 }
 0x282   : > { %v9087_v59 = vpop.f32.mrf.mxu0  ;;  %v4403_v10 = vsel %vm1848_vm1, %v4401_v62, %v4402_v24  ;;  %v4399_v49 = vrot.slane %v4343_v17, 2  ;;  %9487 = vmatpush3.bf16.msra.mxu1 %v10433_v2  ;;  %6625 = vmatprep.mubr.bf16.mxu1 %v12620_v9  ;;  %v12823_v62 = vld [vmem:[#allocation3 + $0x30] sm:$0xff]  }
 0x283   : > { %v4267_v21 = vadd.f32 %v9086_v44, %v12642_v58  ;;  %v12802_v30 = vadd.f32 %v4403_v10, %v12544_v40  ;;  %v4355_v26 = vpop.f32.mrf.mxu1  ;;  %9488 = vmatprep.subr.bf16.mxu1 %v10434_v60 }
 0x284   : > { %v9088_v48 = vpop.f32.mrf.mxu0  ;;  %9937 = vmatpush3.bf16.msra.mxu0 %v10446_v29  ;;  %v4400_v34 = vsel %vm1848_vm1, %v4398_v16, %v4399_v49  ;;  %v4356_v4 = vadd.f32 %v4355_v26, %v4259_v63  ;;  %v10451_v63 = vld [vmem:[%s13289_s2 + $0x230] sm:$0xff]  }
 0x285   : > { %v4364_v58 = vadd.f32 %v9824_v36, %v4267_v21  ;;  %v9089_v19 = vadd.f32 %v9088_v48, %v9087_v59  ;;  %9554 = vmatprep.subr.bf16.mxu0 %v10447_v54  ;;  %v12813_v40 = vadd.f32 %v4400_v34, %v12557_v12  ;;  %v9825_v42 = vpop.f32.mrf.mxu1  ;;  %v12829_v54 = vld [vmem:[#allocation3 + $0x40] sm:$0xff]  }
 0x286   : > { %v9122_v28 = vpop.f32.mrf.mxu0  ;;  %6215 = vmatmul.mubr.bf16.gmra.mxu0 %v12804_v50  ;;  %9489 = vmatpush3.bf16.msra.mxu1 %v10435_v14  ;;  %v4404_v2 = vrot.slane %v4356_v4, 2 }
 0x287   : > { %v4270_v22 = vadd.f32 %v9089_v19, %v12663_v37  ;;  %6222 = vmatprep.mubr.bf16.mxu0 %v12810_v32  ;;  %v4358_v53 = vpop.f32.mrf.mxu1  ;;  %9954 = vmatprep.subr.bf16.mxu1 %v10448_v27  ;;  %v4407_v18 = vrot.slane %v4364_v58, 2 }
 0x288   : > { %v9123_v6 = vpop.f32.mrf.mxu0  ;;  %v4359_v29 = vadd.f32 %v4358_v53, %v4262_v38  ;;  %v10454_v38 = vld [vmem:[%s13289_s2 + $0x228] sm:$0xff]  }
 0x289   : > { %v4367_v51 = vadd.f32 %v9825_v42, %v4270_v22  ;;  %v9124_v12 = vadd.f32 %v9123_v6, %v9122_v28  ;;  %v9186_v33 = vpop.f32.mrf.mxu1  ;;  %6626 = vmatmul.mubr.bf16.vlgmr.msra.gmra.mxu1 %v12633_v3  ;;  %v12849_v42 = vld [vmem:[#allocation3 + $0x38] sm:$0xff]   ;;  %v12854_v6 = vld [vmem:[#allocation3 + $0x48] sm:$0xff]  }
 0x28a   : > { %v9125_v41 = vpop.f32.mrf.mxu0  ;;  %v4405_v37 = vrot.slane %v4359_v29, 2  ;;  %6633 = vmatprep.mubr.bf16.mxu1 %v12644_v8  ;;  %9955 = vmatpush3.bf16.msra.mxu1 %v10448_v27  ;;  %v10460_v28 = vld [vmem:[%s13289_s2 + $0x218] sm:$0xff]  }
 0x28b   : > { %v4408_v57 = vrot.slane %v4367_v51, 2  ;;  %v9187_v0 = vpop.f32.mrf.mxu1  ;;  %9956 = vmatprep.subr.bf16.mxu1 %v10451_v63 }
 0x28c   : > { %v9126_v60 = vpop.f32.mrf.mxu0  ;;  %v4406_v24 = vsel %vm1848_vm1, %v4404_v2, %v4405_v37  ;;  %v9188_v17 = vadd.f32 %v9187_v0, %v9186_v33 }
 0x28d   : > { %v9127_v44 = vadd.f32 %v9126_v60, %v9125_v41  ;;  %v4409_v36 = vsel %vm1848_vm1, %v4407_v18, %v4408_v57  ;;  %v12833_v59 = vadd.f32 %v4406_v24, %v12575_v43  ;;  %v9189_v16 = vpop.f32.mrf.mxu1  ;;  %v10457_v43 = vld [vmem:[%s13289_s2 + $0x220] sm:$0xff]   ;;  %v10463_v41 = vld [vmem:[%s13289_s2 + $0x210] sm:$0xff]  }
 0x28e   : > { %v9128_v10 = vpop.f32.mrf.mxu0  ;;  %6223 = vmatmul.mubr.bf16.gmra.mxu0 %v12823_v62  ;;  %v12837_v49 = vadd.f32 %v4409_v36, %v12568_v15  ;;  %9957 = vmatpush3.bf16.msra.mxu1 %v10451_v63  ;;  %v12840_v21 = vadd.f32 %v9188_v17, %v9124_v12  ;;  %v12867_v24 = vld [vmem:[#allocation3 + $0x40] sm:$0xff]   ;;  %v10466_v17 = vld [vmem:[%s13289_s2 + $0x208] sm:$0xff]  }
 0x28f   : > { %6230 = vmatprep.mubr.bf16.mxu0 %v12829_v54  ;;  %v9190_v14 = vpop.f32.mrf.mxu1  ;;  %9958 = vmatprep.subr.bf16.mxu1 %v10454_v38 }
 0x290   : > { %v9129_v26 = vpop.f32.mrf.mxu0  ;;  %v9191_v48 = vadd.f32 %v9190_v14, %v9189_v16 }
 0x291   : > { %v9130_v27 = vadd.f32 %v9129_v26, %v9128_v10  ;;  %v9192_v34 = vpop.f32.mrf.mxu1  ;;  %6634 = vmatmul.mubr.bf16.gmra.mxu1 %v12679_v45 }
 0x292   : > { %v9131_v58 = vpop.f32.mrf.mxu0  ;;  %6641 = vmatprep.mubr.bf16.mxu1 %v12685_v25  ;;  %9959 = vmatpush3.bf16.msra.mxu1 %v10454_v38  ;;  %v12847_v15 = vadd.f32 %v9191_v48, %v9127_v44  ;;  %v10469_v48 = vld [vmem:[%s13289_s2 + $0x200] sm:$0xff]  }
 0x293   : > { %v9193_v4 = vpop.f32.mrf.mxu1  ;;  %9960 = vmatprep.subr.bf16.mxu1 %v10457_v43 }
 0x294   : > { %v9132_v19 = vpop.f32.mrf.mxu0  ;;  %v9194_v22 = vadd.f32 %v9193_v4, %v9192_v34 }
 0x295   : > { %v9133_v53 = vadd.f32 %v9132_v19, %v9131_v58  ;;  %v9195_v63 = vpop.f32.mrf.mxu1  ;;  %v10449_v19 = vld [vmem:[%s13289_s2 + $0x1b8] sm:$0xff]  }
 0x296   : > { %v9134_v51 = vpop.f32.mrf.mxu0  ;;  %6231 = vmatmul.mubr.bf16.gmra.mxu0 %v12849_v42  ;;  %9961 = vmatpush3.bf16.msra.mxu1 %v10457_v43  ;;  %v12858_v29 = vadd.f32 %v9194_v22, %v9130_v27 }
 0x297   : > { %6238 = vmatprep.mubr.bf16.mxu0 %v12854_v6  ;;  %v9196_v12 = vpop.f32.mrf.mxu1  ;;  %9962 = vmatprep.subr.bf16.mxu1 %v10460_v28 }
 0x298   : > { %v9135_v33 = vpop.f32.mrf.mxu0  ;;  %v9197_v18 = vadd.f32 %v9196_v12, %v9195_v63  ;;  %v10450_v63 = vld [vmem:[%s13289_s2 + $0x1f0] sm:$0xff]  }
 0x299   : > { %v9136_v2 = vadd.f32 %v9135_v33, %v9134_v51  ;;  %v9198_v57 = vpop.f32.mrf.mxu1  ;;  %6642 = vmatmul.mubr.bf16.gmra.mxu1 %v12721_v56 }
 0x29a   : > { %v9137_v37 = vpop.f32.mrf.mxu0  ;;  %6649 = vmatprep.mubr.bf16.mxu1 %v12728_v7  ;;  %9963 = vmatpush3.bf16.msra.mxu1 %v10460_v28  ;;  %v12865_v0 = vadd.f32 %v9197_v18, %v9133_v53  ;;  %v10452_v18 = vld [vmem:[%s13289_s2 + $0x1b0] sm:$0xff]  }
 0x29b   : > { %v9199_v60 = vpop.f32.mrf.mxu1  ;;  %9964 = vmatprep.subr.bf16.mxu1 %v10463_v41 }
 0x29c   : > { %v9138_v38 = vpop.f32.mrf.mxu0  ;;  %v9200_v44 = vadd.f32 %v9199_v60, %v9198_v57  ;;  %v10453_v60 = vld [vmem:[%s13289_s2 + $0x1e8] sm:$0xff]  }
 0x29d   : > { %v9139_v36 = vadd.f32 %v9138_v38, %v9137_v37  ;;  %v9201_v16 = vpop.f32.mrf.mxu1 }
 0x29e   : > { %v9140_v10 = vpop.f32.mrf.mxu0  ;;  %6239 = vmatmul.mubr.bf16.gmra.mxu0 %v12867_v24  ;;  %9965 = vmatpush3.bf16.msra.mxu1 %v10463_v41  ;;  %v12874_v14 = vadd.f32 %v9200_v44, %v9136_v2 }
 0x29f   : > { %9938 = vmatprep.mubr.bf16.mxu0 %v12631_v13  ;;  %v9202_v26 = vpop.f32.mrf.mxu1  ;;  %9966 = vmatprep.subr.bf16.mxu1 %v10466_v17 }
 0x2a0   : > { %v9141_v43 = vpop.f32.mrf.mxu0  ;;  %v9203_v27 = vadd.f32 %v9202_v26, %v9201_v16  ;;  %v10455_v16 = vld [vmem:[%s13289_s2 + $0x1a8] sm:$0xff]  }
 0x2a1   : > { %v9142_v34 = vadd.f32 %v9141_v43, %v9140_v10  ;;  %v9204_v58 = vpop.f32.mrf.mxu1  ;;  %6650 = vmatmul.mubr.bf16.gmra.mxu1 %v12764_v52 }
 0x2a2   : > { %v9143_v4 = vpop.f32.mrf.mxu0  ;;  %6657 = vmatprep.mubr.bf16.mxu1 %v12771_v23  ;;  %9967 = vmatpush3.bf16.msra.mxu1 %v10466_v17  ;;  %v12884_v28 = vadd.f32 %v9203_v27, %v9139_v36 }
 0x2a3   : > { %v9205_v22 = vpop.f32.mrf.mxu1  ;;  %9968 = vmatprep.subr.bf16.mxu1 %v10469_v48 }
 0x2a4   : > { %v9144_v53 = vpop.f32.mrf.mxu0  ;;  %v9206_v51 = vadd.f32 %v9205_v22, %v9204_v58 }
 0x2a5   : > { %v9145_v12 = vadd.f32 %v9144_v53, %v9143_v4  ;;  %v9207_v33 = vpop.f32.mrf.mxu1 }
 0x2a6   : > { %v9146_v41 = vpop.f32.mrf.mxu0  ;;  %9939 = vmatmul.mubr.bf16.vlgmr.msra.gmra.mxu0 %v12657_v20  ;;  %v12894_v2 = vadd.f32 %v9206_v51, %v9142_v34  ;;  %9969 = vmatpush3.bf16.msra.mxu1 %v10469_v48  ;;  %v10456_v48 = vld [vmem:[%s13289_s2 + $0x1e0] sm:$0xff]   ;;  %v10459_v51 = vld [vmem:[%s13289_s2 + $0x1d8] sm:$0xff]  }
 0x2a7   : > { %9942 = vmatprep.mubr.bf16.mxu0 %v12665_v31  ;;  %9555 = vmatpush3.bf16.msra.mxu0 %v10449_v19  ;;  %v9208_v57 = vpop.f32.mrf.mxu1  ;;  %v10458_v19 = vld [vmem:[%s13289_s2 + $0x1a0] sm:$0xff]  }
 0x2a8   : > { %v9147_v37 = vpop.f32.mrf.mxu0  ;;  %9556 = vmatprep.subr.bf16.mxu0 %v10450_v63  ;;  %v9209_v38 = vadd.f32 %v9208_v57, %v9207_v33  ;;  %v10461_v57 = vld [vmem:[%s13289_s2 + $0x198] sm:$0xff]  }
 0x2a9   : > { %v9148_v17 = vadd.f32 %v9147_v37, %v9146_v41  ;;  %v9210_v44 = vpop.f32.mrf.mxu1  ;;  %6658 = vmatmul.mubr.bf16.gmra.mxu1 %v12804_v50 }
 0x2aa   : > { %v9149_v36 = vpop.f32.mrf.mxu0  ;;  %6665 = vmatprep.mubr.bf16.mxu1 %v12810_v32  ;;  %v12904_v10 = vadd.f32 %v9209_v38, %v9145_v12 }
 0x2ab   : > { %9557 = vmatpush3.bf16.msra.mxu0 %v10452_v18  ;;  %v9211_v26 = vpop.f32.mrf.mxu1 }
 0x2ac   : > { %v9150_v43 = vpop.f32.mrf.mxu0  ;;  %9558 = vmatprep.subr.bf16.mxu0 %v10453_v60  ;;  %v9212_v27 = vadd.f32 %v9211_v26, %v9210_v44 }
 0x2ad   : > { %v9151_v34 = vadd.f32 %v9150_v43, %v9149_v36  ;;  %v9213_v58 = vpop.f32.mrf.mxu1  ;;  %v10464_v43 = vld [vmem:[%s13289_s2 + $0x190] sm:$0xff]  }
 0x2ae   : > { %v9152_v4 = vpop.f32.mrf.mxu0  ;;  %9943 = vmatmul.mubr.bf16.gmra.mxu0 %v12699_v1  ;;  %v12914_v22 = vadd.f32 %v9212_v27, %v9148_v17  ;;  %v10462_v17 = vld [vmem:[%s13289_s2 + $0x1d0] sm:$0xff]  }
 0x2af   : > { %9946 = vmatprep.mubr.bf16.mxu0 %v12705_v35  ;;  %9559 = vmatpush3.bf16.msra.mxu0 %v10455_v16  ;;  %v9214_v53 = vpop.f32.mrf.mxu1 }
 0x2b0   : > { %v9153_v63 = vpop.f32.mrf.mxu0  ;;  %9560 = vmatprep.subr.bf16.mxu0 %v10456_v48  ;;  %v9215_v12 = vadd.f32 %v9214_v53, %v9213_v58  ;;  %v10465_v58 = vld [vmem:[%s13289_s2 + $0x1c8] sm:$0xff]  }
 0x2b1   : > { %v9154_v33 = vadd.f32 %v9153_v63, %v9152_v4  ;;  %v9216_v41 = vpop.f32.mrf.mxu1  ;;  %6666 = vmatmul.mubr.bf16.gmra.mxu1 %v12823_v62 }
 0x2b2   : > { %v9155_v18 = vpop.f32.mrf.mxu0  ;;  %6673 = vmatprep.mubr.bf16.mxu1 %v12829_v54  ;;  %v12924_v37 = vadd.f32 %v9215_v12, %v9151_v34 }
 0x2b3   : > { %9561 = vmatpush3.bf16.msra.mxu0 %v10458_v19  ;;  %v9217_v60 = vpop.f32.mrf.mxu1 }
 0x2b4   : > { %v9156_v38 = vpop.f32.mrf.mxu0  ;;  %9562 = vmatprep.subr.bf16.mxu0 %v10459_v51  ;;  %v9218_v44 = vadd.f32 %v9217_v60, %v9216_v41  ;;  %v10467_v51 = vld [vmem:[%s13289_s2 + $0x188] sm:$0xff]  }
 0x2b5   : > { %v9157_v36 = vadd.f32 %v9156_v38, %v9155_v18  ;;  %v9219_v16 = vpop.f32.mrf.mxu1  ;;  %v10468_v18 = vld [vmem:[%s13289_s2 + $0x1c0] sm:$0xff]  }
 0x2b6   : > { %v9158_v26 = vpop.f32.mrf.mxu0  ;;  %9947 = vmatmul.mubr.bf16.gmra.mxu0 %v12743_v46  ;;  %v12934_v48 = vadd.f32 %v9218_v44, %v9154_v33  ;;  %v10470_v44 = vld [vmem:[%s13289_s2 + $0x180] sm:$0xff]  }
 0x2b7   : > { %9950 = vmatprep.mubr.bf16.mxu0 %v12749_v5  ;;  %9563 = vmatpush3.bf16.msra.mxu0 %v10461_v57  ;;  %v9220_v27 = vpop.f32.mrf.mxu1 }
 0x2b8   : > { %v9159_v34 = vpop.f32.mrf.mxu0  ;;  %9564 = vmatprep.subr.bf16.mxu0 %v10462_v17  ;;  %v9221_v4 = vadd.f32 %v9220_v27, %v9219_v16 }
 0x2b9   : > { %v9160_v19 = vadd.f32 %v9159_v34, %v9158_v26  ;;  %v9222_v53 = vpop.f32.mrf.mxu1  ;;  %6674 = vmatmul.mubr.bf16.gmra.mxu1 %v12849_v42 }
 0x2ba   : > { %v9161_v63 = vpop.f32.mrf.mxu0  ;;  %6681 = vmatprep.mubr.bf16.mxu1 %v12854_v6  ;;  %v12944_v12 = vadd.f32 %v9221_v4, %v9157_v36 }
 0x2bb   : > { %9565 = vmatpush3.bf16.msra.mxu0 %v10464_v43  ;;  %v9223_v33 = vpop.f32.mrf.mxu1 }
 0x2bc   : > { %v9162_v41 = vpop.f32.mrf.mxu0  ;;  %9566 = vmatprep.subr.bf16.mxu0 %v10465_v58  ;;  %v9224_v57 = vadd.f32 %v9223_v33, %v9222_v53 }
 0x2bd   : > { %v9163_v60 = vadd.f32 %v9162_v41, %v9161_v63  ;;  %v9225_v38 = vpop.f32.mrf.mxu1 }
 0x2be   : > { %v9164_v17 = vpop.f32.mrf.mxu0  ;;  %9951 = vmatmul.mubr.bf16.gmra.mxu0 %v12780_v11  ;;  %v12954_v36 = vadd.f32 %v9224_v57, %v9160_v19 }
 0x2bf   : > { %9567 = vmatpush3.bf16.msra.mxu0 %v10467_v51  ;;  %7068 = vmatprep.mubr.bf16.mxu0 %v12620_v9  ;;  %v9226_v16 = vpop.f32.mrf.mxu1 }
 0x2c0   : > { %v9165_v26 = vpop.f32.mrf.mxu0  ;;  %9568 = vmatprep.subr.bf16.mxu0 %v10468_v18  ;;  %v9227_v43 = vadd.f32 %v9226_v16, %v9225_v38 }
 0x2c1   : > { %v9166_v27 = vadd.f32 %v9165_v26, %v9164_v17  ;;  %v9228_v34 = vpop.f32.mrf.mxu1  ;;  %6682 = vmatmul.mubr.bf16.gmra.mxu1 %v12867_v24 }
 0x2c2   : > { %v9167_v58 = vpop.f32.mrf.mxu0  ;;  %9970 = vmatprep.mubr.bf16.mxu1 %v12631_v13  ;;  %v12958_v4 = vadd.f32 %v9227_v43, %v9163_v60 }
 0x2c3   : > { %9569 = vmatpush3.bf16.msra.mxu0 %v10470_v44  ;;  %v9229_v9 = vpop.f32.mrf.mxu1 }
 0x2c4   : > { %v9168_v53 = vpop.f32.mrf.mxu0  ;;  %v9230_v63 = vadd.f32 %v9229_v9, %v9228_v34 }
 0x2c5   : > { %v9169_v51 = vadd.f32 %v9168_v53, %v9167_v58  ;;  %v9231_v19 = vpop.f32.mrf.mxu1 }
 0x2c6   : > { %v9844_v33 = vpop.f32.mrf.mxu0  ;;  %7069 = vmatmul.mubr.bf16.vlgmr.msra.gmra.mxu0 %v12633_v3  ;;  %v12963_v18 = vadd.f32 %v9230_v63, %v9166_v27 }
 0x2c7   : > { %v4984_v41 = vadd.f32 %v9844_v33, %v12858_v29  ;;  %7076 = vmatprep.mubr.bf16.mxu0 %v12644_v8  ;;  %v9232_v57 = vpop.f32.mrf.mxu1 }
 0x2c8   : > { %v4975_v38 = vpop.f32.mrf.mxu0  ;;  %v9233_v13 = vadd.f32 %v9232_v57, %v9231_v19 }
 0x2c9   : > { %v4976_v60 = vadd.f32 %v4975_v38, %v12840_v21  ;;  %v9266_v17 = vpop.f32.mrf.mxu1  ;;  %9971 = vmatmul.mubr.bf16.vlgmr.msra.gmra.mxu1 %v12657_v20  ;;  %v5058_v26 = vrot.slane %v4984_v41, 3 }
 0x2ca   : > { %v9845_v44 = vpop.f32.mrf.mxu0  ;;  %9974 = vmatprep.mubr.bf16.mxu1 %v12665_v31  ;;  %v12969_v3 = vadd.f32 %v9233_v13, %v9169_v51 }
 0x2cb   : > { %v4987_v16 = vadd.f32 %v9845_v44, %v12865_v0  ;;  %v9267_v29 = vpop.f32.mrf.mxu1  ;;  %v5055_v20 = vrot.slane %v4976_v60, 3 }
 0x2cc   : > { %v4978_v8 = vpop.f32.mrf.mxu0  ;;  %v12971_v43 = vadd.f32 %v9267_v29, %v9266_v17 }
 0x2cd   : > { %v5059_v27 = vrot.slane %v4987_v16, 3  ;;  %v4979_v34 = vadd.f32 %v4978_v8, %v12847_v15  ;;  %v9269_v21 = vpop.f32.mrf.mxu1 }
 0x2ce   : > { %v9848_v58 = vpop.f32.mrf.mxu0  ;;  %7077 = vmatmul.mubr.bf16.gmra.mxu0 %v12679_v45 }
 0x2cf   : > { %v5060_v31 = vsel %vm5054_vm7, %v5058_v26, %v5059_v27  ;;  %v5056_v9 = vrot.slane %v4979_v34, 3  ;;  %v5000_v0 = vadd.f32 %v9848_v58, %v12894_v2  ;;  %7084 = vmatprep.mubr.bf16.mxu0 %v12685_v25  ;;  %v9270_v63 = vpop.f32.mrf.mxu1 }
 0x2d0   : > { %v12979_v53 = vadd.f32 %v5060_v31, %v12719_v61  ;;  %v4991_v51 = vpop.f32.mrf.mxu0  ;;  %v12982_v15 = vadd.f32 %v9270_v63, %v9269_v21 }
 0x2d1   : > { %v5057_v19 = vsel %vm5054_vm7, %v5055_v20, %v5056_v9  ;;  %v4992_v33 = vadd.f32 %v4991_v51, %v12874_v14  ;;  %v9272_v41 = vpop.f32.mrf.mxu1  ;;  %9975 = vmatmul.mubr.bf16.gmra.mxu1 %v12699_v1  ;;  %v5064_v38 = vrot.slane %v5000_v0, 3 }
 0x2d2   : > { %v12986_v45 = vadd.f32 %v5057_v19, %v12734_v47  ;;  %v9849_v2 = vpop.f32.mrf.mxu0  ;;  %9978 = vmatprep.mubr.bf16.mxu1 %v12705_v35 }
 0x2d3   : > { %v5003_v25 = vadd.f32 %v9849_v2, %v12904_v10  ;;  %v9273_v61 = vpop.f32.mrf.mxu1  ;;  %v5061_v47 = vrot.slane %v4992_v33, 3 }
 0x2d4   : > { %v4994_v57 = vpop.f32.mrf.mxu0  ;;  %v12991_v13 = vadd.f32 %v9273_v61, %v9272_v41 }
 0x2d5   : > { %v5065_v60 = vrot.slane %v5003_v25, 3  ;;  %v4995_v17 = vadd.f32 %v4994_v57, %v12884_v28  ;;  %v9275_v14 = vpop.f32.mrf.mxu1 }
 0x2d6   : > { %v9852_v44 = vpop.f32.mrf.mxu0  ;;  %7085 = vmatmul.mubr.bf16.gmra.mxu0 %v12721_v56 }
 0x2d7   : > { %v5066_v1 = vsel %vm5054_vm7, %v5064_v38, %v5065_v60  ;;  %v5062_v16 = vrot.slane %v4995_v17, 3  ;;  %v5016_v35 = vadd.f32 %v9852_v44, %v12934_v48  ;;  %7092 = vmatprep.mubr.bf16.mxu0 %v12728_v7  ;;  %v9276_v29 = vpop.f32.mrf.mxu1 }
 0x2d8   : > { %v12999_v10 = vadd.f32 %v5066_v1, %v12762_v55  ;;  %v5007_v8 = vpop.f32.mrf.mxu0  ;;  %v13002_v28 = vadd.f32 %v9276_v29, %v9275_v14 }
 0x2d9   : > { %v5063_v26 = vsel %vm5054_vm7, %v5061_v47, %v5062_v16  ;;  %v5008_v27 = vadd.f32 %v5007_v8, %v12914_v22  ;;  %v9278_v34 = vpop.f32.mrf.mxu1  ;;  %9979 = vmatmul.mubr.bf16.gmra.mxu1 %v12743_v46  ;;  %v5070_v58 = vrot.slane %v5016_v35, 3 }
 0x2da   : > { %v13006_v56 = vadd.f32 %v5063_v26, %v12777_v39  ;;  %v9853_v48 = vpop.f32.mrf.mxu0  ;;  %9982 = vmatprep.mubr.bf16.mxu1 %v12749_v5 }
 0x2db   : > { %v5019_v7 = vadd.f32 %v9853_v48, %v12944_v12  ;;  %v9279_v55 = vpop.f32.mrf.mxu1  ;;  %v5067_v39 = vrot.slane %v5008_v27, 3 }
 0x2dc   : > { %v5010_v21 = vpop.f32.mrf.mxu0  ;;  %v13011_v20 = vadd.f32 %v9279_v55, %v9278_v34 }
 0x2dd   : > { %v5071_v31 = vrot.slane %v5019_v7, 3  ;;  %v5011_v9 = vadd.f32 %v5010_v21, %v12924_v37  ;;  %v9281_v22 = vpop.f32.mrf.mxu1 }
 0x2de   : > { %v9856_v0 = vpop.f32.mrf.mxu0  ;;  %7093 = vmatmul.mubr.bf16.gmra.mxu0 %v12764_v52 }
 0x2df   : > { %v5072_v46 = vsel %vm5054_vm7, %v5070_v58, %v5071_v31  ;;  %v5068_v63 = vrot.slane %v5011_v9, 3  ;;  %v5032_v5 = vadd.f32 %v9856_v0, %v12963_v18  ;;  %7100 = vmatprep.mubr.bf16.mxu0 %v12771_v23  ;;  %v9282_v51 = vpop.f32.mrf.mxu1 }
 0x2e0   : > { %v13019_v12 = vadd.f32 %v5072_v46, %v12802_v30  ;;  %v5023_v19 = vpop.f32.mrf.mxu0  ;;  %v13022_v37 = vadd.f32 %v9282_v51, %v9281_v22 }
 0x2e1   : > { %v5069_v33 = vsel %vm5054_vm7, %v5067_v39, %v5068_v63  ;;  %v5024_v41 = vadd.f32 %v5023_v19, %v12954_v36  ;;  %v9284_v2 = vpop.f32.mrf.mxu1  ;;  %9983 = vmatmul.mubr.bf16.gmra.mxu1 %v12780_v11  ;;  %v5076_v61 = vrot.slane %v5032_v5, 3 }
 0x2e2   : > { %v13026_v52 = vadd.f32 %v5069_v33, %v12813_v40  ;;  %v9857_v25 = vpop.f32.mrf.mxu0 }
 0x2e3   : > { %v5035_v23 = vadd.f32 %v9857_v25, %v12969_v3  ;;  %v9285_v18 = vpop.f32.mrf.mxu1  ;;  %v5073_v40 = vrot.slane %v5024_v41, 3 }
 0x2e4   : > { %v5026_v30 = vpop.f32.mrf.mxu0  ;;  %v13030_v57 = vadd.f32 %v9285_v18, %v9284_v2 }
 0x2e5   : > { %v5077_v38 = vrot.slane %v5035_v23, 3  ;;  %v5027_v60 = vadd.f32 %v5026_v30, %v12958_v4  ;;  %v9287_v17 = vpop.f32.mrf.mxu1 }
 0x2e6   : > { %v9330_v14 = vpop.f32.mrf.mxu0  ;;  %7101 = vmatmul.mubr.bf16.gmra.mxu0 %v12804_v50 }
 0x2e7   : > { %v5078_v36 = vsel %vm5054_vm7, %v5076_v61, %v5077_v38  ;;  %v5074_v44 = vrot.slane %v5027_v60, 3  ;;  %7108 = vmatprep.mubr.bf16.mxu0 %v12810_v32  ;;  %v9288_v3 = vpop.f32.mrf.mxu1 }
 0x2e8   : > { %v13037_v11 = vadd.f32 %v5078_v36, %v12837_v49  ;;  %v9331_v47 = vpop.f32.mrf.mxu0  ;;  %v9289_v16 = vadd.f32 %v9288_v3, %v9287_v17 }
 0x2e9   : > { %v5075_v1 = vsel %vm5054_vm7, %v5073_v40, %v5074_v44  ;;  %v9332_v35 = vadd.f32 %v9331_v47, %v9330_v14  ;;  %v9290_v29 = vpop.f32.mrf.mxu1 }
 0x2ea   : > { %v13041_v4 = vadd.f32 %v5075_v1, %v12833_v59  ;;  %v9333_v50 = vpop.f32.mrf.mxu0 }
 0x2eb   : > { %v13044_v8 = vadd.f32 %v9332_v35, %v12971_v43  ;;  %v9291_v26 = vpop.f32.mrf.mxu1 }
 0x2ec   : > { %v9334_v27 = vpop.f32.mrf.mxu0  ;;  %v9292_v32 = vadd.f32 %v9291_v26, %v9290_v29 }
 0x2ed   : > { %v9335_v34 = vadd.f32 %v9334_v27, %v9333_v50  ;;  %v9293_v49 = vpop.f32.mrf.mxu1 }
 0x2ee   : > { %v9336_v48 = vpop.f32.mrf.mxu0  ;;  %7109 = vmatmul.mubr.bf16.gmra.mxu0 %v12823_v62 }
 0x2ef   : > { %7116 = vmatprep.mubr.bf16.mxu0 %v12829_v54  ;;  %v13049_v7 = vadd.f32 %v9335_v34, %v12982_v15  ;;  %v9294_v59 = vpop.f32.mrf.mxu1 }
 0x2f0   : > { %v9337_v55 = vpop.f32.mrf.mxu0  ;;  %v9295_v21 = vadd.f32 %v9294_v59, %v9293_v49 }
 0x2f1   : > { %v9338_v58 = vadd.f32 %v9337_v55, %v9336_v48  ;;  %v9296_v31 = vpop.f32.mrf.mxu1 }
 0x2f2   : > { %v9339_v43 = vpop.f32.mrf.mxu0 }
 0x2f3   : > { %v5556_v9 = vadd.f32 %v9338_v58, %v12991_v13  ;;  %v9297_v22 = vpop.f32.mrf.mxu1 }
 0x2f4   : > { %v9340_v0 = vpop.f32.mrf.mxu0  ;;  %v13052_v39 = vadd.f32 %v9297_v22, %v9296_v31 }
 0x2f5   : > { %v9341_v46 = vadd.f32 %v9340_v0, %v9339_v43  ;;  %v9299_v63 = vpop.f32.mrf.mxu1 }
 0x2f6   : > { %v9342_v62 = vpop.f32.mrf.mxu0  ;;  %7117 = vmatmul.mubr.bf16.gmra.mxu0 %v12849_v42 }
 0x2f7   : > { %7124 = vmatprep.mubr.bf16.mxu0 %v12854_v6  ;;  %v5559_v54 = vadd.f32 %v9341_v46, %v13002_v28  ;;  %v9300_v15 = vpop.f32.mrf.mxu1 }
 0x2f8   : > { %v9343_v5 = vpop.f32.mrf.mxu0  ;;  %v13057_v51 = vadd.f32 %v9300_v15, %v9299_v63 }
 0x2f9   : > { %v9344_v19 = vadd.f32 %v9343_v5, %v9342_v62  ;;  %v9302_v33 = vpop.f32.mrf.mxu1 }
 0x2fa   : > { %v9345_v13 = vpop.f32.mrf.mxu0 }
 0x2fb   : > { %v5564_v41 = vadd.f32 %v9344_v19, %v13011_v20  ;;  %v9303_v2 = vpop.f32.mrf.mxu1 }
 0x2fc   : > { %v9346_v25 = vpop.f32.mrf.mxu0  ;;  %v13060_v23 = vadd.f32 %v9303_v2, %v9302_v33 }
 0x2fd   : > { %v9347_v18 = vadd.f32 %v9346_v25, %v9345_v13  ;;  %v9305_v30 = vpop.f32.mrf.mxu1 }
 0x2fe   : > { %v9348_v42 = vpop.f32.mrf.mxu0  ;;  %7125 = vmatmul.mubr.bf16.gmra.mxu0 %v12867_v24 }
 0x2ff   : > { %v5567_v6 = vadd.f32 %v9347_v18, %v13022_v37  ;;  %v9306_v28 = vpop.f32.mrf.mxu1 }
 0x300   : > { %v9349_v61 = vpop.f32.mrf.mxu0  ;;  %v13064_v38 = vadd.f32 %v9306_v28, %v9305_v30 }
 0x301   : > { %v9350_v60 = vadd.f32 %v9349_v61, %v9348_v42  ;;  %v9308_v17 = vpop.f32.mrf.mxu1 }
 0x302   : > { %v9351_v14 = vpop.f32.mrf.mxu0 }
 0x303   : > { %v5572_v20 = vadd.f32 %v9350_v60, %v13030_v57  ;;  %v9309_v40 = vpop.f32.mrf.mxu1 }
 0x304   : > { %v9352_v36 = vpop.f32.mrf.mxu0  ;;  %v13067_v44 = vadd.f32 %v9309_v40, %v9308_v17 }
 0x305   : > { %v9353_v3 = vadd.f32 %v9352_v36, %v9351_v14  ;;  %v9311_v47 = vpop.f32.mrf.mxu1 }
 0x306   : > { %v9354_v1 = vpop.f32.mrf.mxu0 }
 0x307   : > { %v5575_v35 = vadd.f32 %v9353_v3, %v9289_v16  ;;  %v9312_v24 = vpop.f32.mrf.mxu1 }
 0x308   : > { %v9355_v29 = vpop.f32.mrf.mxu0  ;;  %v13069_v37 = vadd.f32 %v9312_v24, %v9311_v47 }
 0x309   : > { %v9356_v50 = vadd.f32 %v9355_v29, %v9354_v1  ;;  %v9876_v26 = vpop.f32.mrf.mxu1 }
 0x30a   : > { %v9357_v27 = vpop.f32.mrf.mxu0  ;;  %v5653_v34 = vadd.f32 %v9876_v26, %v5556_v9 }
 0x30b   : > { %v5580_v49 = vadd.f32 %v9356_v50, %v9292_v32  ;;  %v5644_v48 = vpop.f32.mrf.mxu1 }
 0x30c   : > { %v9358_v59 = vpop.f32.mrf.mxu0  ;;  %v5645_v57 = vadd.f32 %v5644_v48, %v13044_v8  ;;  %v5727_v46 = vrot.slane %v5653_v34, 4 }
 0x30d   : > { %v9359_v55 = vadd.f32 %v9358_v59, %v9357_v27  ;;  %v9877_v58 = vpop.f32.mrf.mxu1 }
 0x30e   : > { %v9360_v31 = vpop.f32.mrf.mxu0  ;;  %v5656_v43 = vadd.f32 %v9877_v58, %v5559_v54  ;;  %v5724_v5 = vrot.slane %v5645_v57, 4 }
 0x30f   : > { %v5583_v22 = vadd.f32 %v9359_v55, %v9295_v21  ;;  %v5647_v16 = vpop.f32.mrf.mxu1 }
 0x310   : > { %v9361_v0 = vpop.f32.mrf.mxu0  ;;  %v5728_v63 = vrot.slane %v5656_v43, 4  ;;  %v5648_v62 = vadd.f32 %v5647_v16, %v13049_v7 }
 0x311   : > { %v9362_v15 = vadd.f32 %v9361_v0, %v9360_v31  ;;  %v9880_v9 = vpop.f32.mrf.mxu1 }
 0x312   : > { %v9363_v32 = vpop.f32.mrf.mxu0  ;;  %v5729_v19 = vsel %vm5723_vm8, %v5727_v46, %v5728_v63  ;;  %v5725_v33 = vrot.slane %v5648_v62, 4  ;;  %v5669_v8 = vadd.f32 %v9880_v9, %v5572_v20 }
 0x313   : > { %v5588_v13 = vadd.f32 %v9362_v15, %v13052_v39  ;;  %v13076_v54 = vadd.f32 %v5729_v19, %v12979_v53  ;;  %v5660_v21 = vpop.f32.mrf.mxu1 }
 0x314   : > { %v9364_v2 = vpop.f32.mrf.mxu0  ;;  %v5726_v25 = vsel %vm5723_vm8, %v5724_v5, %v5725_v33  ;;  %v5661_v18 = vadd.f32 %v5660_v21, %v5564_v41  ;;  %v5733_v39 = vrot.slane %v5669_v8, 4 }
 0x315   : > { %v9365_v30 = vadd.f32 %v9364_v2, %v9363_v32  ;;  %v13080_v7 = vadd.f32 %v5726_v25, %v12986_v45  ;;  %v9881_v42 = vpop.f32.mrf.mxu1 }
 0x316   : > { %v9366_v28 = vpop.f32.mrf.mxu0  ;;  %v5672_v61 = vadd.f32 %v9881_v42, %v5575_v35  ;;  %v5730_v36 = vrot.slane %v5661_v18, 4 }
 0x317   : > { %v5591_v60 = vadd.f32 %v9365_v30, %v13057_v51  ;;  %v5663_v17 = vpop.f32.mrf.mxu1 }
 0x318   : > { %v9367_v14 = vpop.f32.mrf.mxu0  ;;  %v5734_v20 = vrot.slane %v5672_v61, 4  ;;  %v5664_v53 = vadd.f32 %v5663_v17, %v5567_v6 }
 0x319   : > { %v9368_v40 = vadd.f32 %v9367_v14, %v9366_v28  ;;  %v9884_v3 = vpop.f32.mrf.mxu1 }
 0x31a   : > { %v9369_v47 = vpop.f32.mrf.mxu0  ;;  %v5735_v41 = vsel %vm5723_vm8, %v5733_v39, %v5734_v20  ;;  %v5731_v1 = vrot.slane %v5664_v53, 4  ;;  %v5685_v24 = vadd.f32 %v9884_v3, %v5588_v13 }
 0x31b   : > { %v5596_v45 = vadd.f32 %v9368_v40, %v13060_v23  ;;  %v13086_v29 = vadd.f32 %v5735_v41, %v12999_v10  ;;  %v5676_v35 = vpop.f32.mrf.mxu1 }
 0x31c   : > { %v9370_v51 = vpop.f32.mrf.mxu0  ;;  %v5732_v50 = vsel %vm5723_vm8, %v5730_v36, %v5731_v1  ;;  %v5677_v26 = vadd.f32 %v5676_v35, %v5580_v49  ;;  %v5739_v23 = vrot.slane %v5685_v24, 4 }
 0x31d   : > { %v9371_v27 = vadd.f32 %v9370_v51, %v9369_v47  ;;  %v13090_v6 = vadd.f32 %v5732_v50, %v13006_v56  ;;  %v9885_v34 = vpop.f32.mrf.mxu1 }
 0x31e   : > { %v9372_v48 = vpop.f32.mrf.mxu0  ;;  %v5688_v59 = vadd.f32 %v9885_v34, %v5591_v60  ;;  %v5736_v46 = vrot.slane %v5677_v26, 4 }
 0x31f   : > { %v5599_v57 = vadd.f32 %v9371_v27, %v13064_v38  ;;  %v5679_v55 = vpop.f32.mrf.mxu1 }
 0x320   : > { %v9373_v58 = vpop.f32.mrf.mxu0  ;;  %v5740_v31 = vrot.slane %v5688_v59, 4  ;;  %v5680_v10 = vadd.f32 %v5679_v55, %v5583_v22 }
 0x321   : > { %v9374_v43 = vadd.f32 %v9373_v58, %v9372_v48  ;;  %v9888_v16 = vpop.f32.mrf.mxu1 }
 0x322   : > { %v9375_v0 = vpop.f32.mrf.mxu0  ;;  %v5741_v49 = vsel %vm5723_vm8, %v5739_v23, %v5740_v31  ;;  %v5737_v63 = vrot.slane %v5680_v10, 4 }
 0x323   : > { %v5604_v56 = vadd.f32 %v9374_v43, %v13067_v44  ;;  %v13096_v62 = vadd.f32 %v5741_v49, %v13019_v12  ;;  %v5692_v15 = vpop.f32.mrf.mxu1 }
 0x324   : > { %v9376_v5 = vpop.f32.mrf.mxu0  ;;  %v5738_v38 = vsel %vm5723_vm8, %v5736_v46, %v5737_v63  ;;  %v5693_v32 = vadd.f32 %v5692_v15, %v5596_v45 }
 0x325   : > { %v5701_v9 = vadd.f32 %v9888_v16, %v5604_v56  ;;  %v9377_v19 = vadd.f32 %v9376_v5, %v9375_v0  ;;  %v13100_v22 = vadd.f32 %v5738_v38, %v13026_v52  ;;  %v9889_v33 = vpop.f32.mrf.mxu1 }
 0x326   : > { %v9410_v8 = vpop.f32.mrf.mxu0  ;;  %v5742_v28 = vrot.slane %v5693_v32, 4 }
 0x327   : > { %v5607_v13 = vadd.f32 %v9377_v19, %v13069_v37  ;;  %v5695_v21 = vpop.f32.mrf.mxu1  ;;  %v5745_v42 = vrot.slane %v5701_v9, 4 }
 0x328   : > { %v9411_v2 = vpop.f32.mrf.mxu0  ;;  %v5696_v25 = vadd.f32 %v5695_v21, %v5599_v57 }
 0x329   : > { %v5704_v44 = vadd.f32 %v9889_v33, %v5607_v13  ;;  %v9412_v12 = vadd.f32 %v9411_v2, %v9410_v8  ;;  %v9908_v18 = vpop.f32.mrf.mxu1 }
 0x32a   : > { %v9413_v30 = vpop.f32.mrf.mxu0  ;;  %v5743_v60 = vrot.slane %v5696_v25, 4 }
 0x32b   : > { %v5746_v61 = vrot.slane %v5704_v44, 4  ;;  %v6281_v17 = vpop.f32.mrf.mxu1 }
 0x32c   : > { %v9414_v14 = vpop.f32.mrf.mxu0  ;;  %v5744_v39 = vsel %vm5723_vm8, %v5742_v28, %v5743_v60  ;;  %v6282_v20 = vadd.f32 %v9412_v12, %v6281_v17 }
 0x32d   : > { %v5747_v52 = vsel %vm5723_vm8, %v5745_v42, %v5746_v61  ;;  %v9415_v53 = vadd.f32 %v9414_v14, %v9413_v30  ;;  %v13106_v37 = vadd.f32 %v5744_v39, %v13041_v4  ;;  %v9909_v40 = vpop.f32.mrf.mxu1 }
 0x32e   : > { %v9416_v36 = vpop.f32.mrf.mxu0  ;;  %v13109_v3 = vadd.f32 %v5747_v52, %v13037_v11  ;;  %v6360_v51 = vrot.slane %v6282_v20, 1 }
 0x32f   : > { %v6284_v47 = vpop.f32.mrf.mxu1 }
 0x330   : > { %v9417_v41 = vpop.f32.mrf.mxu0  ;;  %v6285_v1 = vadd.f32 %v9415_v53, %v6284_v47 }
 0x331   : > { %v9418_v24 = vadd.f32 %v9417_v41, %v9416_v36  ;;  %v9912_v45 = vpop.f32.mrf.mxu1 }
 0x332   : > { %v9419_v35 = vpop.f32.mrf.mxu0  ;;  %v6361_v50 = vrot.slane %v6285_v1, 1 }
 0x333   : > { %v6290_v26 = vadd.f32 %v9908_v18, %v9418_v24  ;;  %v6297_v27 = vpop.f32.mrf.mxu1 }
 0x334   : > { %v9420_v34 = vpop.f32.mrf.mxu0  ;;  %v6362_v48 = vsel %vm1388_vm0, %v6360_v51, %v6361_v50 }
 0x335   : > { %v9421_v4 = vadd.f32 %v9420_v34, %v9419_v35  ;;  %v13113_v59 = vadd.f32 %v6362_v48, %v13080_v7  ;;  %v9913_v57 = vpop.f32.mrf.mxu1  ;;  %v6363_v31 = vrot.slane %v6290_v26, 1 }
 0x336   : > { %v9422_v11 = vpop.f32.mrf.mxu0 }
 0x337   : > { %v6293_v55 = vadd.f32 %v9909_v40, %v9421_v4  ;;  %v6300_v58 = vpop.f32.mrf.mxu1 }
 0x338   : > { %v9423_v23 = vpop.f32.mrf.mxu0 }
 0x339   : > { %v6364_v10 = vrot.slane %v6293_v55, 1  ;;  %v9424_v43 = vadd.f32 %v9423_v23, %v9422_v11  ;;  %v9916_v16 = vpop.f32.mrf.mxu1 }
 0x33a   : > { %v9425_v0 = vpop.f32.mrf.mxu0 }
 0x33b   : > { %v6365_v46 = vsel %vm1388_vm0, %v6363_v31, %v6364_v10  ;;  %v6298_v49 = vadd.f32 %v9424_v43, %v6297_v27  ;;  %v6313_v63 = vpop.f32.mrf.mxu1 }
 0x33c   : > { %v9426_v56 = vpop.f32.mrf.mxu0  ;;  %v13117_v15 = vadd.f32 %v6365_v46, %v13076_v54 }
 0x33d   : > { %v9427_v7 = vadd.f32 %v9426_v56, %v9425_v0  ;;  %v9917_v5 = vpop.f32.mrf.mxu1  ;;  %v6366_v33 = vrot.slane %v6298_v49, 1 }
 0x33e   : > { %v9428_v38 = vpop.f32.mrf.mxu0 }
 0x33f   : > { %v6301_v9 = vadd.f32 %v9427_v7, %v6300_v58  ;;  %v6316_v32 = vpop.f32.mrf.mxu1 }
 0x340   : > { %v9429_v19 = vpop.f32.mrf.mxu0 }
 0x341   : > { %v6367_v8 = vrot.slane %v6301_v9, 1  ;;  %v9430_v13 = vadd.f32 %v9429_v19, %v9428_v38  ;;  %v13119_v21 = vpop.f32.mrf.mxu1 }
 0x342   : > { %v9431_v2 = vpop.f32.mrf.mxu0 }
 0x343   : > { %v6368_v44 = vsel %vm1388_vm0, %v6366_v33, %v6367_v8  ;;  %v6306_v25 = vadd.f32 %v9912_v45, %v9430_v13  ;;  %v6329_v12 = vpop.f32.mrf.mxu1 }
 0x344   : > { %v9432_v18 = vpop.f32.mrf.mxu0  ;;  %v13123_v54 = vadd.f32 %v6368_v44, %v13090_v6 }
 0x345   : > { %v9433_v30 = vadd.f32 %v9432_v18, %v9431_v2  ;;  %v13125_v42 = vpop.f32.mrf.mxu1  ;;  %v6369_v14 = vrot.slane %v6306_v25, 1 }
 0x346   : > { %v9434_v28 = vpop.f32.mrf.mxu0 }
 0x347   : > { %v6309_v61 = vadd.f32 %v9913_v57, %v9433_v30  ;;  %v6332_v60 = vpop.f32.mrf.mxu1 }
 0x348   : > { %v9435_v17 = vpop.f32.mrf.mxu0 }
 0x349   : > { %v6370_v52 = vrot.slane %v6309_v61, 1  ;;  %v9436_v39 = vadd.f32 %v9435_v17, %v9434_v28  ;;  %v9490_v20 = vpop.f32.mrf.mxu1 }
 0x34a   : > { %v9437_v53 = vpop.f32.mrf.mxu0 }
 0x34b   : > { %v6371_v40 = vsel %vm1388_vm0, %v6369_v14, %v6370_v52  ;;  %v6314_v36 = vadd.f32 %v9436_v39, %v6313_v63  ;;  %v9491_v47 = vpop.f32.mrf.mxu1 }
 0x34c   : > { %v9438_v41 = vpop.f32.mrf.mxu0  ;;  %v13129_v6 = vadd.f32 %v6371_v40, %v13086_v29  ;;  %v13131_v1 = vadd.f32 %v9491_v47, %v9490_v20 }
 0x34d   : > { %v9439_v24 = vadd.f32 %v9438_v41, %v9437_v53  ;;  %v9493_v45 = vpop.f32.mrf.mxu1  ;;  %v6372_v27 = vrot.slane %v6314_v36, 1 }
 0x34e   : > { %v9440_v35 = vpop.f32.mrf.mxu0 }
 0x34f   : > { %v6317_v51 = vadd.f32 %v9439_v24, %v6316_v32  ;;  %v9494_v50 = vpop.f32.mrf.mxu1 }
 0x350   : > { %v9441_v26 = vpop.f32.mrf.mxu0 }
 0x351   : > { %v6373_v34 = vrot.slane %v6317_v51, 1  ;;  %v9442_v48 = vadd.f32 %v9441_v26, %v9440_v35  ;;  %v9496_v4 = vpop.f32.mrf.mxu1 }
 0x352   : > { %v9443_v57 = vpop.f32.mrf.mxu0 }
 0x353   : > { %v6374_v11 = vsel %vm1388_vm0, %v6372_v27, %v6373_v34  ;;  %v6322_v55 = vadd.f32 %v9916_v16, %v9442_v48  ;;  %v9497_v58 = vpop.f32.mrf.mxu1 }
 0x354   : > { %v9444_v23 = vpop.f32.mrf.mxu0  ;;  %v13135_v29 = vadd.f32 %v6374_v11, %v13100_v22 }
 0x355   : > { %v9445_v31 = vadd.f32 %v9444_v23, %v9443_v57  ;;  %v9499_v10 = vpop.f32.mrf.mxu1  ;;  %v6375_v63 = vrot.slane %v6322_v55, 1 }
 0x356   : > { %v9446_v43 = vpop.f32.mrf.mxu0 }
 0x357   : > { %v6325_v0 = vadd.f32 %v9917_v5, %v9445_v31  ;;  %v9500_v46 = vpop.f32.mrf.mxu1 }
 0x358   : > { %v9447_v49 = vpop.f32.mrf.mxu0  ;;  %v9501_v24 = vadd.f32 %v9500_v46, %v9499_v10 }
 0x359   : > { %v6376_v56 = vrot.slane %v6325_v0, 1  ;;  %v9448_v7 = vadd.f32 %v9447_v49, %v9446_v43  ;;  %v9502_v38 = vpop.f32.mrf.mxu1 }
 0x35a   : > { %v9449_v9 = vpop.f32.mrf.mxu0 }
 0x35b   : > { %v6377_v32 = vsel %vm1388_vm0, %v6375_v63, %v6376_v56  ;;  %v6330_v19 = vadd.f32 %v9448_v7, %v6329_v12  ;;  %v9503_v16 = vpop.f32.mrf.mxu1 }
 0x35c   : > { %v9450_v33 = vpop.f32.mrf.mxu0  ;;  %v13139_v8 = vadd.f32 %v6377_v32, %v13096_v62  ;;  %v9504_v63 = vadd.f32 %v9503_v16, %v9502_v38 }
 0x35d   : > { %v9451_v22 = vadd.f32 %v9450_v33, %v9449_v9  ;;  %v9505_v13 = vpop.f32.mrf.mxu1  ;;  %v6378_v18 = vrot.slane %v6330_v19, 1 }
 0x35e   : > { %v9452_v2 = vpop.f32.mrf.mxu0 }
 0x35f   : > { %v6333_v44 = vadd.f32 %v9451_v22, %v6332_v60  ;;  %v9506_v5 = vpop.f32.mrf.mxu1  ;;  %v9498_v60 = vadd.f32 %v9497_v58, %v9496_v4 }
 0x360   : > { %v9453_v25 = vpop.f32.mrf.mxu0  ;;  %v9507_v33 = vadd.f32 %v9506_v5, %v9505_v13 }
 0x361   : > { %v6379_v30 = vrot.slane %v6333_v44, 1  ;;  %v9454_v28 = vadd.f32 %v9453_v25, %v9452_v2  ;;  %v9508_v61 = vpop.f32.mrf.mxu1 }
 0x362   : > { %v9455_v17 = vpop.f32.mrf.mxu0 }
 0x363   : > { %v6380_v14 = vsel %vm1388_vm0, %v6378_v18, %v6379_v30  ;;  %v6338_v12 = vadd.f32 %v13119_v21, %v9454_v28  ;;  %v9509_v52 = vpop.f32.mrf.mxu1  ;;  %v9495_v21 = vadd.f32 %v9494_v50, %v9493_v45 }
 0x364   : > { %v9456_v39 = vpop.f32.mrf.mxu0  ;;  %v13144_v62 = vadd.f32 %v6380_v14, %v13106_v37  ;;  %v9510_v43 = vadd.f32 %v9509_v52, %v9508_v61 }
 0x365   : > { %v9457_v20 = vadd.f32 %v9456_v39, %v9455_v17  ;;  %v9511_v53 = vpop.f32.mrf.mxu1  ;;  %v6381_v35 = vrot.slane %v6338_v12, 1 }
 0x366   : > { %v9940_v40 = vpop.f32.mrf.mxu0 }
 0x367   : > { %v6341_v36 = vadd.f32 %v13125_v42, %v9457_v20  ;;  %v9512_v47 = vpop.f32.mrf.mxu1  ;;  %v6733_v26 = vadd.f32 %v9940_v40, %v9498_v60 }
 0x368   : > { %v6724_v41 = vpop.f32.mrf.mxu0 }
 0x369   : > { %v6382_v51 = vrot.slane %v6341_v36, 1  ;;  %v9514_v27 = vpop.f32.mrf.mxu1  ;;  %v6725_v37 = vadd.f32 %v13131_v1, %v6724_v41  ;;  %v6806_v42 = vrot.slane %v6733_v26, 2 }
 0x36a   : > { %v9941_v34 = vpop.f32.mrf.mxu0 }
 0x36b   : > { %v6383_v48 = vsel %vm1388_vm0, %v6381_v35, %v6382_v51  ;;  %v6736_v57 = vadd.f32 %v9941_v34, %v9501_v24  ;;  %v9515_v4 = vpop.f32.mrf.mxu1  ;;  %v6803_v0 = vrot.slane %v6725_v37, 2 }
 0x36c   : > { %v13150_v11 = vadd.f32 %v6383_v48, %v13109_v3  ;;  %v6727_v55 = vpop.f32.mrf.mxu0  ;;  %v9513_v3 = vadd.f32 %v9512_v47, %v9511_v53  ;;  %v9516_v13 = vadd.f32 %v9515_v4, %v9514_v27 }
 0x36d   : > { %v6807_v58 = vrot.slane %v6736_v57, 2  ;;  %v6728_v23 = vadd.f32 %v9495_v21, %v6727_v55  ;;  %v9517_v31 = vpop.f32.mrf.mxu1 }
 0x36e   : > { %v9944_v10 = vpop.f32.mrf.mxu0 }
 0x36f   : > { %v6808_v46 = vsel %vm1848_vm1, %v6806_v42, %v6807_v58  ;;  %v6804_v45 = vrot.slane %v6728_v23, 2  ;;  %v9518_v1 = vpop.f32.mrf.mxu1  ;;  %v6749_v7 = vadd.f32 %v9944_v10, %v9510_v43 }
 0x370   : > { %v13154_v50 = vadd.f32 %v6808_v46, %v13117_v15  ;;  %v6740_v49 = vpop.f32.mrf.mxu0  ;;  %v9519_v36 = vadd.f32 %v9518_v1, %v9517_v31 }
 0x371   : > { %v6805_v56 = vsel %vm1848_vm1, %v6803_v0, %v6804_v45  ;;  %v9520_v32 = vpop.f32.mrf.mxu1  ;;  %v6741_v22 = vadd.f32 %v9504_v63, %v6740_v49  ;;  %v6812_v18 = vrot.slane %v6749_v7, 2 }
 0x372   : > { %v13158_v9 = vadd.f32 %v6805_v56, %v13113_v59  ;;  %v9945_v19 = vpop.f32.mrf.mxu0 }
 0x373   : > { %v6752_v2 = vadd.f32 %v9945_v19, %v9513_v3  ;;  %v9521_v44 = vpop.f32.mrf.mxu1  ;;  %v6809_v16 = vrot.slane %v6741_v22, 2 }
 0x374   : > { %v6743_v25 = vpop.f32.mrf.mxu0  ;;  %v9522_v38 = vadd.f32 %v9521_v44, %v9520_v32 }
 0x375   : > { %v6813_v15 = vrot.slane %v6752_v2, 2  ;;  %v6744_v30 = vadd.f32 %v9507_v33, %v6743_v25  ;;  %v9523_v28 = vpop.f32.mrf.mxu1 }
 0x376   : > { %v9948_v61 = vpop.f32.mrf.mxu0 }
 0x377   : > { %v6814_v17 = vsel %vm1848_vm1, %v6812_v18, %v6813_v15  ;;  %v6810_v14 = vrot.slane %v6744_v30, 2  ;;  %v9524_v12 = vpop.f32.mrf.mxu1  ;;  %v6765_v20 = vadd.f32 %v9948_v61, %v9522_v38 }
 0x378   : > { %v13162_v59 = vadd.f32 %v6814_v17, %v13129_v6  ;;  %v6756_v52 = vpop.f32.mrf.mxu0  ;;  %v9525_v5 = vadd.f32 %v9524_v12, %v9523_v28 }
 0x379   : > { %v6811_v39 = vsel %vm1848_vm1, %v6809_v16, %v6810_v14  ;;  %v9526_v40 = vpop.f32.mrf.mxu1  ;;  %v6757_v47 = vadd.f32 %v9516_v13, %v6756_v52  ;;  %v6818_v51 = vrot.slane %v6765_v20, 2 }
 0x37a   : > { %v13166_v53 = vadd.f32 %v6811_v39, %v13123_v54  ;;  %v9949_v60 = vpop.f32.mrf.mxu0 }
 0x37b   : > { %v6768_v41 = vadd.f32 %v9949_v60, %v9525_v5  ;;  %v9527_v24 = vpop.f32.mrf.mxu1  ;;  %v6815_v27 = vrot.slane %v6757_v47, 2 }
 0x37c   : > { %v6759_v35 = vpop.f32.mrf.mxu0  ;;  %v9528_v55 = vadd.f32 %v9527_v24, %v9526_v40 }
 0x37d   : > { %v6819_v6 = vrot.slane %v6768_v41, 2  ;;  %v6760_v26 = vadd.f32 %v9519_v36, %v6759_v35  ;;  %v9529_v34 = vpop.f32.mrf.mxu1  ;;  %v13189_v41 = vld [vmem:[%s13292_s5] ss:$0 sm:$0xff] }
 0x37e   : > { %v9952_v21 = vpop.f32.mrf.mxu0 }
 0x37f   : > { %v6820_v48 = vsel %vm1848_vm1, %v6818_v51, %v6819_v6  ;;  %v6816_v37 = vrot.slane %v6760_v26, 2  ;;  %v9530_v54 = vpop.f32.mrf.mxu1  ;;  %v13194_v26 = vstv %s8402_s21  ;;  %s10578_s21 = scalar_lea.vmem %s10577_s20, 2048 }
 0x380   : > { %v13170_v57 = vadd.f32 %v6820_v48, %v13139_v8  ;;  %v6772_v4 = vpop.f32.mrf.mxu0  ;;  %v9531_v10 = vadd.f32 %v9530_v54, %v9529_v34  ;;  %p10580_p0 = scmp.lt.s32.totalorder %s10578_s21, %s10572_s17 }
 0x381   : > { %v6817_v42 = vsel %vm1848_vm1, %v6815_v27, %v6816_v37  ;;  %v9532_v23 = vpop.f32.mrf.mxu1  ;;  %v6773_v43 = vadd.f32 %v9528_v55, %v6772_v4 }
 0x382   : > { %v13174_v58 = vadd.f32 %v6817_v42, %v13135_v29  ;;  %v9953_v31 = vpop.f32.mrf.mxu0  ;;  %p10581_p1 = por %p10580_p0, %p10579_p13 }
 0x383   : > { %v9533_v0 = vpop.f32.mrf.mxu1  ;;  %v6821_v3 = vrot.slane %v6773_v43, 2 }
 0x384   : > { %v6775_v46 = vpop.f32.mrf.mxu0  ;;  %v9534_v45 = vadd.f32 %v9533_v0, %v9532_v23  ;;  %p10582_p2 = pnand %p10581_p1, %p10575_p12 }
 0x385   : > { %v6776_v1 = vadd.f32 %v9531_v10, %v6775_v46  ;;  %v9535_v49 = vpop.f32.mrf.mxu1 }
 0x386   : > { %v9570_v63 = vpop.f32.mrf.mxu0  ;;  %v6781_v8 = vadd.f32 %v9952_v21, %v9534_v45 }
 0x387   : > { %v6822_v56 = vrot.slane %v6776_v1, 2  ;;  %v9536_v7 = vpop.f32.mrf.mxu1 }
 0x388   : > { %v9571_v32 = vpop.f32.mrf.mxu0  ;;  %v9537_v19 = vadd.f32 %v9536_v7, %v9535_v49  ;;  %v6824_v30 = vrot.slane %v6781_v8, 2 }
 0x389   : > { %v6823_v33 = vsel %vm1848_vm1, %v6821_v3, %v6822_v56  ;;  %v9972_v22 = vpop.f32.mrf.mxu1  ;;  %v9572_v25 = vadd.f32 %v9571_v32, %v9570_v63 }
 0x38a   : > { %v13178_v29 = vadd.f32 %v6823_v33, %v13144_v62  ;;  %v9573_v2 = vpop.f32.mrf.mxu0  ;;  %v6784_v44 = vadd.f32 %v9953_v31, %v9537_v19 }
 0x38b   : > { %v7167_v18 = vpop.f32.mrf.mxu1 }
 0x38c   : > { %v9574_v15 = vpop.f32.mrf.mxu0  ;;  %v6825_v28 = vrot.slane %v6784_v44, 2  ;;  %v7168_v14 = vadd.f32 %v9572_v25, %v7167_v18 }
 0x38d   : > { %v9575_v61 = vadd.f32 %v9574_v15, %v9573_v2  ;;  %v9973_v38 = vpop.f32.mrf.mxu1 }
 0x38e   : > { %v9576_v16 = vpop.f32.mrf.mxu0  ;;  %v6826_v17 = vsel %vm1848_vm1, %v6824_v30, %v6825_v28  ;;  %v7246_v40 = vrot.slane %v7168_v14, 3 }
 0x38f   : > { %v13182_v12 = vadd.f32 %v6826_v17, %v13150_v11  ;;  %v7170_v62 = vpop.f32.mrf.mxu1 }
 0x390   : > { %v9577_v52 = vpop.f32.mrf.mxu0  ;;  %v7171_v13 = vadd.f32 %v9575_v61, %v7170_v62 }
 0x391   : > { %v9578_v5 = vadd.f32 %v9577_v52, %v9576_v16  ;;  %v9976_v39 = vpop.f32.mrf.mxu1 }
 0x392   : > { %v9579_v20 = vpop.f32.mrf.mxu0  ;;  %v7247_v60 = vrot.slane %v7171_v13, 3 }
 0x393   : > { %v7176_v11 = vadd.f32 %v9972_v22, %v9578_v5  ;;  %v7183_v51 = vpop.f32.mrf.mxu1 }
 0x394   : > { %v9580_v36 = vpop.f32.mrf.mxu0  ;;  %v7248_v47 = vsel %vm5054_vm7, %v7246_v40, %v7247_v60 }
 0x395   : > { %v9581_v24 = vadd.f32 %v9580_v36, %v9579_v20  ;;  %v7278_v35 = vadd.f32 %v7248_v47, %v13158_v9  ;;  %v7249_v48 = vrot.slane %v7176_v11, 3  ;;  %v9977_v55 = vpop.f32.mrf.mxu1 }
 0x396   : > { %v9582_v6 = vpop.f32.mrf.mxu0 }
 0x397   : > { %v7179_v34 = vadd.f32 %v9973_v38, %v9581_v24  ;;  %v7293_v21 = vadd.f32 %v13189_v41, %v7278_v35  ;;  %v7186_v45 = vpop.f32.mrf.mxu1 }
 0x398   : > { %v9583_v27 = vpop.f32.mrf.mxu0 }
 0x399   : > { %v7250_v37 = vrot.slane %v7179_v34, 3  ;;  %v9584_v54 = vadd.f32 %v9583_v27, %v9582_v6  ;;  %vm7301_vm0 = vcmp.ge.f32.partialorder %v7293_v21, 0.0  ;;  %v7311_v4 = vmul.f32 %v13194_v26, %v7293_v21  ;;  %v9980_v32 = vpop.f32.mrf.mxu1 }
 0x39a   : > { %v9585_v42 = vpop.f32.mrf.mxu0 }
 0x39b   : > { %v7251_v9 = vsel %vm5054_vm7, %v7249_v48, %v7250_v37  ;;  %v7319_v23 = vsel %vm7301_vm0, %v7293_v21, %v7311_v4  ;;  %v7184_v43 = vadd.f32 %v9584_v54, %v7183_v51  ;;  %v7199_v18 = vpop.f32.mrf.mxu1 }
 0x39c   : > { %v7279_v31 = vadd.f32 %v7251_v9, %v13154_v50  ;;  %v9586_v10 = vpop.f32.mrf.mxu0  ;;  %7327 = vst [vmem:[%s13200_s13] sm:$0xff] %v7319_v23 }
 0x39d   : > { %v9587_v0 = vadd.f32 %v9586_v10, %v9585_v42  ;;  %v7252_v3 = vrot.slane %v7184_v43, 3  ;;  %v9981_v62 = vpop.f32.mrf.mxu1 }
 0x39e   : > { %v7294_v46 = vadd.f32 %v13189_v41, %v7279_v31  ;;  %v9588_v1 = vpop.f32.mrf.mxu0 }
 0x39f   : > { %v7187_v49 = vadd.f32 %v9587_v0, %v7186_v45  ;;  %v7202_v60 = vpop.f32.mrf.mxu1 }
 0x3a0   : > { %vm7302_vm1 = vcmp.ge.f32.partialorder %v7294_v46, 0.0  ;;  %v7312_v63 = vmul.f32 %v13194_v26, %v7294_v46  ;;  %v9589_v8 = vpop.f32.mrf.mxu0 }
 0x3a1   : > { %v7253_v56 = vrot.slane %v7187_v49, 3  ;;  %v9590_v50 = vadd.f32 %v9589_v8, %v9588_v1  ;;  %v9984_v51 = vpop.f32.mrf.mxu1 }
 0x3a2   : > { %v7320_v7 = vsel %vm7302_vm1, %v7294_v46, %v7312_v63  ;;  %v9591_v19 = vpop.f32.mrf.mxu0 }
 0x3a3   : > { %7328 = vst [vmem:[%s13200_s13 + $0x8] sm:$0xff] %v7320_v7  ;;  %v7254_v33 = vsel %vm5054_vm7, %v7252_v3, %v7253_v56  ;;  %v7192_v44 = vadd.f32 %v9976_v39, %v9590_v50  ;;  %v7215_v4 = vpop.f32.mrf.mxu1 }
 0x3a4   : > { %v7280_v22 = vadd.f32 %v7254_v33, %v13166_v53  ;;  %v9592_v2 = vpop.f32.mrf.mxu0 }
 0x3a5   : > { %v9593_v25 = vadd.f32 %v9592_v2, %v9591_v19  ;;  %v7255_v16 = vrot.slane %v7192_v44, 3  ;;  %v9985_v0 = vpop.f32.mrf.mxu1 }
 0x3a6   : > { %v7295_v15 = vadd.f32 %v13189_v41, %v7280_v22  ;;  %v9594_v30 = vpop.f32.mrf.mxu0 }
 0x3a7   : > { %v7195_v28 = vadd.f32 %v9977_v55, %v9593_v25  ;;  %v7218_v56 = vpop.f32.mrf.mxu1 }
 0x3a8   : > { %vm7303_vm9 = vcmp.ge.f32.partialorder %v7295_v15, 0.0  ;;  %v7313_v61 = vmul.f32 %v13194_v26, %v7295_v15  ;;  %v9595_v38 = vpop.f32.mrf.mxu0 }
 0x3a9   : > { %v7256_v17 = vrot.slane %v7195_v28, 3  ;;  %v9596_v14 = vadd.f32 %v9595_v38, %v9594_v30 }
 0x3aa   : > { %v7321_v52 = vsel %vm7303_vm9, %v7295_v15, %v7313_v61  ;;  %v9597_v13 = vpop.f32.mrf.mxu0 }
 0x3ab   : > { %7329 = vst [vmem:[%s13200_s13 + $0x10] sm:$0xff] %v7321_v52  ;;  %v7257_v53 = vsel %vm5054_vm7, %v7255_v16, %v7256_v17  ;;  %v7200_v20 = vadd.f32 %v9596_v14, %v7199_v18 }
 0x3ac   : > { %v7281_v5 = vadd.f32 %v7257_v53, %v13162_v59  ;;  %v9598_v39 = vpop.f32.mrf.mxu0 }
 0x3ad   : > { %v9599_v40 = vadd.f32 %v9598_v39, %v9597_v13  ;;  %v7258_v6 = vrot.slane %v7200_v20, 3 }
 0x3ae   : > { %v7296_v36 = vadd.f32 %v13189_v41, %v7281_v5  ;;  %v9600_v47 = vpop.f32.mrf.mxu0 }
 0x3af   : > { %v7203_v11 = vadd.f32 %v9599_v40, %v7202_v60 }
 0x3b0   : > { %vm7304_vm10 = vcmp.ge.f32.partialorder %v7296_v36, 0.0  ;;  %v7314_v24 = vmul.f32 %v13194_v26, %v7296_v36  ;;  %v9601_v35 = vpop.f32.mrf.mxu0 }
 0x3b1   : > { %v7259_v34 = vrot.slane %v7203_v11, 3  ;;  %v9602_v21 = vadd.f32 %v9601_v35, %v9600_v47 }
 0x3b2   : > { %v7322_v27 = vsel %vm7304_vm10, %v7296_v36, %v7314_v24  ;;  %v9603_v48 = vpop.f32.mrf.mxu0 }
 0x3b3   : > { %7330 = vst [vmem:[%s13200_s13 + $0x18] sm:$0xff] %v7322_v27  ;;  %v7260_v59 = vsel %vm5054_vm7, %v7258_v6, %v7259_v34  ;;  %v7208_v55 = vadd.f32 %v9980_v32, %v9602_v21 }
 0x3b4   : > { %v7282_v37 = vadd.f32 %v7260_v59, %v13174_v58  ;;  %v9604_v54 = vpop.f32.mrf.mxu0 }
 0x3b5   : > { %v9605_v42 = vadd.f32 %v9604_v54, %v9603_v48  ;;  %v7261_v46 = vrot.slane %v7208_v55, 3 }
 0x3b6   : > { %v7297_v9 = vadd.f32 %v13189_v41, %v7282_v37  ;;  %v9606_v23 = vpop.f32.mrf.mxu0 }
 0x3b7   : > { %v7211_v31 = vadd.f32 %v9981_v62, %v9605_v42 }
 0x3b8   : > { %vm7305_vm11 = vcmp.ge.f32.partialorder %v7297_v9, 0.0  ;;  %v7315_v10 = vmul.f32 %v13194_v26, %v7297_v9  ;;  %v9607_v43 = vpop.f32.mrf.mxu0 }
 0x3b9   : > { %v7262_v45 = vrot.slane %v7211_v31, 3  ;;  %v9608_v1 = vadd.f32 %v9607_v43, %v9606_v23 }
 0x3ba   : > { %v7323_v49 = vsel %vm7305_vm11, %v7297_v9, %v7315_v10  ;;  %v9609_v63 = vpop.f32.mrf.mxu0 }
 0x3bb   : > { %7331 = vst [vmem:[%s13200_s13 + $0x20] sm:$0xff] %v7323_v49  ;;  %v7263_v58 = vsel %vm5054_vm7, %v7261_v46, %v7262_v45  ;;  %v7216_v50 = vadd.f32 %v9608_v1, %v7215_v4 }
 0x3bc   : > { %v7283_v8 = vadd.f32 %v7263_v58, %v13170_v57  ;;  %v9610_v3 = vpop.f32.mrf.mxu0 }
 0x3bd   : > { %v9611_v7 = vadd.f32 %v9610_v3, %v9609_v63  ;;  %v7264_v44 = vrot.slane %v7216_v50, 3 }
 0x3be   : > { %v7298_v32 = vadd.f32 %v13189_v41, %v7283_v8  ;;  %v9612_v19 = vpop.f32.mrf.mxu0 }
 0x3bf   : > { %v7219_v33 = vadd.f32 %v9611_v7, %v7218_v56 }
 0x3c0   : > { %vm7306_vm12 = vcmp.ge.f32.partialorder %v7298_v32, 0.0  ;;  %v7316_v22 = vmul.f32 %v13194_v26, %v7298_v32  ;;  %v9613_v2 = vpop.f32.mrf.mxu0 }
 0x3c1   : > { %v7265_v25 = vrot.slane %v7219_v33, 3  ;;  %v9614_v18 = vadd.f32 %v9613_v2, %v9612_v19 }
 0x3c2   : > { %v7324_v15 = vsel %vm7306_vm12, %v7298_v32, %v7316_v22  ;;  %v9615_v30 = vpop.f32.mrf.mxu0 }
 0x3c3   : > { %7332 = vst [vmem:[%s13200_s13 + $0x28] sm:$0xff] %v7324_v15  ;;  %v7266_v57 = vsel %vm5054_vm7, %v7264_v44, %v7265_v25  ;;  %v7224_v38 = vadd.f32 %v9984_v51, %v9614_v18 }
 0x3c4   : > { %v7284_v28 = vadd.f32 %v7266_v57, %v13178_v29  ;;  %v9616_v61 = vpop.f32.mrf.mxu0 }
 0x3c5   : > { %v9617_v16 = vadd.f32 %v9616_v61, %v9615_v30  ;;  %v7267_v52 = vrot.slane %v7224_v38, 3 }
 0x3c6   : > { %v7299_v17 = vadd.f32 %v13189_v41, %v7284_v28 }
 0x3c7   : > { %v7227_v14 = vadd.f32 %v9985_v0, %v9617_v16 }
 0x3c8   : > { %vm7307_vm13 = vcmp.ge.f32.partialorder %v7299_v17, 0.0  ;;  %v7317_v62 = vmul.f32 %v13194_v26, %v7299_v17 }
 0x3c9   : > { %v7268_v13 = vrot.slane %v7227_v14, 3 }
 0x3ca   : > { %v7325_v53 = vsel %vm7307_vm13, %v7299_v17, %v7317_v62 }
 0x3cb   : > { %7333 = vst [vmem:[%s13200_s13 + $0x30] sm:$0xff] %v7325_v53  ;;  %v7269_v5 = vsel %vm5054_vm7, %v7267_v52, %v7268_v13 }
 0x3cc   : > { %v7285_v29 = vadd.f32 %v7269_v5, %v13182_v12 }
 0x3ce   : > { %v7300_v39 = vadd.f32 %v13189_v41, %v7285_v29 }
 0x3d0   : > { %vm7308_vm14 = vcmp.ge.f32.partialorder %v7300_v39, 0.0  ;;  %v7318_v20 = vmul.f32 %v13194_v26, %v7300_v39 }
 0x3d2   : > { %v7326_v40 = vsel %vm7308_vm14, %v7300_v39, %v7318_v20 }
 0x3d3   : > { %7334 = vst [vmem:[%s13200_s13 + $0x38] sm:$0xff] %v7326_v40 }
 0x3d4   : > { %10585 = shalt.err (!%p10582_p2)
}
 0x3d5   : > { %s10586_s22 = scalar_lea.hbm %s13240_s16, 1024  ;;  %s10590_s8 = scalar_lea.hbm %s13294_s7, 2048 }
 0x3d6   : > { %p10587_p3 = scmp.ne.s32.totalorder %s13240_s16, %s10586_s22  ;;  %p10591_p8 = scmp.lt.s32.totalorder %s13240_s16, %s13294_s7 }
 0x3d7   : > { %p10592_p9 = scmp.lt.s32.totalorder %s10590_s8, %s10586_s22 }
 0x3d8   : > { %p10588_p4 = pnand %p10587_p3, %p10721_p5 }
 0x3d9   : > { %p10593_p10 = por %p10592_p9, %p10591_p8 }
 0x3da   : > { %p10589_p7 = pneg %p10588_p4 }
 0x3dc   : > { %p10594_p11 = pnand %p10593_p10, %p10589_p7 }
 0x3de   : > { %10597 = shalt.err (!%p10594_p11)
}
 0x3df   : > { %s10641_s14 = smov 128   ;;  %s10642_s15 = smov 8  }
 0x3e0   : > { %9990 = dma.vmem_to_hbm [thread:$0]  (%p10721_p5), %s13242_s9, 1024, %s13240_s16, %s13247_s28, %s10641_s14, %s10641_s14, %s10642_s15  }
 0x3e1 PF: > { %p10002_p12 = scmp.ge.s32.totalorder %s10636_s27, 2  ;;  %s7364_s17 = sand.u32 1, %s10624_s24  }
 0x3e2   : > { %s7365_s18 = scalar_lea.sflag [#allocation5], %s7364_s17 }
 0x3e3   : > { %p9997_p13 = pnand %p10002_p12, %p10725_p6 }
 0x3e5   : > { %p9998_p0 = pneg %p9997_p13 }
 0x3e7   : > { %10619 = dma.done.wait (%p9998_p0), %s7365_s18, 1024  }
 0x3e8   : > { %10621 = vsyncadd (%p9998_p0), %s7365_s18, 4294966272  ;;  %p18_p1 = scmp.ge.s32.totalorder %s10708_s30, 4   ;;  %s13306_s24 = smov %s10628_s25 }
 0x3e9   : > { %s13307_s25 = smov %s10632_s26  ;;  %s13308_s26 = smov %s10719_s10 }
 0x3ea   : > { %s13309_s27 = smov %s10708_s30  ;;  %20 = sbr.rel (!%p18_p1) target bundleno = 4 (0x4), region = 103 }
 0x3ef   :  { %7370 = vsyncpa [#allocation5], 1 }
 0x3f0   :  { %7372 = vsyncpa [#allocation5 + $0x1], 1 }
 0x3f1   :  { %7373 = vsyncpa [#allocation6], 1 }
 0x3f2   :  { %7375 = vsyncpa [#allocation6 + $0x1], 1 }

</bundles_post_ra>
